<compile_context>
chip_gen: v5e
topology: v5e:2x2
jax: 0.10.0
libtpu: 0.0.40
codegen_flags: <defaults>
</compile_context>

<pallas_src>
import functools

import numpy as np
import jax
import jax.numpy as jnp
from jax import lax
from jax.experimental import pallas as pl
from jax.experimental.pallas import tpu as pltpu


def _round_up(n, m):
    return (n + m - 1) // m * m


def _pick_vmem_limit():
    """Generation-aware scoped-VMEM limit: ~75% of physical, capped at 100 MiB."""
    try:
        cap = pltpu.get_tpu_info().vmem_capacity_bytes
    except Exception:
        cap = 64 * 1024 * 1024          # conservative fallback (v7x-sized)
    return int(min(cap * 3 // 4, 100 * 1024 * 1024))


# ------------------------------------------------------------------ fused forward kernel
def _deformable_attn_kernel(x_ref, g_ref, wqkv_ref, bqkv_ref, wp_ref, bp_ref,
                            o_ref, attn_ref, *, num_heads, head_dim,
                            sample_ratio, sr_pad, dim, batch_block):
    sr, srp, C, hd = sample_ratio, sr_pad, dim, head_dim
    q_off = 2 * srp
    k_off = q_off + C
    v_off = k_off + C

    for bb in range(batch_block):                      # static; batch_block=1 at demo size
        x = x_ref[bb]                                  # (C, HW) bf16

        # One MXU matmul for [sample_q | sample_k | q*scale | k | v] (rows = out channels,
        # segments 8-sublane aligned).  bf16 operands, f32 accumulation, f32 bias add.
        qkv = jnp.dot(wqkv_ref[...], x, preferred_element_type=jnp.float32)
        qkv = qkv + bqkv_ref[...]                      # (Rtot, HW) f32

        def gate(logits, noise):
            # gumbel-softmax over the channel rows (tau=1, hard=False), keep row 0.
            z = logits + noise                         # (sr, HW) f32
            z = z - jnp.max(z, axis=0, keepdims=True)
            e = jnp.exp(z)
            return e[0:1, :] * pl.reciprocal(jnp.sum(e, axis=0, keepdims=True),
                                             approx=True)            # (1, HW)

        sq = gate(qkv[0:sr, :], g_ref[bb, 0:sr, :])
        sk = gate(qkv[srp:srp + sr, :], g_ref[bb, srp:srp + sr, :])

        q = qkv[q_off:q_off + C, :] * sq               # head_dim**-0.5 folded into W_q/b_q
        k = qkv[k_off:k_off + C, :] * sk
        v = qkv[v_off:v_off + C, :]                    # = shortcut (kept f32 for residual)

        # TODO(synk): flash-tile this loop over the KV (lane) axis for production HW.
        for h in range(num_heads):                     # static unroll; num_heads is small
            lo = h * hd
            qh = q[lo:lo + hd, :].astype(jnp.bfloat16)     # (hd, HW)
            kh = k[lo:lo + hd, :].astype(jnp.bfloat16)
            vh = v[lo:lo + hd, :].astype(jnp.bfloat16)
            # s[i, j] = sum_d qh[d, i] * kh[d, j]
            s = lax.dot_general(qh, kh, (((0,), (0,)), ((), ())),
                                preferred_element_type=jnp.float32)  # (HW, HW) f32
            s = s - jnp.max(s, axis=-1, keepdims=True)
            p = jnp.exp(s)
            p = p * pl.reciprocal(jnp.sum(p, axis=-1, keepdims=True), approx=True)
            # o[d, i] = sum_j vh[d, j] * p[i, j]  -> lane-dense (hd, HW)
            oh = lax.dot_general(vh, p.astype(jnp.bfloat16), (((1,), (1,)), ((), ())),
                                 preferred_element_type=jnp.float32)
            attn_ref[lo:lo + hd, :] = oh               # sublane-aligned scratch write

        gated = sq * attn_ref[...] + (1.0 - sq) * v    # (C, HW) f32 gated residual mix
        o_ref[bb] = jnp.dot(wp_ref[...], gated.astype(jnp.bfloat16),
                            preferred_element_type=jnp.float32) + bp_ref[...]


# ---------------------------------------------------------------------------- parameters
def prepare_fused_params(params, num_heads, sample_ratio):
    """Fold the attention scale into W_q/b_q, stack all pre-attention 1x1 convs into one
    8-sublane-aligned slab (rows = output channels), and store matmul weights in bf16."""
    C = params["q_w"].shape[0]
    assert C % num_heads == 0
    hd = C // num_heads
    scale = float(hd) ** (-0.5)
    srp = _round_up(sample_ratio, 8)

    def pad_rows(w, rows):
        return jnp.pad(w, ((0, rows - w.shape[0]), (0, 0)))

    def pad_vec(b, rows):
        return jnp.pad(b, (0, rows - b.shape[0]))

    w_all = jnp.concatenate([pad_rows(params["sq_w"], srp),
                             pad_rows(params["sk_w"], srp),
                             params["q_w"] * scale,
                             params["k_w"],
                             params["v_w"]], axis=0)                 # (2srp+3C, C)
    b_all = jnp.concatenate([pad_vec(params["sq_b"], srp),
                             pad_vec(params["sk_b"], srp),
                             params["q_b"] * scale,
                             params["k_b"],
                             params["v_b"]], axis=0)
    rtot = w_all.shape[0]
    rpad = _round_up(rtot, 8)
    w_all = jnp.pad(w_all, ((0, rpad - rtot), (0, 0)))
    b_all = jnp.pad(b_all, (0, rpad - rtot)).reshape(rpad, 1)

    return dict(w_all=w_all.astype(jnp.bfloat16),
                b_all=b_all.astype(jnp.float32),
                wp=params["proj_w"].astype(jnp.bfloat16),
                bp=params["proj_b"].reshape(C, 1).astype(jnp.float32))


# ------------------------------------------------------------------------------- wrapper
def deformable_attention_forward(x_nchw, fused, noise, *, num_heads, sample_ratio,
                                 batch_block=1):
    B, C, H, W = x_nchw.shape
    HW = H * W
    hd = C // num_heads
    srp = _round_up(sample_ratio, 8)
    rpad = fused["w_all"].shape[0]
    assert B % batch_block == 0

    x = x_nchw.reshape(B, C, HW).astype(jnp.bfloat16)   # free reshape, no transpose

    kernel = functools.partial(_deformable_attn_kernel,
                               num_heads=num_heads, head_dim=hd,
                               sample_ratio=sample_ratio, sr_pad=srp, dim=C,
                               batch_block=batch_block)
    out = pl.pallas_call(
        kernel,
        out_shape=jax.ShapeDtypeStruct((B, C, HW), jnp.float32),
        grid=(B // batch_block,),
        in_specs=[
            pl.BlockSpec((batch_block, C, HW), lambda b: (b, 0, 0)),        # x (bf16)
            pl.BlockSpec((batch_block, 2 * srp, HW), lambda b: (b, 0, 0)),  # packed gumbel noise
            pl.BlockSpec((rpad, C), lambda b: (0, 0)),                      # fused W (bf16)
            pl.BlockSpec((rpad, 1), lambda b: (0, 0)),                      # fused b (f32)
            pl.BlockSpec((C, C), lambda b: (0, 0)),                         # proj W (bf16)
            pl.BlockSpec((C, 1), lambda b: (0, 0)),                         # proj b (f32)
        ],
        out_specs=pl.BlockSpec((batch_block, C, HW), lambda b: (b, 0, 0)),
        scratch_shapes=[pltpu.VMEM((C, HW), jnp.float32)],                  # head outputs
        compiler_params=pltpu.CompilerParams(
            dimension_semantics=("parallel",),
            vmem_limit_bytes=_pick_vmem_limit()),
    )(x, noise, fused["w_all"], fused["b_all"], fused["wp"], fused["bp"])

    return out.reshape(B, C, H, W)                      # free reshape, no transpose


# -------------------------------------------------------------------- init & reference
def init_params(key, dim, sample_ratio):
    ks = jax.random.split(key, 12)

    def conv_init(kw, kb, cin, cout):                   # torch Conv2d default init
        bound = 1.0 / np.sqrt(cin)
        w = jax.random.uniform(kw, (cout, cin), jnp.float32, -bound, bound)
        b = jax.random.uniform(kb, (cout,), jnp.float32, -bound, bound)
        return w, b

    p = {}
    p["sq_w"], p["sq_b"] = conv_init(ks[0], ks[1], dim, sample_ratio)
    p["sk_w"], p["sk_b"] = conv_init(ks[2], ks[3], dim, sample_ratio)
    p["q_w"], p["q_b"] = conv_init(ks[4], ks[5], dim, dim)
    p["k_w"], p["k_b"] = conv_init(ks[6], ks[7], dim, dim)
    p["v_w"], p["v_b"] = conv_init(ks[8], ks[9], dim, dim)
    p["proj_w"], p["proj_b"] = conv_init(ks[10], ks[11], dim, dim)
    return p


def reference_forward(x_nchw, params, noise, num_heads, sample_ratio, sr_pad):
    """Pure-JAX f32 HIGHEST-precision mirror of the PyTorch module (same gumbel noise)."""
    B, C, H, W = x_nchw.shape
    HW = H * W
    hd = C // num_heads
    scale = float(hd) ** (-0.5)
    hp = jax.lax.Precision.HIGHEST
    x = x_nchw.reshape(B, C, HW)

    def conv(w, b, inp):
        return jnp.einsum('oc,bcn->bon', w, inp, precision=hp) + b[None, :, None]

    gq = noise[:, 0:sample_ratio]
    gk = noise[:, sr_pad:sr_pad + sample_ratio]
    sq = jax.nn.softmax(conv(params["sq_w"], params["sq_b"], x) + gq, axis=1)[:, 0:1]
    sk = jax.nn.softmax(conv(params["sk_w"], params["sk_b"], x) + gk, axis=1)[:, 0:1]
    q = conv(params["q_w"], params["q_b"], x) * sq
    k = conv(params["k_w"], params["k_b"], x) * sk
    v = conv(params["v_w"], params["v_b"], x)
    qh = q.reshape(B, num_heads, hd, HW)
    kh = k.reshape(B, num_heads, hd, HW)
    vh = v.reshape(B, num_heads, hd, HW)
    s = jnp.einsum('bhdi,bhdj->bhij', qh * scale, kh, precision=hp)
    p = jax.nn.softmax(s, axis=-1)
    o = jnp.einsum('bhij,bhdj->bhdi', p, vh, precision=hp).reshape(B, C, HW)
    out = conv(params["proj_w"], params["proj_b"], sq * o + (1.0 - sq) * v)
    return out.reshape(B, C, H, W)


# ------------------------------------------------------------------------------- main
if __name__ == "__main__":
    B, dim, H, W = 2, 32, 16, 16
    num_heads, sample_ratio = 4, 4
    HW = H * W
    srp = _round_up(sample_ratio, 8)

    key = jax.random.PRNGKey(0)
    k_x, k_p, k_g = jax.random.split(key, 3)
    x = jax.random.normal(k_x, (B, dim, H, W), jnp.float32)          # torch NCHW input
    params = init_params(k_p, dim, sample_ratio)
    # Packed gumbel noise: rows [0:sr] -> sample_q gate, rows [srp:srp+sr] -> sample_k gate.
    noise = jax.random.gumbel(k_g, (B, 2 * srp, HW), jnp.float32)

    fused = prepare_fused_params(params, num_heads, sample_ratio)

    fwd = jax.jit(functools.partial(deformable_attention_forward,
                                    num_heads=num_heads, sample_ratio=sample_ratio,
                                    batch_block=1))
    y = jax.block_until_ready(fwd(x, fused, noise))

    assert y.shape == (B, dim, H, W), y.shape
    assert bool(jnp.all(jnp.isfinite(y)))

    y_ref = reference_forward(x, params, noise, num_heads, sample_ratio, srp)
    err = jnp.abs(y - y_ref)
    max_err, mean_err = float(jnp.max(err)), float(jnp.mean(err))
    # bf16 MXU operands + approx reciprocals vs. an f32 HIGHEST-precision reference:
    # expected max error ~1e-2 at these shapes.
    assert max_err < 1e-1 and mean_err < 1e-2, (max_err, mean_err)

    print("KERNEL_OK")
</pallas_src>

<mosaic_0001>
module attributes {stable_mosaic.version = 11 : i64} {
  func.func @_deformable_attn_kernel(%arg0: i32, %arg1: memref<1x32x256xbf16, #tpu.memory_space<vmem>>, %arg2: memref<1x16x256xf32, #tpu.memory_space<vmem>>, %arg3: memref<112x32xbf16, #tpu.memory_space<vmem>>, %arg4: memref<112x1xf32, #tpu.memory_space<vmem>>, %arg5: memref<32x32xbf16, #tpu.memory_space<vmem>>, %arg6: memref<32x1xf32, #tpu.memory_space<vmem>>, %arg7: memref<1x32x256xf32, #tpu.memory_space<vmem>>, %arg8: memref<32x256xf32, #tpu.memory_space<vmem>>) attributes {dimension_semantics = [#tpu.dimension_semantics<parallel>], iteration_bounds = array<i64: 2>, scalar_prefetch = 0 : i64, scratch_operands = 1 : i64, tpu.core_type = #tpu.core_type<tc>, window_params = [{transform_indices = @transform_0, window_bounds = array<i64: 1, 32, 256>}, {transform_indices = @transform_1, window_bounds = array<i64: 1, 16, 256>}, {pipeline_mode = #tpu.pipeline_mode<synchronous>, transform_indices = @transform_2, window_bounds = array<i64: 112, 32>}, {pipeline_mode = #tpu.pipeline_mode<synchronous>, transform_indices = @transform_3, window_bounds = array<i64: 112, 1>}, {pipeline_mode = #tpu.pipeline_mode<synchronous>, transform_indices = @transform_4, window_bounds = array<i64: 32, 32>}, {pipeline_mode = #tpu.pipeline_mode<synchronous>, transform_indices = @transform_5, window_bounds = array<i64: 32, 1>}, {transform_indices = @transform_6, window_bounds = array<i64: 1, 32, 256>}]} {
    %c0 = arith.constant 0 : index
    %c0_0 = arith.constant 0 : index
    %c0_1 = arith.constant 0 : index
    %0 = vector.load %arg1[%c0, %c0_0, %c0_1] : memref<1x32x256xbf16, #tpu.memory_space<vmem>>, vector<1x32x256xbf16>
    %1 = vector.shape_cast %0 : vector<1x32x256xbf16> to vector<32x256xbf16>
    %c0_2 = arith.constant 0 : index
    %c0_3 = arith.constant 0 : index
    %2 = vector.load %arg3[%c0_2, %c0_3] : memref<112x32xbf16, #tpu.memory_space<vmem>>, vector<112x32xbf16>
    %cst = arith.constant dense<0.000000e+00> : vector<112x256xf32>
    %3 = tpu.matmul %2, %1, %cst {dimension_numbers = #tpu.dot_dimension_numbers<[1], [0], [0], [1], [0, 0, 1, 1], [], []>} : vector<112x32xbf16>, vector<32x256xbf16>, vector<112x256xf32> -> vector<112x256xf32>
    %c0_4 = arith.constant 0 : index
    %c0_5 = arith.constant 0 : index
    %4 = vector.load %arg4[%c0_4, %c0_5] : memref<112x1xf32, #tpu.memory_space<vmem>>, vector<112x1xf32>
    %5 = vector.broadcast %4 : vector<112x1xf32> to vector<112x256xf32>
    %6 = arith.addf %3, %5 : vector<112x256xf32>
    %7 = vector.extract_strided_slice %6 {offsets = [0, 0], sizes = [4, 256], strides = [1, 1]} : vector<112x256xf32> to vector<4x256xf32>
    %c0_6 = arith.constant 0 : index
    %c0_7 = arith.constant 0 : index
    %c0_8 = arith.constant 0 : index
    %8 = vector.load %arg2[%c0_6, %c0_7, %c0_8] : memref<1x16x256xf32, #tpu.memory_space<vmem>>, vector<1x4x256xf32>
    %9 = vector.shape_cast %8 : vector<1x4x256xf32> to vector<4x256xf32>
    %10 = arith.addf %7, %9 : vector<4x256xf32>
    %cst_9 = arith.constant dense<0xFF800000> : vector<256xf32>
    %11 = vector.multi_reduction <maximumf>, %10, %cst_9 [0] : vector<4x256xf32> to vector<256xf32>
    %12 = vector.shape_cast %11 : vector<256xf32> to vector<1x256xf32>
    %13 = vector.broadcast %12 : vector<1x256xf32> to vector<4x256xf32>
    %14 = arith.subf %10, %13 : vector<4x256xf32>
    %15 = math.exp %14 : vector<4x256xf32>
    %16 = vector.extract_strided_slice %15 {offsets = [0, 0], sizes = [1, 256], strides = [1, 1]} : vector<4x256xf32> to vector<1x256xf32>
    %cst_10 = arith.constant dense<0.000000e+00> : vector<256xf32>
    %17 = vector.multi_reduction <add>, %15, %cst_10 [0] : vector<4x256xf32> to vector<256xf32>
    %18 = vector.shape_cast %17 : vector<256xf32> to vector<1x256xf32>
    %19 = tpu.reciprocal %18 {approx = true} : vector<1x256xf32> -> vector<1x256xf32>
    %20 = arith.mulf %16, %19 : vector<1x256xf32>
    %21 = vector.extract_strided_slice %6 {offsets = [8, 0], sizes = [4, 256], strides = [1, 1]} : vector<112x256xf32> to vector<4x256xf32>
    %c0_11 = arith.constant 0 : index
    %c8 = arith.constant 8 : index
    %c0_12 = arith.constant 0 : index
    %22 = vector.load %arg2[%c0_11, %c8, %c0_12] : memref<1x16x256xf32, #tpu.memory_space<vmem>>, vector<1x4x256xf32>
    %23 = vector.shape_cast %22 : vector<1x4x256xf32> to vector<4x256xf32>
    %24 = arith.addf %21, %23 : vector<4x256xf32>
    %cst_13 = arith.constant dense<0xFF800000> : vector<256xf32>
    %25 = vector.multi_reduction <maximumf>, %24, %cst_13 [0] : vector<4x256xf32> to vector<256xf32>
    %26 = vector.shape_cast %25 : vector<256xf32> to vector<1x256xf32>
    %27 = vector.broadcast %26 : vector<1x256xf32> to vector<4x256xf32>
    %28 = arith.subf %24, %27 : vector<4x256xf32>
    %29 = math.exp %28 : vector<4x256xf32>
    %30 = vector.extract_strided_slice %29 {offsets = [0, 0], sizes = [1, 256], strides = [1, 1]} : vector<4x256xf32> to vector<1x256xf32>
    %cst_14 = arith.constant dense<0.000000e+00> : vector<256xf32>
    %31 = vector.multi_reduction <add>, %29, %cst_14 [0] : vector<4x256xf32> to vector<256xf32>
    %32 = vector.shape_cast %31 : vector<256xf32> to vector<1x256xf32>
    %33 = tpu.reciprocal %32 {approx = true} : vector<1x256xf32> -> vector<1x256xf32>
    %34 = arith.mulf %30, %33 : vector<1x256xf32>
    %35 = vector.extract_strided_slice %6 {offsets = [16, 0], sizes = [32, 256], strides = [1, 1]} : vector<112x256xf32> to vector<32x256xf32>
    %36 = vector.broadcast %20 : vector<1x256xf32> to vector<32x256xf32>
    %37 = arith.mulf %35, %36 : vector<32x256xf32>
    %38 = vector.extract_strided_slice %6 {offsets = [48, 0], sizes = [32, 256], strides = [1, 1]} : vector<112x256xf32> to vector<32x256xf32>
    %39 = vector.broadcast %34 : vector<1x256xf32> to vector<32x256xf32>
    %40 = arith.mulf %38, %39 : vector<32x256xf32>
    %41 = vector.extract_strided_slice %6 {offsets = [80, 0], sizes = [32, 256], strides = [1, 1]} : vector<112x256xf32> to vector<32x256xf32>
    %42 = vector.extract_strided_slice %37 {offsets = [0, 0], sizes = [8, 256], strides = [1, 1]} : vector<32x256xf32> to vector<8x256xf32>
    %43 = arith.truncf %42 : vector<8x256xf32> to vector<8x256xbf16>
    %44 = vector.extract_strided_slice %40 {offsets = [0, 0], sizes = [8, 256], strides = [1, 1]} : vector<32x256xf32> to vector<8x256xf32>
    %45 = arith.truncf %44 : vector<8x256xf32> to vector<8x256xbf16>
    %46 = vector.extract_strided_slice %41 {offsets = [0, 0], sizes = [8, 256], strides = [1, 1]} : vector<32x256xf32> to vector<8x256xf32>
    %47 = arith.truncf %46 : vector<8x256xf32> to vector<8x256xbf16>
    %cst_15 = arith.constant dense<0.000000e+00> : vector<256x256xf32>
    %48 = tpu.matmul %43, %45, %cst_15 {dimension_numbers = #tpu.dot_dimension_numbers<[0], [0], [1], [1], [0, 1, 1, 1], [], []>} : vector<8x256xbf16>, vector<8x256xbf16>, vector<256x256xf32> -> vector<256x256xf32>
    %cst_16 = arith.constant dense<0xFF800000> : vector<256xf32>
    %49 = vector.multi_reduction <maximumf>, %48, %cst_16 [1] : vector<256x256xf32> to vector<256xf32>
    %50 = vector.shape_cast %49 : vector<256xf32> to vector<256x1xf32>
    %51 = vector.broadcast %50 : vector<256x1xf32> to vector<256x256xf32>
    %52 = arith.subf %48, %51 : vector<256x256xf32>
    %53 = math.exp %52 : vector<256x256xf32>
    %cst_17 = arith.constant dense<0.000000e+00> : vector<256xf32>
    %54 = vector.multi_reduction <add>, %53, %cst_17 [1] : vector<256x256xf32> to vector<256xf32>
    %55 = vector.shape_cast %54 : vector<256xf32> to vector<256x1xf32>
    %56 = tpu.reciprocal %55 {approx = true} : vector<256x1xf32> -> vector<256x1xf32>
    %57 = vector.broadcast %56 : vector<256x1xf32> to vector<256x256xf32>
    %58 = arith.mulf %53, %57 : vector<256x256xf32>
    %59 = arith.truncf %58 : vector<256x256xf32> to vector<256x256xbf16>
    %cst_18 = arith.constant dense<0.000000e+00> : vector<8x256xf32>
    %60 = tpu.matmul %47, %59, %cst_18 {dimension_numbers = #tpu.dot_dimension_numbers<[1], [1], [0], [0], [0, 0, 1, 0], [], []>} : vector<8x256xbf16>, vector<256x256xbf16>, vector<8x256xf32> -> vector<8x256xf32>
    %c0_19 = arith.constant 0 : index
    %c0_20 = arith.constant 0 : index
    %61 = vector.load %arg8[%c0_19, %c0_20] : memref<32x256xf32, #tpu.memory_space<vmem>>, vector<8x256xf32>
    tpu.vector_store %arg8[%c0_19, %c0_20], %60 {strides = array<i32>} : memref<32x256xf32, #tpu.memory_space<vmem>>, vector<8x256xf32>,
    %62 = vector.extract_strided_slice %37 {offsets = [8, 0], sizes = [8, 256], strides = [1, 1]} : vector<32x256xf32> to vector<8x256xf32>
    %63 = arith.truncf %62 : vector<8x256xf32> to vector<8x256xbf16>
    %64 = vector.extract_strided_slice %40 {offsets = [8, 0], sizes = [8, 256], strides = [1, 1]} : vector<32x256xf32> to vector<8x256xf32>
    %65 = arith.truncf %64 : vector<8x256xf32> to vector<8x256xbf16>
    %66 = vector.extract_strided_slice %41 {offsets = [8, 0], sizes = [8, 256], strides = [1, 1]} : vector<32x256xf32> to vector<8x256xf32>
    %67 = arith.truncf %66 : vector<8x256xf32> to vector<8x256xbf16>
    %cst_21 = arith.constant dense<0.000000e+00> : vector<256x256xf32>
    %68 = tpu.matmul %63, %65, %cst_21 {dimension_numbers = #tpu.dot_dimension_numbers<[0], [0], [1], [1], [0, 1, 1, 1], [], []>} : vector<8x256xbf16>, vector<8x256xbf16>, vector<256x256xf32> -> vector<256x256xf32>
    %cst_22 = arith.constant dense<0xFF800000> : vector<256xf32>
    %69 = vector.multi_reduction <maximumf>, %68, %cst_22 [1] : vector<256x256xf32> to vector<256xf32>
    %70 = vector.shape_cast %69 : vector<256xf32> to vector<256x1xf32>
    %71 = vector.broadcast %70 : vector<256x1xf32> to vector<256x256xf32>
    %72 = arith.subf %68, %71 : vector<256x256xf32>
    %73 = math.exp %72 : vector<256x256xf32>
    %cst_23 = arith.constant dense<0.000000e+00> : vector<256xf32>
    %74 = vector.multi_reduction <add>, %73, %cst_23 [1] : vector<256x256xf32> to vector<256xf32>
    %75 = vector.shape_cast %74 : vector<256xf32> to vector<256x1xf32>
    %76 = tpu.reciprocal %75 {approx = true} : vector<256x1xf32> -> vector<256x1xf32>
    %77 = vector.broadcast %76 : vector<256x1xf32> to vector<256x256xf32>
    %78 = arith.mulf %73, %77 : vector<256x256xf32>
    %79 = arith.truncf %78 : vector<256x256xf32> to vector<256x256xbf16>
    %cst_24 = arith.constant dense<0.000000e+00> : vector<8x256xf32>
    %80 = tpu.matmul %67, %79, %cst_24 {dimension_numbers = #tpu.dot_dimension_numbers<[1], [1], [0], [0], [0, 0, 1, 0], [], []>} : vector<8x256xbf16>, vector<256x256xbf16>, vector<8x256xf32> -> vector<8x256xf32>
    %c8_25 = arith.constant 8 : index
    %c0_26 = arith.constant 0 : index
    %81 = vector.load %arg8[%c8_25, %c0_26] : memref<32x256xf32, #tpu.memory_space<vmem>>, vector<8x256xf32>
    tpu.vector_store %arg8[%c8_25, %c0_26], %80 {strides = array<i32>} : memref<32x256xf32, #tpu.memory_space<vmem>>, vector<8x256xf32>,
    %82 = vector.extract_strided_slice %37 {offsets = [16, 0], sizes = [8, 256], strides = [1, 1]} : vector<32x256xf32> to vector<8x256xf32>
    %83 = arith.truncf %82 : vector<8x256xf32> to vector<8x256xbf16>
    %84 = vector.extract_strided_slice %40 {offsets = [16, 0], sizes = [8, 256], strides = [1, 1]} : vector<32x256xf32> to vector<8x256xf32>
    %85 = arith.truncf %84 : vector<8x256xf32> to vector<8x256xbf16>
    %86 = vector.extract_strided_slice %41 {offsets = [16, 0], sizes = [8, 256], strides = [1, 1]} : vector<32x256xf32> to vector<8x256xf32>
    %87 = arith.truncf %86 : vector<8x256xf32> to vector<8x256xbf16>
    %cst_27 = arith.constant dense<0.000000e+00> : vector<256x256xf32>
    %88 = tpu.matmul %83, %85, %cst_27 {dimension_numbers = #tpu.dot_dimension_numbers<[0], [0], [1], [1], [0, 1, 1, 1], [], []>} : vector<8x256xbf16>, vector<8x256xbf16>, vector<256x256xf32> -> vector<256x256xf32>
    %cst_28 = arith.constant dense<0xFF800000> : vector<256xf32>
    %89 = vector.multi_reduction <maximumf>, %88, %cst_28 [1] : vector<256x256xf32> to vector<256xf32>
    %90 = vector.shape_cast %89 : vector<256xf32> to vector<256x1xf32>
    %91 = vector.broadcast %90 : vector<256x1xf32> to vector<256x256xf32>
    %92 = arith.subf %88, %91 : vector<256x256xf32>
    %93 = math.exp %92 : vector<256x256xf32>
    %cst_29 = arith.constant dense<0.000000e+00> : vector<256xf32>
    %94 = vector.multi_reduction <add>, %93, %cst_29 [1] : vector<256x256xf32> to vector<256xf32>
    %95 = vector.shape_cast %94 : vector<256xf32> to vector<256x1xf32>
    %96 = tpu.reciprocal %95 {approx = true} : vector<256x1xf32> -> vector<256x1xf32>
    %97 = vector.broadcast %96 : vector<256x1xf32> to vector<256x256xf32>
    %98 = arith.mulf %93, %97 : vector<256x256xf32>
    %99 = arith.truncf %98 : vector<256x256xf32> to vector<256x256xbf16>
    %cst_30 = arith.constant dense<0.000000e+00> : vector<8x256xf32>
    %100 = tpu.matmul %87, %99, %cst_30 {dimension_numbers = #tpu.dot_dimension_numbers<[1], [1], [0], [0], [0, 0, 1, 0], [], []>} : vector<8x256xbf16>, vector<256x256xbf16>, vector<8x256xf32> -> vector<8x256xf32>
    %c16 = arith.constant 16 : index
    %c0_31 = arith.constant 0 : index
    %101 = vector.load %arg8[%c16, %c0_31] : memref<32x256xf32, #tpu.memory_space<vmem>>, vector<8x256xf32>
    tpu.vector_store %arg8[%c16, %c0_31], %100 {strides = array<i32>} : memref<32x256xf32, #tpu.memory_space<vmem>>, vector<8x256xf32>,
    %102 = vector.extract_strided_slice %37 {offsets = [24, 0], sizes = [8, 256], strides = [1, 1]} : vector<32x256xf32> to vector<8x256xf32>
    %103 = arith.truncf %102 : vector<8x256xf32> to vector<8x256xbf16>
    %104 = vector.extract_strided_slice %40 {offsets = [24, 0], sizes = [8, 256], strides = [1, 1]} : vector<32x256xf32> to vector<8x256xf32>
    %105 = arith.truncf %104 : vector<8x256xf32> to vector<8x256xbf16>
    %106 = vector.extract_strided_slice %41 {offsets = [24, 0], sizes = [8, 256], strides = [1, 1]} : vector<32x256xf32> to vector<8x256xf32>
    %107 = arith.truncf %106 : vector<8x256xf32> to vector<8x256xbf16>
    %cst_32 = arith.constant dense<0.000000e+00> : vector<256x256xf32>
    %108 = tpu.matmul %103, %105, %cst_32 {dimension_numbers = #tpu.dot_dimension_numbers<[0], [0], [1], [1], [0, 1, 1, 1], [], []>} : vector<8x256xbf16>, vector<8x256xbf16>, vector<256x256xf32> -> vector<256x256xf32>
    %cst_33 = arith.constant dense<0xFF800000> : vector<256xf32>
    %109 = vector.multi_reduction <maximumf>, %108, %cst_33 [1] : vector<256x256xf32> to vector<256xf32>
    %110 = vector.shape_cast %109 : vector<256xf32> to vector<256x1xf32>
    %111 = vector.broadcast %110 : vector<256x1xf32> to vector<256x256xf32>
    %112 = arith.subf %108, %111 : vector<256x256xf32>
    %113 = math.exp %112 : vector<256x256xf32>
    %cst_34 = arith.constant dense<0.000000e+00> : vector<256xf32>
    %114 = vector.multi_reduction <add>, %113, %cst_34 [1] : vector<256x256xf32> to vector<256xf32>
    %115 = vector.shape_cast %114 : vector<256xf32> to vector<256x1xf32>
    %116 = tpu.reciprocal %115 {approx = true} : vector<256x1xf32> -> vector<256x1xf32>
    %117 = vector.broadcast %116 : vector<256x1xf32> to vector<256x256xf32>
    %118 = arith.mulf %113, %117 : vector<256x256xf32>
    %119 = arith.truncf %118 : vector<256x256xf32> to vector<256x256xbf16>
    %cst_35 = arith.constant dense<0.000000e+00> : vector<8x256xf32>
    %120 = tpu.matmul %107, %119, %cst_35 {dimension_numbers = #tpu.dot_dimension_numbers<[1], [1], [0], [0], [0, 0, 1, 0], [], []>} : vector<8x256xbf16>, vector<256x256xbf16>, vector<8x256xf32> -> vector<8x256xf32>
    %c24 = arith.constant 24 : index
    %c0_36 = arith.constant 0 : index
    %121 = vector.load %arg8[%c24, %c0_36] : memref<32x256xf32, #tpu.memory_space<vmem>>, vector<8x256xf32>
    tpu.vector_store %arg8[%c24, %c0_36], %120 {strides = array<i32>} : memref<32x256xf32, #tpu.memory_space<vmem>>, vector<8x256xf32>,
    %c0_37 = arith.constant 0 : index
    %c0_38 = arith.constant 0 : index
    %122 = vector.load %arg8[%c0_37, %c0_38] : memref<32x256xf32, #tpu.memory_space<vmem>>, vector<32x256xf32>
    %123 = vector.broadcast %20 : vector<1x256xf32> to vector<32x256xf32>
    %124 = arith.mulf %123, %122 : vector<32x256xf32>
    %cst_39 = arith.constant 1.000000e+00 : f32
    %125 = vector.broadcast %cst_39 : f32 to vector<1x256xf32>
    %126 = arith.subf %125, %20 : vector<1x256xf32>
    %127 = vector.broadcast %126 : vector<1x256xf32> to vector<32x256xf32>
    %128 = arith.mulf %127, %41 : vector<32x256xf32>
    %129 = arith.addf %124, %128 : vector<32x256xf32>
    %c0_40 = arith.constant 0 : index
    %c0_41 = arith.constant 0 : index
    %130 = vector.load %arg5[%c0_40, %c0_41] : memref<32x32xbf16, #tpu.memory_space<vmem>>, vector<32x32xbf16>
    %131 = arith.truncf %129 : vector<32x256xf32> to vector<32x256xbf16>
    %cst_42 = arith.constant dense<0.000000e+00> : vector<32x256xf32>
    %132 = tpu.matmul %130, %131, %cst_42 {dimension_numbers = #tpu.dot_dimension_numbers<[1], [0], [0], [1], [0, 0, 1, 1], [], []>} : vector<32x32xbf16>, vector<32x256xbf16>, vector<32x256xf32> -> vector<32x256xf32>
    %c0_43 = arith.constant 0 : index
    %c0_44 = arith.constant 0 : index
    %133 = vector.load %arg6[%c0_43, %c0_44] : memref<32x1xf32, #tpu.memory_space<vmem>>, vector<32x1xf32>
    %134 = vector.broadcast %133 : vector<32x1xf32> to vector<32x256xf32>
    %135 = arith.addf %132, %134 : vector<32x256xf32>
    %c0_45 = arith.constant 0 : index
    %c0_46 = arith.constant 0 : index
    %c0_47 = arith.constant 0 : index
    %136 = vector.load %arg7[%c0_45, %c0_46, %c0_47] : memref<1x32x256xf32, #tpu.memory_space<vmem>>, vector<1x32x256xf32>
    %137 = vector.shape_cast %136 : vector<1x32x256xf32> to vector<32x256xf32>
    %138 = vector.shape_cast %135 : vector<32x256xf32> to vector<1x32x256xf32>
    tpu.vector_store %arg7[%c0_45, %c0_46, %c0_47], %138 {strides = array<i32>} : memref<1x32x256xf32, #tpu.memory_space<vmem>>, vector<1x32x256xf32>,
    return
  }
  func.func @transform_0(%arg0: i32) -> (i32, i32, i32) {
    %c0_i32 = arith.constant 0 : i32
    %c0_i32_0 = arith.constant 0 : i32
    %c0_i32_1 = arith.constant 0 : i32
    return %arg0, %c0_i32, %c0_i32_0 : i32, i32, i32
  }
  func.func @transform_1(%arg0: i32) -> (i32, i32, i32) {
    %c0_i32 = arith.constant 0 : i32
    %c0_i32_0 = arith.constant 0 : i32
    %c0_i32_1 = arith.constant 0 : i32
    return %arg0, %c0_i32, %c0_i32_0 : i32, i32, i32
  }
  func.func @transform_2(%arg0: i32) -> (i32, i32) {
    %c0_i32 = arith.constant 0 : i32
    %c0_i32_0 = arith.constant 0 : i32
    %c0_i32_1 = arith.constant 0 : i32
    return %c0_i32, %c0_i32_0 : i32, i32
  }
  func.func @transform_3(%arg0: i32) -> (i32, i32) {
    %c0_i32 = arith.constant 0 : i32
    %c0_i32_0 = arith.constant 0 : i32
    %c0_i32_1 = arith.constant 0 : i32
    return %c0_i32, %c0_i32_0 : i32, i32
  }
  func.func @transform_4(%arg0: i32) -> (i32, i32) {
    %c0_i32 = arith.constant 0 : i32
    %c0_i32_0 = arith.constant 0 : i32
    %c0_i32_1 = arith.constant 0 : i32
    return %c0_i32, %c0_i32_0 : i32, i32
  }
  func.func @transform_5(%arg0: i32) -> (i32, i32) {
    %c0_i32 = arith.constant 0 : i32
    %c0_i32_0 = arith.constant 0 : i32
    %c0_i32_1 = arith.constant 0 : i32
    return %c0_i32, %c0_i32_0 : i32, i32
  }
  func.func @transform_6(%arg0: i32) -> (i32, i32, i32) {
    %c0_i32 = arith.constant 0 : i32
    %c0_i32_0 = arith.constant 0 : i32
    %c0_i32_1 = arith.constant 0 : i32
    return %arg0, %c0_i32, %c0_i32_0 : i32, i32, i32
  }
}

</mosaic_0001>

<bundles_post_ra>
// kernel: deformable_attention_forward.1
= control target key start
LH: loop header
LB: loop body
LE: loop exit
PB: predicated region body
PF: predicated region fallthrough
CT: control target
= control target key end

     0   :  { %s5226_s21 = smov 0   ;;  %s8191_s0 = inlined_call_operand.vmem [shape: bf16[2,32,256], index: 0, kind: input, shape index: {}]   ;;  %s8192_s1 = inlined_call_operand.vmem [shape: f32[2,16,256], index: 1, kind: input, shape index: {}]   ;;  %s8193_s2 = inlined_call_operand.vmem [shape: bf16[112,32], index: 2, kind: input, shape index: {}]   ;;  %s8194_s3 = inlined_call_operand.vmem [shape: f32[112,1], index: 3, kind: input, shape index: {}]   ;;  %s8195_s4 = inlined_call_operand.vmem [shape: bf16[32,32], index: 4, kind: input, shape index: {}]   ;;  %s8196_s5 = inlined_call_operand.vmem [shape: f32[32,1], index: 5, kind: input, shape index: {}]   ;;  %s8197_s6 = inlined_call_operand.vmem [shape: f32[2,32,256], index: 6, kind: output, shape index: {}]  }
   0x1 LB: > { %s4155_s22 = sadd.s32 4294967295, %s5188_s21   ;;  %p4159_p0 = scmp.ge.s32.totalorder %s5188_s21, 1  ;;  %s5188_s21 = sphi %s5226_s21, %s16_s21  }
   0x2   : > { %p222_p1 = scmp.lt.s32.totalorder %s5188_s21, 3 }
   0x4   : > { %p223_p2 = pnand %p4159_p0, %p222_p1 }
   0x6   : > { %226 = sbr.rel (%p223_p2) target bundleno = 3987 (0xf93), region = 44 }
   0xb   : > { %p257_p3 = scmp.lt.s32.totalorder %s4155_s22, 1  ;;  %v291_v0 = vld [vmem:[%s8194_s3] sm:$0xff]  ;;  %v5190_v1 = vmov 0   ;;  %v292_v2 = vld [vmem:[%s8194_s3 + $0x8] sm:$0xff]  ;;  %vm430_vm0 = vcmask 261120   ;;  %v293_v17 = vld [vmem:[%s8194_s3 + $0x10] sm:$0xff] }
   0xc   : > { %4395 = vset.pattern.permute.xlu0 %v5190_v1  ;;  %4396 = vset.pattern.permute.xlu1 %v5190_v1  ;;  %v4373_v15 = vld [vmem:[%s8193_s2] sm:$0xff]  ;;  %v4374_v16 = vld [vmem:[%s8193_s2 + $0x8] sm:$0xff]  ;;  %v297_v18 = vld [vmem:[%s8194_s3 + $0x30] sm:$0xff]  ;;  %vm544_vm1 = vcmask 1043456   ;;  %vm675_vm2 = vcmask 64512  }
   0xd   : > { %s8639_s22 = smov (!%p257_p3, %s4155_s22), 1  ;;  %307 = vperm.xlu0 %4395, %v291_v0   ;;  %317 = vperm.xlu1 %4396, %v293_v17   ;;  %v4375_v19 = vld [vmem:[%s8193_s2 + $0x10] sm:$0xff]  ;;  %v4376_v20 = vld [vmem:[%s8193_s2 + $0x18] sm:$0xff] }
   0xe   : > { %s4366_s25 = sshll.u32 %s8639_s22, 5  ;;  %s4368_s16 = sshll.u32 %s8639_s22, 6 }
   0xf   : > { %s261_s28 = scalar_lea.vmem %s8191_s0, %s4366_s25  ;;  %s266_s23 = scalar_lea.vmem %s8192_s1, %s4366_s25 }
  0x10   : > { %v4204_v3 = vld [vmem:[%s261_s28 + $0x10] sm:$0xf]  ;;  %v4372_v4 = vld [vmem:[%s261_s28 + $0x14] sm:$0xf0]  ;;  %v4371_v5 = vld [vmem:[%s261_s28 + $0x14] sm:$0xf]  ;;  %s271_s19 = scalar_lea.vmem %s8197_s6, %s4368_s16 }
  0x11   : > { %v4205_v6 = vor.u32 %v4372_v4, %v4204_v3  ;;  %v4206_v7 = vld [vmem:[%s261_s28 + $0x18] sm:$0xf0]  ;;  %v4196_v8 = vld [vmem:[%s261_s28] sm:$0xf]  ;;  %v4370_v9 = vld [vmem:[%s261_s28 + $0x4] sm:$0xf0] }
  0x12   : > { %v4209_v10 = vor.u32 %v4371_v5, %v4206_v7  ;;  %v4369_v11 = vld [vmem:[%s261_s28 + $0x4] sm:$0xf]  ;;  %v4198_v12 = vld [vmem:[%s261_s28 + $0x8] sm:$0xf0]  ;;  %v4197_v13 = vor.u32 %v4370_v9, %v4196_v8  ;;  %v540_v23 = vld [vmem:[%s266_s23] sm:$0xf] }
  0x13   : > { %458 = vmatpush.bf16.msra.mxu0 %v4205_v6  ;;  %4382 = vmatpush.bf16.msra.mxu2 %v4205_v6  ;;  %v4201_v14 = vor.u32 %v4369_v11, %v4198_v12  ;;  %v541_v26 = vld [vmem:[%s266_s23 + $0x8] sm:$0xf]  ;;  %v583_v37 = vld [vmem:[%s266_s23 + $0x10] sm:$0xf]  ;;  %v584_v41 = vld [vmem:[%s266_s23 + $0x18] sm:$0xf] }
  0x14   : > { %502 = vmatpush.bf16.msra.mxu1 %v4209_v10  ;;  %4384 = vmatpush.bf16.msra.mxu3 %v4209_v10 }
  0x15   : > { %312 = vperm.xlu0 %4395, %v292_v2   ;;  %337 = vperm.xlu1 %4396, %v297_v18  }
  0x17   : > { %459 = vmatpush.bf16.msra.mxu0 %v4197_v13  ;;  %4383 = vmatpush.bf16.msra.mxu2 %v4197_v13 }
  0x18   : > { %503 = vmatpush.bf16.msra.mxu1 %v4201_v14  ;;  %4385 = vmatpush.bf16.msra.mxu3 %v4201_v14 }
  0x1a   : > { %4210 = vmatmul.msk.bf16.vlgmr.msra.gmra.mxu0 %vm430_vm0, %v4373_v15 }
  0x1b   : > { %4217 = vmatmul.msk.bf16.vlgmr.msra.gmra.mxu1 %vm430_vm0, %v4373_v15 }
  0x2a   : > { %4211 = vmatmul.msk.bf16.gmra.mxu0 %vm430_vm0, %v4374_v16 }
  0x2b   : > { %4218 = vmatmul.msk.bf16.gmra.mxu1 %vm430_vm0, %v4374_v16 }
  0x3a   : > { %4212 = vmatmul.msk.bf16.gmra.mxu0 %vm430_vm0, %v4375_v19 }
  0x3b   : > { %4219 = vmatmul.msk.bf16.gmra.mxu1 %vm430_vm0, %v4375_v19 }
  0x4a   : > { %4213 = vmatmul.msk.bf16.gmra.mxu0 %vm430_vm0, %v4376_v20 }
  0x4b   : > { %4220 = vmatmul.msk.bf16.gmra.mxu1 %vm430_vm0, %v4376_v20 }
  0x7f   : > { %v308_v21 = vpop.permute.xlu0 %307 }
  0x87   : > { %v313_v34 = vpop.permute.xlu0 %312 }
  0x97   : > { %v461_v22 = vpop.f32.mrf.mxu0 }
  0x98   : > { %v462_v24 = vadd.f32 %v461_v22, %v308_v21  ;;  %v505_v25 = vpop.f32.mrf.mxu1 }
  0x99   : > { %v506_v27 = vadd.f32 %v505_v25, %v308_v21 }
  0x9a   : > { %v542_v28 = vadd.f32 %v540_v23, %v462_v24 }
  0x9b   : > { %v543_v29 = vadd.f32 %v541_v26, %v506_v27  ;;  %v4377_v26 = vld [vmem:[%s8193_s2 + $0x20] sm:$0xff] }
  0x9c   : > { %v545_v30 = vsel %vm544_vm1, %v542_v28, -inf  ;;  %4214 = vmatmul.msk.bf16.vlgmr.msra.gmra.mxu2 %vm430_vm0, %v4377_v26  ;;  %4221 = vmatmul.msk.bf16.vlgmr.msra.gmra.mxu3 %vm430_vm0, %v4377_v26 }
  0x9d   : > { %v546_v31 = vrot.slane %v545_v30, 4  ;;  %v552_v32 = vsel %vm544_vm1, %v543_v29, -inf }
  0x9e   : > { %v553_v33 = vrot.slane %v552_v32, 4 }
  0x9f   : > { %v547_v35 = vmax.f32 %v545_v30, %v546_v31  ;;  %v463_v36 = vpop.f32.mrf.mxu0 }
  0xa0   : > { %v554_v38 = vmax.f32 %v552_v32, %v553_v33  ;;  %v464_v39 = vadd.f32 %v463_v36, %v313_v34  ;;  %v507_v40 = vpop.f32.mrf.mxu1 }
  0xa1   : > { %v548_v42 = vrot.slane %v547_v35, 2  ;;  %v508_v43 = vadd.f32 %v507_v40, %v313_v34 }
  0xa2   : > { %v555_v44 = vrot.slane %v554_v38, 2  ;;  %v585_v45 = vadd.f32 %v583_v37, %v464_v39 }
  0xa3   : > { %v549_v46 = vmax.f32 %v547_v35, %v548_v42  ;;  %v586_v47 = vadd.f32 %v584_v41, %v508_v43 }
  0xa4   : > { %v556_v48 = vmax.f32 %v554_v38, %v555_v44  ;;  %v587_v49 = vsel %vm544_vm1, %v585_v45, -inf }
  0xa5   : > { %v550_v50 = vrot.slane %v549_v46, 1  ;;  %v588_v51 = vrot.slane %v587_v49, 4  ;;  %v594_v52 = vsel %vm544_vm1, %v586_v47, -inf }
  0xa6   : > { %v557_v53 = vrot.slane %v556_v48, 1  ;;  %v595_v54 = vrot.slane %v594_v52, 4 }
  0xa7   : > { %v551_v55 = vmax.f32 %v549_v46, %v550_v50  ;;  %v589_v56 = vmax.f32 %v587_v49, %v588_v51  ;;  %v5285_v57 = vpop.f32.mrf.mxu0 }
  0xa8   : > { %v558_v58 = vmax.f32 %v556_v48, %v557_v53  ;;  %v596_v59 = vmax.f32 %v594_v52, %v595_v54  ;;  %v5287_v60 = vpop.f32.mrf.mxu1  ;;  %v318_v48 = vpop.permute.xlu1 %317 }
  0xa9   : > { %v559_v61 = vsub.f32 %v542_v28, %v551_v55  ;;  %v590_v62 = vrot.slane %v589_v56, 2 }
  0xaa   : > { %v560_v63 = vsub.f32 %v543_v29, %v558_v58  ;;  %v597_v0 = vrot.slane %v596_v59, 2 }
  0xab   : > { %v561_v2 = vmul.f32 1.442695, %v559_v61  ;;  %v591_v3 = vmax.f32 %v589_v56, %v590_v62  ;;  %v467_v56 = vadd.f32 %v5285_v57, %v318_v48  ;;  %v511_v62 = vadd.f32 %v5287_v60, %v318_v48 }
  0xac   : > { %v563_v4 = vmul.f32 1.442695, %v560_v63  ;;  %v598_v5 = vmax.f32 %v596_v59, %v597_v0  ;;  %v4378_v59 = vld [vmem:[%s8193_s2 + $0x28] sm:$0xff] }
  0xad   : > { %4398 = vpow2.f32 %v561_v2  ;;  %v592_v6 = vrot.slane %v591_v3, 1  ;;  %4215 = vmatmul.msk.bf16.gmra.mxu2 %vm430_vm0, %v4378_v59  ;;  %4222 = vmatmul.msk.bf16.gmra.mxu3 %vm430_vm0, %v4378_v59 }
  0xae   : > { %4400 = vpow2.f32 %v563_v4  ;;  %v599_v7 = vrot.slane %v598_v5, 1 }
  0xaf   : > { %v593_v8 = vmax.f32 %v591_v3, %v592_v6  ;;  %v5289_v11 = vpop.f32.mrf.mxu0 }
  0xb0   : > { %v600_v9 = vmax.f32 %v598_v5, %v599_v7  ;;  %8332 = vst [vmem:[#allocation3_spill] sm:$0xff] %v5289_v11  ;;  %v5291_v13 = vpop.f32.mrf.mxu1  ;;  %v338_v5 = vpop.permute.xlu1 %337 }
  0xb1   : > { %v601_v10 = vsub.f32 %v585_v45, %v593_v8  ;;  %8333 = vst [vmem:[#allocation4_spill] sm:$0xff] %v5291_v13 }
  0xb2   : > { %v602_v12 = vsub.f32 %v586_v47, %v600_v9 }
  0xb3   : > { %v4399_v14 = vpop.eup %4398  ;;  %v603_v15 = vmul.f32 1.442695, %v601_v10 }
  0xb4   : > { %v4401_v16 = vpop.eup %4400  ;;  %v565_v17 = vsel %vm544_vm1, %v4399_v14, 0.0  ;;  %v605_v18 = vmul.f32 1.442695, %v602_v12 }
  0xb5   : > { %v566_v19 = vrot.slane %v565_v17, 4  ;;  %v572_v20 = vsel %vm544_vm1, %v4401_v16, 0.0  ;;  %4402 = vpow2.f32 %v603_v15 }
  0xb6   : > { %v573_v21 = vrot.slane %v572_v20, 4  ;;  %4404 = vpow2.f32 %v605_v18 }
  0xb7   : > { %v567_v22 = vadd.f32 %v566_v19, %v565_v17  ;;  %v5298_v29 = vpop.f32.mrf.mxu0 }
  0xb8   : > { %v574_v23 = vadd.f32 %v573_v21, %v572_v20  ;;  %8334 = vst [vmem:[#allocation5_spill] sm:$0xff] %v5298_v29  ;;  %v5301_v33 = vpop.f32.mrf.mxu1 }
  0xb9   : > { %v568_v24 = vrot.slane %v567_v22, 2  ;;  %8335 = vst [vmem:[#allocation6_spill] sm:$0xff] %v5301_v33 }
  0xba   : > { %v575_v25 = vrot.slane %v574_v23, 2 }
  0xbb   : > { %v4403_v27 = vpop.eup %4402  ;;  %v569_v28 = vadd.f32 %v568_v24, %v567_v22  ;;  %v4379_v22 = vld [vmem:[%s8193_s2 + $0x30] sm:$0xff] }
  0xbc   : > { %v4405_v30 = vpop.eup %4404  ;;  %v576_v31 = vadd.f32 %v575_v25, %v574_v23  ;;  %v607_v32 = vsel %vm544_vm1, %v4403_v27, 0.0 }
  0xbd   : > { %v570_v34 = vrot.slane %v569_v28, 1  ;;  %v608_v35 = vrot.slane %v607_v32, 4  ;;  %v614_v36 = vsel %vm544_vm1, %v4405_v30, 0.0  ;;  %4216 = vmatmul.msk.bf16.gmra.mxu2 %vm430_vm0, %v4379_v22  ;;  %4223 = vmatmul.msk.bf16.gmra.mxu3 %vm430_vm0, %v4379_v22 }
  0xbe   : > { %v577_v37 = vrot.slane %v576_v31, 1  ;;  %v615_v38 = vrot.slane %v614_v36, 4 }
  0xbf   : > { %v571_v39 = vadd.f32 %v570_v34, %v569_v28  ;;  %v609_v40 = vadd.f32 %v608_v35, %v607_v32  ;;  %v5306_v49 = vpop.f32.mrf.mxu0 }
  0xc0   : > { %v578_v41 = vadd.f32 %v577_v37, %v576_v31  ;;  %v616_v42 = vadd.f32 %v615_v38, %v614_v36  ;;  %8336 = vst [vmem:[#allocation7_spill] sm:$0xff] %v5306_v49  ;;  %v5308_v51 = vpop.f32.mrf.mxu1 }
  0xc1   : > { %4406 = vrcp.f32 %v571_v39  ;;  %v610_v43 = vrot.slane %v609_v40, 2  ;;  %8337 = vst [vmem:[#allocation8_spill] sm:$0xff] %v5308_v51 }
  0xc2   : > { %4408 = vrcp.f32 %v578_v41  ;;  %v617_v44 = vrot.slane %v616_v42, 2 }
  0xc3   : > { %v611_v45 = vadd.f32 %v610_v43, %v609_v40 }
  0xc4   : > { %v618_v46 = vadd.f32 %v617_v44, %v616_v42 }
  0xc5   : > { %v612_v47 = vrot.slane %v611_v45, 1 }
  0xc6   : > { %v619_v50 = vrot.slane %v618_v46, 1 }
  0xc7   : > { %v4407_v52 = vpop.eup %4406  ;;  %v613_v53 = vadd.f32 %v612_v47, %v611_v45  ;;  %v476_v60 = vpop.f32.mrf.mxu0 }
  0xc8   : > { %v4409_v54 = vpop.eup %4408  ;;  %v5310_v55 = vmul.f32 %v4407_v52, %v4399_v14  ;;  %v620_v58 = vadd.f32 %v619_v50, %v618_v46  ;;  %v520_v9 = vpop.f32.mrf.mxu1  ;;  %v477_v12 = vadd.f32 %v476_v60, %v338_v5 }
  0xc9   : > { %v5316_v61 = vmul.f32 %v4409_v54, %v4401_v16  ;;  %4410 = vrcp.f32 %v613_v53  ;;  %v521_v15 = vadd.f32 %v520_v9, %v338_v5 }
  0xca   : > { %8338 = vst [vmem:[#allocation9_spill] sm:$0xff] %v5310_v55  ;;  %v5320_v63 = vperm.slane %v5310_v55, 0  ;;  %4412 = vrcp.f32 %v620_v58 }
  0xcb   : > { %8339 = vst [vmem:[#allocation10_spill] sm:$0xff] %v5316_v61  ;;  %v5323_v0 = vperm.slane %v5316_v61, 0 }
  0xcc   : > { %8340 = vst [vmem:[#allocation11_spill] sm:$0xff] %v5320_v63  ;;  %v627_v2 = vmul.f32 %v5320_v63, %v467_v56 }
  0xcd   : > { %8341 = vst [vmem:[#allocation12_spill] sm:$0xff] %v5323_v0  ;;  %v628_v57 = vmul.f32 %v5323_v0, %v511_v62 }
  0xce   : > { %v645_v3 = vpack.c.bf16 %v627_v2, %v627_v2 }
  0xcf   : > { %v4411_v4 = vpop.eup %4410  ;;  %v646_v6 = vpack.c.bf16 %v628_v57, %v628_v57 }
  0xd0   : > { %v4413_v7 = vpop.eup %4412  ;;  %v623_v8 = vmul.f32 %v4411_v4, %v4403_v27 }
  0xd1   : > { %v624_v10 = vmul.f32 %v4413_v7, %v4405_v30  ;;  %651 = vxpose.binary.xlu2.c.b16.start.end [1/2] (short) %v646_v6, %v645_v3, 128 }
  0xd2   : > { %v5329_v14 = vperm.slane %v623_v8, 0 }
  0xd3   : > { %v5331_v16 = vperm.slane %v624_v10, 0 }
  0xd4   : > { %8342 = vst [vmem:[#allocation13_spill] sm:$0xff] %v5329_v14  ;;  %v637_v17 = vmul.f32 %v5329_v14, %v477_v12 }
  0xd5   : > { %8343 = vst [vmem:[#allocation14_spill] sm:$0xff] %v5331_v16  ;;  %v638_v18 = vmul.f32 %v5331_v16, %v521_v15 }
  0xd6   : > { %v647_v19 = vpack.c.bf16 %v637_v17, %v637_v17 }
  0xd7   : > { %v648_v20 = vpack.c.bf16 %v638_v18, %v638_v18 }
  0xd8   : > { %v725_v21 = vsel %vm544_vm1, %v647_v19, 0 }
  0xd9   : > { %737 = vmatpush.bf16.msrb.mxu2 %v725_v21  ;;  %v728_v23 = vsel %vm544_vm1, %v648_v20, 0 }
  0xda   : > { %826 = vmatpush.bf16.msrb.mxu3 %v728_v23 }
 0x11f   : > { %v5353_v35 = vpop.f32.mrf.mxu2  ;;  %v5355_v36 = vpop.f32.mrf.mxu3 }
 0x120   : > { %8344 = vst [vmem:[#allocation15_spill] sm:$0xff] %v5353_v35 }
 0x121   : > { %8345 = vst [vmem:[#allocation16_spill] sm:$0xff] %v5355_v36 }
 0x127   : > { %v5359_v38 = vpop.f32.mrf.mxu2  ;;  %v5361_v39 = vpop.f32.mrf.mxu3 }
 0x128   : > { %8346 = vst [vmem:[#allocation17_spill] sm:$0xff] %v5359_v38 }
 0x129   : > { %8347 = vst [vmem:[#allocation18_spill] sm:$0xff] %v5361_v39 }
 0x130   : > { %v5363_v41 = vpop.f32.mrf.mxu2  ;;  %v5365_v42 = vpop.f32.mrf.mxu3 }
 0x131   : > { %8348 = vst [vmem:[#allocation19_spill] sm:$0xff] %v5363_v41 }
 0x132   : > { %8349 = vst [vmem:[#allocation20_spill] sm:$0xff] %v5365_v42 }
 0x133   : > { %4397 = vset.pattern.permute.xlu2 %v5190_v1 }
 0x138   : > { %v5369_v44 = vpop.f32.mrf.mxu2  ;;  %v5371_v45 = vpop.f32.mrf.mxu3 }
 0x139   : > { %8350 = vst [vmem:[#allocation21_spill] sm:$0xff] %v5369_v44 }
 0x13a   : > { %8351 = vst [vmem:[#allocation22_spill] sm:$0xff] %v5371_v45 }
 0x140   : > { %v5375_v48 = vpop.f32.mrf.mxu2  ;;  %v5377_v50 = vpop.f32.mrf.mxu3 }
 0x141   : > { %8352 = vst [vmem:[#allocation23_spill] sm:$0xff] %v5375_v48 }
 0x142   : > { %8353 = vst [vmem:[#allocation24_spill] sm:$0xff] %v5377_v50 }
 0x148   : > { %v5379_v52 = vpop.f32.mrf.mxu2  ;;  %v5381_v53 = vpop.f32.mrf.mxu3 }
 0x149   : > { %8354 = vst [vmem:[#allocation25_spill] sm:$0xff] %v5379_v52 }
 0x14a   : > { %8355 = vst [vmem:[#allocation26_spill] sm:$0xff] %v5381_v53 }
 0x172   : > { %v659_v24 = vpop.trf.xlu2 }
 0x173   : > { %4224 = vmatmul.msk.bf16.vlgmr.msrb.gmra.mxu2 %vm675_vm2, %v659_v24  ;;  %4240 = vmatmul.msk.bf16.vlgmr.msrb.gmra.mxu3 %vm675_vm2, %v659_v24 }
 0x17a   : > { %v660_v25 = vpop.trf.xlu2 }
 0x182   : > { %v661_v26 = vpop.trf.xlu2 }
 0x183   : > { %4225 = vmatmul.msk.bf16.gmra.mxu2 %vm675_vm2, %v661_v26  ;;  %4241 = vmatmul.msk.bf16.gmra.mxu3 %vm675_vm2, %v661_v26 }
 0x18a   : > { %v662_v27 = vpop.trf.xlu2 }
 0x192   : > { %v663_v28 = vpop.trf.xlu2 }
 0x193   : > { %4226 = vmatmul.msk.bf16.gmra.mxu2 %vm675_vm2, %v663_v28  ;;  %4242 = vmatmul.msk.bf16.gmra.mxu3 %vm675_vm2, %v663_v28 }
 0x19a   : > { %v664_v30 = vpop.trf.xlu2 }
 0x1a2   : > { %v665_v1 = vpop.trf.xlu2 }
 0x1a3   : > { %4227 = vmatmul.msk.bf16.gmra.mxu2 %vm675_vm2, %v665_v1  ;;  %4243 = vmatmul.msk.bf16.gmra.mxu3 %vm675_vm2, %v665_v1 }
 0x1aa   : > { %v666_v31 = vpop.trf.xlu2 }
 0x1b2   : > { %v667_v32 = vpop.trf.xlu2 }
 0x1b3   : > { %4228 = vmatmul.msk.bf16.gmra.mxu2 %vm675_vm2, %v667_v32  ;;  %4244 = vmatmul.msk.bf16.gmra.mxu3 %vm675_vm2, %v667_v32 }
 0x1ba   : > { %v668_v34 = vpop.trf.xlu2 }
 0x1c2   : > { %v669_v37 = vpop.trf.xlu2 }
 0x1c3   : > { %4229 = vmatmul.msk.bf16.gmra.mxu2 %vm675_vm2, %v669_v37  ;;  %4245 = vmatmul.msk.bf16.gmra.mxu3 %vm675_vm2, %v669_v37 }
 0x1ca   : > { %v670_v40 = vpop.trf.xlu2 }
 0x1d2   : > { %v671_v43 = vpop.trf.xlu2 }
 0x1d3   : > { %4230 = vmatmul.msk.bf16.gmra.mxu2 %vm675_vm2, %v671_v43  ;;  %4246 = vmatmul.msk.bf16.gmra.mxu3 %vm675_vm2, %v671_v43 }
 0x1da   : > { %v672_v46 = vpop.trf.xlu2 }
 0x1e2   : > { %v673_v47 = vpop.trf.xlu2 }
 0x1e3   : > { %4231 = vmatmul.msk.bf16.gmra.mxu2 %vm675_vm2, %v673_v47  ;;  %4247 = vmatmul.msk.bf16.gmra.mxu3 %vm675_vm2, %v673_v47 }
 0x1ea   : > { %v674_v1 = vpop.trf.xlu2 }
 0x1f3   : > { %4232 = vmatmul.msk.bf16.gmra.mxu2 %vm675_vm2, %v660_v25  ;;  %4248 = vmatmul.msk.bf16.gmra.mxu3 %vm675_vm2, %v660_v25 }
 0x1f6   : > { %v5385_v54 = vpop.f32.mrf.mxu2  ;;  %v5387_v56 = vpop.f32.mrf.mxu3 }
 0x1fe   : > { %v5389_v58 = vpop.f32.mrf.mxu2  ;;  %v5391_v59 = vpop.f32.mrf.mxu3 }
 0x203   : > { %4233 = vmatmul.msk.bf16.gmra.mxu2 %vm675_vm2, %v662_v27  ;;  %4249 = vmatmul.msk.bf16.gmra.mxu3 %vm675_vm2, %v662_v27 }
 0x206   : > { %v5395_v62 = vpop.f32.mrf.mxu2  ;;  %v5397_v2 = vpop.f32.mrf.mxu3 }
 0x20e   : > { %v5399_v57 = vpop.f32.mrf.mxu2  ;;  %v5401_v3 = vpop.f32.mrf.mxu3 }
 0x213   : > { %4234 = vmatmul.msk.bf16.gmra.mxu2 %vm675_vm2, %v664_v30  ;;  %4250 = vmatmul.msk.bf16.gmra.mxu3 %vm675_vm2, %v664_v30 }
 0x216   : > { %v5405_v4 = vpop.f32.mrf.mxu2  ;;  %v5407_v5 = vpop.f32.mrf.mxu3 }
 0x21e   : > { %v5409_v60 = vpop.f32.mrf.mxu2  ;;  %v5411_v6 = vpop.f32.mrf.mxu3 }
 0x223   : > { %4235 = vmatmul.msk.bf16.gmra.mxu2 %vm675_vm2, %v666_v31  ;;  %4251 = vmatmul.msk.bf16.gmra.mxu3 %vm675_vm2, %v666_v31 }
 0x226   : > { %v5415_v7 = vpop.f32.mrf.mxu2  ;;  %v5417_v8 = vpop.f32.mrf.mxu3 }
 0x227   : > { %v926_v47 = vmax.f32 %v5415_v7, %v5417_v8 }
 0x22e   : > { %v5419_v9 = vpop.f32.mrf.mxu2  ;;  %v5421_v10 = vpop.f32.mrf.mxu3 }
 0x233   : > { %4236 = vmatmul.msk.bf16.gmra.mxu2 %vm675_vm2, %v668_v34  ;;  %4252 = vmatmul.msk.bf16.gmra.mxu3 %vm675_vm2, %v668_v34 }
 0x236   : > { %v5425_v12 = vpop.f32.mrf.mxu2  ;;  %v5427_v15 = vpop.f32.mrf.mxu3 }
 0x237   : > { %v932_v34 = vmax.f32 %v5425_v12, %v5427_v15 }
 0x23e   : > { %v5429_v17 = vpop.f32.mrf.mxu2  ;;  %v5431_v18 = vpop.f32.mrf.mxu3 }
 0x243   : > { %4237 = vmatmul.msk.bf16.gmra.mxu2 %vm675_vm2, %v670_v40  ;;  %4253 = vmatmul.msk.bf16.gmra.mxu3 %vm675_vm2, %v670_v40 }
 0x246   : > { %v5435_v19 = vpop.f32.mrf.mxu2  ;;  %v5437_v20 = vpop.f32.mrf.mxu3 }
 0x247   : > { %v938_v28 = vmax.f32 %v5435_v19, %v5437_v20 }
 0x24e   : > { %v5439_v21 = vpop.f32.mrf.mxu2  ;;  %v5441_v22 = vpop.f32.mrf.mxu3 }
 0x24f   : > { %v941_v37 = vmax.f32 %v5439_v21, %v5441_v22 }
 0x253   : > { %4238 = vmatmul.msk.bf16.gmra.mxu2 %vm675_vm2, %v672_v46  ;;  %4254 = vmatmul.msk.bf16.gmra.mxu3 %vm675_vm2, %v672_v46 }
 0x256   : > { %v5445_v23 = vpop.f32.mrf.mxu2  ;;  %v5447_v24 = vpop.f32.mrf.mxu3 }
 0x257   : > { %v944_v25 = vmax.f32 %v5445_v23, %v5447_v24 }
 0x259   : > { %945 = vmax.xlane.f32.xlu1 %v944_v25  ;;  %v935_v25 = vmax.f32 %v5429_v17, %v5431_v18 }
 0x25e   : > { %v5451_v26 = vpop.f32.mrf.mxu2  ;;  %v5453_v27 = vpop.f32.mrf.mxu3 }
 0x25f   : > { %v947_v30 = vmax.f32 %v5451_v26, %v5453_v27 }
 0x261   : > { %939 = vmax.xlane.f32.xlu1 %v938_v28  ;;  %948 = vmax.xlane.f32.xlu0 %v947_v30 }
 0x263   : > { %4239 = vmatmul.msk.bf16.gmra.mxu2 %vm675_vm2, %v674_v1  ;;  %4255 = vmatmul.msk.bf16.gmra.mxu3 %vm675_vm2, %v674_v1  ;;  %v920_v1 = vmax.f32 %v5405_v4, %v5407_v5 }
 0x266   : > { %v5461_v31 = vpop.f32.mrf.mxu2  ;;  %v5463_v32 = vpop.f32.mrf.mxu3 }
 0x267   : > { %v950_v40 = vmax.f32 %v5461_v31, %v5463_v32 }
 0x269   : > { %933 = vmax.xlane.f32.xlu1 %v932_v34  ;;  %942 = vmax.xlane.f32.xlu0 %v941_v37  ;;  %v929_v34 = vmax.f32 %v5419_v9, %v5421_v10 }
 0x26a   : > { %951 = vmax.xlane.f32.xlu2 %v950_v40 }
 0x26e   : > { %v5471_v43 = vpop.f32.mrf.mxu2  ;;  %v5473_v46 = vpop.f32.mrf.mxu3 }
 0x271   : > { %927 = vmax.xlane.f32.xlu1 %v926_v47  ;;  %936 = vmax.xlane.f32.xlu0 %v935_v25  ;;  %v914_v47 = vmax.f32 %v5395_v62, %v5397_v2  ;;  %v923_v25 = vmax.f32 %v5409_v60, %v5411_v6 }
 0x276   : > { %v5479_v28 = vpop.f32.mrf.mxu2  ;;  %v5481_v30 = vpop.f32.mrf.mxu3 }
 0x277   : > { %8356 = vst [vmem:[#allocation27_spill] sm:$0xff] %v5479_v28 }
 0x278   : > { %8357 = vst [vmem:[#allocation28_spill] sm:$0xff] %v5481_v30 }
 0x279   : > { %921 = vmax.xlane.f32.xlu1 %v920_v1  ;;  %930 = vmax.xlane.f32.xlu0 %v929_v34  ;;  %v908_v1 = vmax.f32 %v5385_v54, %v5387_v56  ;;  %v917_v34 = vmax.f32 %v5399_v57, %v5401_v3 }
 0x27e   : > { %v5487_v37 = vpop.f32.mrf.mxu2  ;;  %v5489_v40 = vpop.f32.mrf.mxu3 }
 0x27f   : > { %8358 = vst [vmem:[#allocation29_spill] sm:$0xff] %v5487_v37 }
 0x280   : > { %8359 = vst [vmem:[#allocation30_spill] sm:$0xff] %v5489_v40 }
 0x281   : > { %915 = vmax.xlane.f32.xlu1 %v914_v47  ;;  %924 = vmax.xlane.f32.xlu0 %v923_v25  ;;  %v911_v47 = vmax.f32 %v5389_v58, %v5391_v59  ;;  %v956_v25 = vmax.f32 %v5479_v28, %v5481_v30 }
 0x286   : > { %v5495_v53 = vpop.f32.mrf.mxu2  ;;  %v5497_v52 = vpop.f32.mrf.mxu3 }
 0x287   : > { %8360 = vst [vmem:[#allocation31_spill] sm:$0xff] %v5495_v53 }
 0x288   : > { %8361 = vst [vmem:[#allocation32_spill] sm:$0xff] %v5497_v52 }
 0x289   : > { %909 = vmax.xlane.f32.xlu1 %v908_v1  ;;  %918 = vmax.xlane.f32.xlu0 %v917_v34  ;;  %v953_v1 = vmax.f32 %v5471_v43, %v5473_v46  ;;  %v962_v34 = vmax.f32 %v5495_v53, %v5497_v52 }
 0x28e   : > { %v5503_v39 = vpop.f32.mrf.mxu2  ;;  %v5505_v38 = vpop.f32.mrf.mxu3 }
 0x28f   : > { %8362 = vst [vmem:[#allocation33_spill] sm:$0xff] %v5505_v38 }
 0x291   : > { %912 = vmax.xlane.f32.xlu0 %v911_v47  ;;  %957 = vmax.xlane.f32.xlu1 %v956_v25  ;;  %v959_v47 = vmax.f32 %v5487_v37, %v5489_v40 }
 0x296   : > { %v5511_v50 = vpop.f32.mrf.mxu2  ;;  %v5513_v48 = vpop.f32.mrf.mxu3 }
 0x297   : > { %v968_v25 = vmax.f32 %v5511_v50, %v5513_v48 }
 0x299   : > { %954 = vmax.xlane.f32.xlu0 %v953_v1  ;;  %963 = vmax.xlane.f32.xlu1 %v962_v34  ;;  %v965_v1 = vmax.f32 %v5503_v39, %v5505_v38 }
 0x29e   : > { %v5519_v51 = vpop.f32.mrf.mxu2  ;;  %v5521_v49 = vpop.f32.mrf.mxu3 }
 0x2a1   : > { %960 = vmax.xlane.f32.xlu0 %v959_v47  ;;  %969 = vmax.xlane.f32.xlu1 %v968_v25  ;;  %v971_v47 = vmax.f32 %v5519_v51, %v5521_v49 }
 0x2a6   : > { %v5527_v36 = vpop.f32.mrf.mxu2  ;;  %v5529_v35 = vpop.f32.mrf.mxu3 }
 0x2a7   : > { %v974_v34 = vmax.f32 %v5527_v36, %v5529_v35 }
 0x2a9   : > { %966 = vmax.xlane.f32.xlu0 %v965_v1  ;;  %975 = vmax.xlane.f32.xlu1 %v974_v34 }
 0x2ae   : > { %v5535_v33 = vpop.f32.mrf.mxu2  ;;  %v5537_v29 = vpop.f32.mrf.mxu3 }
 0x2af   : > { %v977_v44 = vmax.f32 %v5535_v33, %v5537_v29 }
 0x2b1   : > { %972 = vmax.xlane.f32.xlu0 %v971_v47 }
 0x2b6   : > { %v5541_v25 = vpop.f32.mrf.mxu2  ;;  %v5543_v45 = vpop.f32.mrf.mxu3 }
 0x2b7   : > { %v980_v16 = vmax.f32 %v5541_v25, %v5543_v45 }
 0x2b9   : > { %978 = vmax.xlane.f32.xlu0 %v977_v44  ;;  %981 = vmax.xlane.f32.xlu1 %v980_v16 }
 0x2be   : > { %v5549_v1 = vpop.f32.mrf.mxu2  ;;  %v5551_v34 = vpop.f32.mrf.mxu3 }
 0x2bf   : > { %v983_v14 = vmax.f32 %v5549_v1, %v5551_v34 }
 0x2c1   : > { %984 = vmax.xlane.f32.xlu0 %v983_v14 }
 0x2c6   : > { %v5555_v47 = vpop.f32.mrf.mxu2  ;;  %v5557_v0 = vpop.f32.mrf.mxu3 }
 0x2c7   : > { %v986_v63 = vmax.f32 %v5555_v47, %v5557_v0 }
 0x2c9   : > { %987 = vmax.xlane.f32.xlu1 %v986_v63 }
 0x2cc   : > { %v946_v13 = vpop.xlane.xlu1 %945 }
 0x2ce   : > { %v5561_v11 = vpop.f32.mrf.mxu2  ;;  %v5563_v16 = vpop.f32.mrf.mxu3 }
 0x2cf   : > { %v989_v44 = vmax.f32 %v5561_v11, %v5563_v16 }
 0x2d1   : > { %990 = vmax.xlane.f32.xlu0 %v989_v44  ;;  %v1028_v44 = vsub.f32 %v5445_v23, %v946_v13 }
 0x2d4   : > { %v940_v42 = vpop.xlane.xlu1 %939  ;;  %v949_v41 = vpop.xlane.xlu0 %948 }
 0x2d5   : > { %v1024_v14 = vsub.f32 %v5435_v19, %v940_v42  ;;  %v1025_v61 = vsub.f32 %v5437_v20, %v940_v42  ;;  %v1029_v19 = vsub.f32 %v5447_v24, %v946_v13  ;;  %v1030_v13 = vsub.f32 %v5451_v26, %v949_v41 }
 0x2d6   : > { %v5577_v20 = vpop.f32.mrf.mxu2 }
 0x2d7   : > { %v1108_v55 = vmul.f32 1.442695, %v1024_v14  ;;  %v1110_v30 = vmul.f32 1.442695, %v1025_v61  ;;  %v1120_v26 = vmul.f32 1.442695, %v1030_v13 }
 0x2d9   : > { %4414 = vpow2.f32 %v1108_v55  ;;  %v5579_v55 = vpop.f32.mrf.mxu3 }
 0x2da   : > { %4416 = vpow2.f32 %v1110_v30  ;;  %v992_v24 = vmax.f32 %v5577_v20, %v5579_v55 }
 0x2dc   : > { %v934_v63 = vpop.xlane.xlu1 %933  ;;  %v943_v28 = vpop.xlane.xlu0 %942 }
 0x2dd   : > { %v1026_v40 = vsub.f32 %v5439_v21, %v943_v28  ;;  %v1027_v37 = vsub.f32 %v5441_v22, %v943_v28  ;;  %v1116_v21 = vmul.f32 1.442695, %v1028_v44  ;;  %v1118_v22 = vmul.f32 1.442695, %v1029_v19 }
 0x2de   : > { %v5591_v14 = vpop.f32.mrf.mxu2 }
 0x2df   : > { %v5571_v52 = vpop.eup %4414  ;;  %v1112_v53 = vmul.f32 1.442695, %v1026_v40  ;;  %v1114_v42 = vmul.f32 1.442695, %v1027_v37  ;;  %v1031_v40 = vsub.f32 %v5453_v27, %v949_v41  ;;  %v1020_v41 = vsub.f32 %v5425_v12, %v934_v63 }
 0x2e0   : > { %8363 = vst [vmem:[#allocation34_spill] sm:$0xff] %v5571_v52  ;;  %v5574_v38 = vpop.eup %4416  ;;  %v1021_v27 = vsub.f32 %v5427_v15, %v934_v63 }
 0x2e1   : > { %8364 = vst [vmem:[#allocation35_spill] sm:$0xff] %v5574_v38  ;;  %v1226_v61 = vadd.f32 %v5574_v38, %v5571_v52  ;;  %4418 = vpow2.f32 %v1112_v53  ;;  %v5593_v53 = vpop.f32.mrf.mxu3 }
 0x2e2   : > { %4420 = vpow2.f32 %v1114_v42  ;;  %v995_v13 = vmax.f32 %v5591_v14, %v5593_v53  ;;  %v1102_v12 = vmul.f32 1.442695, %v1021_v27  ;;  %v952_v27 = vpop.xlane.xlu2 %951 }
 0x2e3   : > { %1227 = vadd.xlane.f32.xlu1 %v1226_v61  ;;  %4422 = vpow2.f32 %v1116_v21 }
 0x2e4   : > { %v928_v28 = vpop.xlane.xlu1 %927  ;;  %v937_v23 = vpop.xlane.xlu0 %936  ;;  %4424 = vpow2.f32 %v1118_v22  ;;  %v1122_v22 = vmul.f32 1.442695, %v1031_v40 }
 0x2e5   : > { %4426 = vpow2.f32 %v1120_v26  ;;  %v1022_v38 = vsub.f32 %v5429_v17, %v937_v23  ;;  %v1023_v52 = vsub.f32 %v5431_v18, %v937_v23  ;;  %v1016_v18 = vsub.f32 %v5415_v7, %v928_v28 }
 0x2e6   : > { %4428 = vpow2.f32 %v1122_v22 }
 0x2e7   : > { %v5583_v30 = vpop.eup %4418  ;;  %v1104_v17 = vmul.f32 1.442695, %v1022_v38  ;;  %v1106_v26 = vmul.f32 1.442695, %v1023_v52 }
 0x2e8   : > { %8365 = vst [vmem:[#allocation36_spill] sm:$0xff] %v5583_v30  ;;  %v5588_v37 = vpop.eup %4420 }
 0x2e9   : > { %8366 = vst [vmem:[#allocation37_spill] sm:$0xff] %v5588_v37  ;;  %v1229_v44 = vadd.f32 %v5588_v37, %v5583_v30  ;;  %v5599_v61 = vpop.eup %4422  ;;  %v1100_v37 = vmul.f32 1.442695, %v1020_v41  ;;  %v5613_v40 = vpop.f32.mrf.mxu3  ;;  %v1017_v41 = vsub.f32 %v5417_v8, %v928_v28  ;;  %v1032_v8 = vsub.f32 %v5461_v31, %v952_v27 }
 0x2ea   : > { %8367 = vst [vmem:[#allocation38_spill] sm:$0xff] %v5599_v61  ;;  %v5601_v21 = vpop.eup %4424 }
 0x2eb   : > { %993 = vmax.xlane.f32.xlu1 %v992_v24  ;;  %1230 = vadd.xlane.f32.xlu0 %v1229_v44  ;;  %8368 = vst [vmem:[#allocation39_spill] sm:$0xff] %v5601_v21  ;;  %v1232_v24 = vadd.f32 %v5601_v21, %v5599_v61  ;;  %v5611_v44 = vpop.f32.mrf.mxu2  ;;  %v5617_v30 = vpop.eup %4426  ;;  %4430 = vpow2.f32 %v1100_v37  ;;  %v1094_v52 = vmul.f32 1.442695, %v1017_v41  ;;  %v1124_v41 = vmul.f32 1.442695, %v1032_v8 }
 0x2ec   : > { %v5597_v19 = vpop.xlane.xlu1 %921  ;;  %v931_v42 = vpop.xlane.xlu0 %930  ;;  %v998_v23 = vmax.f32 %v5611_v44, %v5613_v40  ;;  %4432 = vpow2.f32 %v1102_v12 }
 0x2ed   : > { %v5622_v22 = vpop.eup %4428  ;;  %4434 = vpow2.f32 %v1104_v17  ;;  %v1033_v17 = vsub.f32 %v5463_v32, %v952_v27 }
 0x2ee   : > { %8369 = vst [vmem:[#allocation40_spill] sm:$0xff] %v5622_v22  ;;  %4436 = vpow2.f32 %v1106_v26  ;;  %v1235_v38 = vadd.f32 %v5622_v22, %v5617_v30  ;;  %v1018_v26 = vsub.f32 %v5419_v9, %v931_v42 }
 0x2ef   : > { %v1126_v61 = vmul.f32 1.442695, %v1033_v17  ;;  %v1012_v17 = vsub.f32 %v5405_v4, %v5597_v19 }
 0x2f0   : > { %v1096_v22 = vmul.f32 1.442695, %v1018_v26 }
 0x2f1   : > { %v5659_v8 = vpop.f32.mrf.mxu3 }
 0x2f3   : > { %1233 = vadd.xlane.f32.xlu1 %v1232_v24  ;;  %996 = vmax.xlane.f32.xlu0 %v995_v13  ;;  %v1092_v24 = vmul.f32 1.442695, %v1016_v18  ;;  %v5631_v13 = vpop.eup %4430 }
 0x2f4   : > { %v5615_v15 = vpop.xlane.xlu1 %915  ;;  %v925_v63 = vpop.xlane.xlu0 %924 }
 0x2f5   : > { %v5633_v21 = vpop.eup %4432  ;;  %4438 = vpow2.f32 %v1092_v24 }
 0x2f6   : > { %8370 = vst [vmem:[#allocation41_spill] sm:$0xff] %v5633_v21  ;;  %v5635_v12 = vpop.eup %4434  ;;  %4440 = vpow2.f32 %v1094_v52  ;;  %v1220_v18 = vadd.f32 %v5633_v21, %v5631_v13  ;;  %v5657_v52 = vpop.f32.mrf.mxu2 }
 0x2f7   : > { %v5638_v28 = vpop.eup %4436  ;;  %4442 = vpow2.f32 %v1124_v41  ;;  %v1084_v41 = vmul.f32 1.442695, %v1012_v17 }
 0x2f8   : > { %8371 = vst [vmem:[#allocation42_spill] sm:$0xff] %v5638_v28  ;;  %4444 = vpow2.f32 %v1126_v61 }
 0x2f9   : > { %4446 = vpow2.f32 %v1096_v22 }
 0x2fb   : > { %999 = vmax.xlane.f32.xlu1 %v998_v23  ;;  %1236 = vadd.xlane.f32.xlu0 %v1235_v38  ;;  %v1019_v23 = vsub.f32 %v5421_v10, %v931_v42  ;;  %v1223_v38 = vadd.f32 %v5638_v28, %v5635_v12  ;;  %v5649_v24 = vpop.eup %4438  ;;  %v1014_v10 = vsub.f32 %v5409_v60, %v925_v63 }
 0x2fc   : > { %v5627_v37 = vpop.xlane.xlu1 %909  ;;  %v5629_v7 = vpop.xlane.xlu0 %918  ;;  %8372 = vst [vmem:[#allocation43_spill] sm:$0xff] %v5649_v24  ;;  %v1015_v42 = vsub.f32 %v5411_v6, %v925_v63  ;;  %v1001_v60 = vmax.f32 %v5657_v52, %v5659_v8 }
 0x2fd   : > { %v5651_v32 = vpop.eup %4440  ;;  %v1098_v9 = vmul.f32 1.442695, %v1019_v23  ;;  %v1088_v23 = vmul.f32 1.442695, %v1014_v10 }
 0x2fe   : > { %8373 = vst [vmem:[#allocation44_spill] sm:$0xff] %v5651_v32  ;;  %v1214_v26 = vadd.f32 %v5651_v32, %v5649_v24  ;;  %v1090_v6 = vmul.f32 1.442695, %v1015_v42  ;;  %v5669_v63 = vpop.eup %4442 }
 0x2ff   : > { %4448 = vpow2.f32 %v1098_v9  ;;  %v5671_v4 = vpop.eup %4444 }
 0x300   : > { %4450 = vpow2.f32 %v1088_v23  ;;  %v1238_v9 = vadd.f32 %v5671_v4, %v5669_v63 }
 0x301   : > { %4452 = vpow2.f32 %v1090_v6 }
 0x302   : > { %4454 = vpow2.f32 %v1084_v41 }
 0x303   : > { %1221 = vadd.xlane.f32.xlu1 %v1220_v18  ;;  %1224 = vadd.xlane.f32.xlu0 %v1223_v38  ;;  %v1013_v18 = vsub.f32 %v5407_v5, %v5597_v19  ;;  %v5673_v38 = vpop.eup %4446 }
 0x304   : > { %v5647_v31 = vpop.xlane.xlu0 %912  ;;  %v5653_v27 = vpop.xlane.xlu1 %957  ;;  %8374 = vst [vmem:[#allocation45_spill] sm:$0xff] %v5673_v38 }
 0x305   : > { %v1086_v22 = vmul.f32 1.442695, %v1013_v18  ;;  %v5675_v32 = vpop.eup %4448 }
 0x306   : > { %8375 = vst [vmem:[#allocation46_spill] sm:$0xff] %v5675_v32  ;;  %v1217_v42 = vadd.f32 %v5675_v32, %v5673_v38 }
 0x307   : > { %4456 = vpow2.f32 %v1086_v22 }
 0x30b   : > { %1215 = vadd.xlane.f32.xlu1 %v1214_v26  ;;  %1002 = vmax.xlane.f32.xlu0 %v1001_v60  ;;  %v5687_v26 = vpop.eup %4450 }
 0x30c   : > { %v955_v61 = vpop.xlane.xlu0 %954  ;;  %v5677_v5 = vpop.xlane.xlu1 %963  ;;  %8376 = vst [vmem:[#allocation47_spill] sm:$0xff] %v5687_v26 }
 0x30d   : > { %v1034_v19 = vsub.f32 %v5471_v43, %v955_v61  ;;  %v1035_v10 = vsub.f32 %v5473_v46, %v955_v61  ;;  %v5689_v23 = vpop.eup %4452 }
 0x30e   : > { %8377 = vst [vmem:[#allocation48_spill] sm:$0xff] %v5689_v23  ;;  %v5691_v43 = vpop.eup %4454  ;;  %v1211_v46 = vadd.f32 %v5689_v23, %v5687_v26 }
 0x30f   : > { %v1128_v18 = vmul.f32 1.442695, %v1034_v19  ;;  %v1130_v60 = vmul.f32 1.442695, %v1035_v10  ;;  %8378 = vst [vmem:[#allocation49_spill] sm:$0xff] %v5691_v43  ;;  %v5693_v6 = vpop.eup %4456 }
 0x310   : > { %8379 = vst [vmem:[#allocation50_spill] sm:$0xff] %v5693_v6  ;;  %v1208_v41 = vadd.f32 %v5693_v6, %v5691_v43 }
 0x311   : > { %4458 = vpow2.f32 %v1128_v18 }
 0x312   : > { %4460 = vpow2.f32 %v1130_v60 }
 0x313   : > { %1239 = vadd.xlane.f32.xlu1 %v1238_v9  ;;  %1218 = vadd.xlane.f32.xlu0 %v1217_v42 }
 0x314   : > { %v5685_v17 = vpop.xlane.xlu0 %960  ;;  %v5697_v61 = vpop.xlane.xlu1 %969 }
 0x317   : > { %v5703_v19 = vpop.eup %4458 }
 0x318   : > { %v5705_v9 = vpop.eup %4460 }
 0x319   : > { %v1241_v10 = vadd.f32 %v5705_v9, %v5703_v19 }
 0x31b   : > { %1212 = vadd.xlane.f32.xlu1 %v1211_v46  ;;  %1209 = vadd.xlane.f32.xlu0 %v1208_v41 }
 0x31c   : > { %v5701_v22 = vpop.xlane.xlu0 %966  ;;  %v5709_v42 = vpop.xlane.xlu1 %975 }
 0x323   : > { %1242 = vadd.xlane.f32.xlu0 %v1241_v10 }
 0x324   : > { %v5711_v18 = vpop.xlane.xlu0 %972 }
 0x32c   : > { %v5713_v60 = vpop.xlane.xlu0 %978  ;;  %v982_v23 = vpop.xlane.xlu1 %981 }
 0x32d   : > { %v1052_v46 = vsub.f32 %v5541_v25, %v982_v23  ;;  %v1053_v6 = vsub.f32 %v5543_v45, %v982_v23 }
 0x32f   : > { %v1164_v41 = vmul.f32 1.442695, %v1052_v46  ;;  %v1166_v26 = vmul.f32 1.442695, %v1053_v6 }
 0x331   : > { %4462 = vpow2.f32 %v1164_v41 }
 0x332   : > { %4464 = vpow2.f32 %v1166_v26 }
 0x334   : > { %v985_v43 = vpop.xlane.xlu0 %984 }
 0x335   : > { %v1054_v24 = vsub.f32 %v5549_v1, %v985_v43  ;;  %v1055_v32 = vsub.f32 %v5551_v34, %v985_v43 }
 0x337   : > { %v1168_v38 = vmul.f32 1.442695, %v1054_v24  ;;  %v1170_v28 = vmul.f32 1.442695, %v1055_v32  ;;  %v5719_v21 = vpop.eup %4462 }
 0x338   : > { %v5721_v10 = vpop.eup %4464 }
 0x339   : > { %4466 = vpow2.f32 %v1168_v38  ;;  %v1268_v45 = vadd.f32 %v5721_v10, %v5719_v21 }
 0x33a   : > { %4468 = vpow2.f32 %v1170_v28 }
 0x33b   : > { %1269 = vadd.xlane.f32.xlu2 %v1268_v45 }
 0x33c   : > { %v988_v25 = vpop.xlane.xlu1 %987 }
 0x33d   : > { %v1056_v26 = vsub.f32 %v5555_v47, %v988_v25  ;;  %v1057_v23 = vsub.f32 %v5557_v0, %v988_v25  ;;  %v1010_v0 = vsub.f32 %v5399_v57, %v5629_v7  ;;  %v1011_v25 = vsub.f32 %v5401_v3, %v5629_v7 }
 0x33e   : > { %v1004_v57 = vsub.f32 %v5385_v54, %v5627_v37  ;;  %v1046_v54 = vsub.f32 %v5519_v51, %v5711_v18 }
 0x33f   : > { %v5727_v1 = vpop.eup %4466  ;;  %v1172_v34 = vmul.f32 1.442695, %v1056_v26  ;;  %v1174_v24 = vmul.f32 1.442695, %v1057_v23 }
 0x340   : > { %v5729_v32 = vpop.eup %4468  ;;  %v1068_v7 = vmul.f32 1.442695, %v1004_v57 }
 0x341   : > { %4470 = vpow2.f32 %v1172_v34  ;;  %v1271_v38 = vadd.f32 %v5729_v32, %v5727_v1 }
 0x342   : > { %4472 = vpow2.f32 %v1174_v24  ;;  %v1005_v24 = vsub.f32 %v5387_v56, %v5627_v37  ;;  %v1047_v56 = vsub.f32 %v5521_v49, %v5711_v18 }
 0x343   : > { %1272 = vadd.xlane.f32.xlu0 %v1271_v38 }
 0x344   : > { %v991_v28 = vpop.xlane.xlu0 %990  ;;  %v1070_v38 = vmul.f32 1.442695, %v1005_v24 }
 0x345   : > { %v1058_v43 = vsub.f32 %v5561_v11, %v991_v28  ;;  %v1059_v6 = vsub.f32 %v5563_v16, %v991_v28  ;;  %v1080_v11 = vmul.f32 1.442695, %v1010_v0  ;;  %v1082_v16 = vmul.f32 1.442695, %v1011_v25 }
 0x346   : > { %v1152_v0 = vmul.f32 1.442695, %v1046_v54 }
 0x347   : > { %v5735_v47 = vpop.eup %4470  ;;  %v1176_v46 = vmul.f32 1.442695, %v1058_v43  ;;  %v1178_v41 = vmul.f32 1.442695, %v1059_v6 }
 0x348   : > { %v5739_v45 = vpop.eup %4472 }
 0x349   : > { %4474 = vpow2.f32 %v1176_v46  ;;  %v1274_v26 = vadd.f32 %v5739_v45, %v5735_v47  ;;  %v1154_v46 = vmul.f32 1.442695, %v1047_v56 }
 0x34a   : > { %4476 = vpow2.f32 %v1178_v41 }
 0x34b   : > { %1275 = vadd.xlane.f32.xlu1 %v1274_v26  ;;  %4478 = vpow2.f32 %v1080_v11 }
 0x34c   : > { %4480 = vpow2.f32 %v1082_v16 }
 0x34d   : > { %4482 = vpow2.f32 %v1068_v7 }
 0x34e   : > { %4484 = vpow2.f32 %v1070_v38 }
 0x34f   : > { %v5745_v23 = vpop.eup %4474  ;;  %4486 = vpow2.f32 %v1152_v0 }
 0x350   : > { %v5749_v34 = vpop.eup %4476  ;;  %4488 = vpow2.f32 %v1154_v46  ;;  %v1049_v46 = vsub.f32 %v5529_v35, %v5709_v42  ;;  %v1008_v35 = vsub.f32 %v5395_v62, %v5615_v15 }
 0x351   : > { %v1277_v3 = vadd.f32 %v5749_v34, %v5745_v23  ;;  %v5755_v28 = vpop.eup %4478 }
 0x352   : > { %v5757_v43 = vpop.eup %4480 }
 0x353   : > { %1278 = vadd.xlane.f32.xlu2 %v1277_v3  ;;  %v1205_v37 = vadd.f32 %v5757_v43, %v5755_v28  ;;  %v5767_v41 = vpop.eup %4482 }
 0x354   : > { %v5769_v25 = vpop.eup %4484 }
 0x355   : > { %v1196_v57 = vadd.f32 %v5769_v25, %v5767_v41  ;;  %v5777_v24 = vpop.eup %4486 }
 0x356   : > { %v5759_v6 = vpop.xlane.xlu1 %1227  ;;  %8380 = vst [vmem:[#allocation51_spill] sm:$0xff] %v5777_v24  ;;  %v5779_v3 = vpop.eup %4488 }
 0x357   : > { %8381 = vst [vmem:[#allocation52_spill] sm:$0xff] %v5779_v3 }
 0x35b   : > { %1206 = vadd.xlane.f32.xlu2 %v1205_v37  ;;  %v1259_v37 = vadd.f32 %v5779_v3, %v5777_v24 }
 0x35e   : > { %v994_v26 = vpop.xlane.xlu1 %993  ;;  %v5773_v16 = vpop.xlane.xlu0 %1230 }
 0x35f   : > { %v1060_v11 = vsub.f32 %v5577_v20, %v994_v26  ;;  %v1061_v51 = vsub.f32 %v5579_v55, %v994_v26  ;;  %v1048_v55 = vsub.f32 %v5527_v36, %v5709_v42  ;;  %v1158_v36 = vmul.f32 1.442695, %v1049_v46 }
 0x361   : > { %v1180_v49 = vmul.f32 1.442695, %v1060_v11  ;;  %v1182_v18 = vmul.f32 1.442695, %v1061_v51 }
 0x363   : > { %4490 = vpow2.f32 %v1180_v49  ;;  %1197 = vadd.xlane.f32.xlu2 %v1196_v57  ;;  %v1156_v49 = vmul.f32 1.442695, %v1048_v55  ;;  %v1009_v55 = vsub.f32 %v5397_v2, %v5615_v15  ;;  %v1050_v15 = vsub.f32 %v5535_v33, %v5713_v60 }
 0x364   : > { %4492 = vpow2.f32 %v1182_v18 }
 0x366   : > { %v5781_v7 = vpop.xlane.xlu1 %1233  ;;  %v997_v20 = vpop.xlane.xlu0 %996 }
 0x367   : > { %v1062_v54 = vsub.f32 %v5591_v14, %v997_v20  ;;  %v1063_v56 = vsub.f32 %v5593_v53, %v997_v20 }
 0x369   : > { %v5783_v38 = vpop.eup %4490  ;;  %v1184_v26 = vmul.f32 1.442695, %v1062_v54  ;;  %v1186_v11 = vmul.f32 1.442695, %v1063_v56 }
 0x36a   : > { %v5791_v0 = vpop.eup %4492 }
 0x36b   : > { %1260 = vadd.xlane.f32.xlu2 %v1259_v37  ;;  %v1280_v51 = vadd.f32 %v5791_v0, %v5783_v38  ;;  %4494 = vpow2.f32 %v1184_v26  ;;  %v1078_v37 = vmul.f32 1.442695, %v1009_v55 }
 0x36c   : > { %4496 = vpow2.f32 %v1186_v11 }
 0x36d   : > { %1281 = vadd.xlane.f32.xlu1 %v1280_v51  ;;  %4498 = vpow2.f32 %v1156_v49  ;;  %v1051_v51 = vsub.f32 %v5537_v29, %v5713_v60  ;;  %v301_v29 = vld [vmem:[%s8194_s3 + $0x50] sm:$0xff]  ;;  %v1044_v60 = vsub.f32 %v5511_v50, %v5697_v61  ;;  %v1007_v50 = vsub.f32 %v5391_v59, %v5647_v31 }
 0x36e   : > { %v1000_v14 = vpop.xlane.xlu1 %999  ;;  %v5799_v57 = vpop.xlane.xlu0 %1236  ;;  %4500 = vpow2.f32 %v1158_v36  ;;  %v1160_v36 = vmul.f32 1.442695, %v1050_v15  ;;  %v8382_v59 = vld [vmem:[#allocation33_spill] sm:$0xff] }
 0x36f   : > { %v1064_v53 = vsub.f32 %v5611_v44, %v1000_v14  ;;  %v1065_v18 = vsub.f32 %v5613_v40, %v1000_v14  ;;  %v1076_v44 = vmul.f32 1.442695, %v1008_v35 }
 0x371   : > { %v1188_v42 = vmul.f32 1.442695, %v1064_v53  ;;  %v1190_v20 = vmul.f32 1.442695, %v1065_v18  ;;  %v5805_v54 = vpop.eup %4494  ;;  %v1162_v53 = vmul.f32 1.442695, %v1051_v51 }
 0x372   : > { %v5807_v56 = vpop.eup %4496 }
 0x373   : > { %4502 = vpow2.f32 %v1188_v42  ;;  %v1283_v40 = vadd.f32 %v5807_v56, %v5805_v54  ;;  %v5811_v46 = vpop.eup %4498 }
 0x374   : > { %4504 = vpow2.f32 %v1190_v20  ;;  %v5813_v62 = vpop.eup %4500 }
 0x375   : > { %1284 = vadd.xlane.f32.xlu0 %v1283_v40  ;;  %4506 = vpow2.f32 %v1076_v44  ;;  %v1262_v14 = vadd.f32 %v5813_v62, %v5811_v46  ;;  %v1045_v44 = vsub.f32 %v5513_v48, %v5697_v61  ;;  %v1006_v40 = vsub.f32 %v5389_v58, %v5647_v31 }
 0x376   : > { %v5815_v26 = vpop.xlane.xlu0 %1224  ;;  %4508 = vpow2.f32 %v1078_v37  ;;  %v5833_v33 = vpop.xlane.xlu1 %1221  ;;  %v1074_v58 = vmul.f32 1.442695, %v1007_v50  ;;  %v1043_v31 = vsub.f32 %v8382_v59, %v5701_v22 }
 0x377   : > { %4510 = vpow2.f32 %v1160_v36  ;;  %v1072_v48 = vmul.f32 1.442695, %v1006_v40 }
 0x378   : > { %4512 = vpow2.f32 %v1162_v53 }
 0x379   : > { %v5817_v2 = vpop.eup %4502 }
 0x37a   : > { %v5821_v11 = vpop.eup %4504 }
 0x37b   : > { %v1286_v49 = vadd.f32 %v5821_v11, %v5817_v2  ;;  %v5829_v18 = vpop.eup %4506 }
 0x37c   : > { %v5831_v35 = vpop.eup %4508 }
 0x37d   : > { %1287 = vadd.xlane.f32.xlu1 %v1286_v49  ;;  %1263 = vadd.xlane.f32.xlu0 %v1262_v14  ;;  %v1202_v51 = vadd.f32 %v5831_v35, %v5829_v18  ;;  %v1148_v49 = vmul.f32 1.442695, %v1044_v60  ;;  %v1042_v14 = vsub.f32 %v5503_v39, %v5701_v22  ;;  %v8384_v39 = vld [vmem:[#allocation32_spill] sm:$0xff] }
 0x37e   : > { %v1003_v42 = vpop.xlane.xlu0 %1002  ;;  %v5860_v53 = vpop.xlane.xlu1 %1215 }
 0x37f   : > { %v1066_v20 = vsub.f32 %v5657_v52, %v1003_v42  ;;  %v1067_v55 = vsub.f32 %v5659_v8, %v1003_v42  ;;  %v1150_v52 = vmul.f32 1.442695, %v1045_v44  ;;  %v5850_v8 = vpop.eup %4510  ;;  %v1041_v44 = vsub.f32 %v8384_v39, %v5677_v5  ;;  %v8388_v39 = vld [vmem:[#allocation28_spill] sm:$0xff] }
 0x380   : > { %v5852_v61 = vpop.eup %4512  ;;  %v1144_v40 = vmul.f32 1.442695, %v1042_v14  ;;  %v8386_v14 = vld [vmem:[#allocation30_spill] sm:$0xff] }
 0x381   : > { %v1192_v37 = vmul.f32 1.442695, %v1066_v20  ;;  %v1194_v15 = vmul.f32 1.442695, %v1067_v55  ;;  %v1265_v20 = vadd.f32 %v5852_v61, %v5850_v8 }
 0x383   : > { %357 = vperm.xlu2 %4397, %v301_v29   ;;  %4514 = vpow2.f32 %v1192_v37  ;;  %v8383_v29 = vld [vmem:[#allocation31_spill] sm:$0xff]  ;;  %v1146_v37 = vmul.f32 1.442695, %v1043_v31  ;;  %v1039_v31 = vsub.f32 %v8386_v14, %v5685_v17 }
 0x384   : > { %4516 = vpow2.f32 %v1194_v15  ;;  %v1040_v60 = vsub.f32 %v8383_v29, %v5677_v5  ;;  %v8387_v29 = vld [vmem:[#allocation27_spill] sm:$0xff] }
 0x385   : > { %1203 = vadd.xlane.f32.xlu1 %v1202_v51  ;;  %4518 = vpow2.f32 %v1148_v49  ;;  %v1142_v49 = vmul.f32 1.442695, %v1041_v44  ;;  %v1037_v44 = vsub.f32 %v8388_v39, %v5653_v27  ;;  %v1138_v3 = vmul.f32 1.442695, %v1039_v31 }
 0x386   : > { %v5854_v36 = vpop.xlane.xlu0 %1218  ;;  %4520 = vpow2.f32 %v1150_v52  ;;  %v1140_v51 = vmul.f32 1.442695, %v1040_v60  ;;  %v8385_v52 = vld [vmem:[#allocation29_spill] sm:$0xff]  ;;  %v1036_v60 = vsub.f32 %v8387_v29, %v5653_v27 }
 0x387   : > { %4522 = vpow2.f32 %v1072_v48  ;;  %v1038_v48 = vsub.f32 %v8385_v52, %v5685_v17  ;;  %v1240_v52 = vpop.xlane.xlu1 %1239  ;;  %v1134_v14 = vmul.f32 1.442695, %v1037_v44 }
 0x388   : > { %4524 = vpow2.f32 %v1074_v58 }
 0x389   : > { %v5862_v42 = vpop.eup %4514  ;;  %4526 = vpow2.f32 %v1144_v40 }
 0x38a   : > { %v5868_v55 = vpop.eup %4516  ;;  %4528 = vpow2.f32 %v1146_v37  ;;  %v1132_v37 = vmul.f32 1.442695, %v1036_v60 }
 0x38b   : > { %v1289_v22 = vadd.f32 %v5868_v55, %v5862_v42  ;;  %v5874_v15 = vpop.eup %4518  ;;  %4530 = vpow2.f32 %v1140_v51 }
 0x38c   : > { %v5876_v50 = vpop.eup %4520  ;;  %4532 = vpow2.f32 %v1142_v49 }
 0x38d   : > { %1266 = vadd.xlane.f32.xlu1 %v1265_v20  ;;  %1290 = vadd.xlane.f32.xlu0 %v1289_v22  ;;  %v5882_v59 = vpop.eup %4522  ;;  %v1256_v20 = vadd.f32 %v5876_v50, %v5874_v15  ;;  %v1136_v22 = vmul.f32 1.442695, %v1038_v48  ;;  %4534 = vrcp.f32 %v1240_v52 }
 0x38e   : > { %v5880_v58 = vpop.xlane.xlu0 %1209  ;;  %v5884_v5 = vpop.eup %4524 }
 0x38f   : > { %v1199_v40 = vadd.f32 %v5884_v5, %v5882_v59  ;;  %v5896_v17 = vpop.eup %4526  ;;  %4536 = vpow2.f32 %v1136_v22 }
 0x390   : > { %v5898_v51 = vpop.eup %4528 }
 0x391   : > { %v5900_v24 = vpop.eup %4530  ;;  %v1253_v49 = vadd.f32 %v5898_v51, %v5896_v17 }
 0x392   : > { %v5902_v27 = vpop.eup %4532 }
 0x393   : > { %v4535_v48 = vpop.eup %4534  ;;  %v1250_v31 = vadd.f32 %v5902_v27, %v5900_v24 }
 0x394   : > { %v1353_v22 = vmul.f32 %v4535_v48, %v5671_v4 }
 0x395   : > { %1257 = vadd.xlane.f32.xlu1 %v1256_v20  ;;  %1200 = vadd.xlane.f32.xlu0 %v1199_v40  ;;  %v5909_v60 = vpop.eup %4536 }
 0x396   : > { %v1243_v29 = vpop.xlane.xlu0 %1242 }
 0x397   : > { %4538 = vrcp.f32 %v1243_v29 }
 0x398   : > { %4540 = vpow2.f32 %v1138_v3  ;;  %v1352_v3 = vmul.f32 %v4535_v48, %v5669_v63  ;;  %v8390_v48 = vld [vmem:[#allocation38_spill] sm:$0xff] }
 0x399   : > { %4542 = vpow2.f32 %v1132_v37 }
 0x39a   : > { %4544 = vpow2.f32 %v1134_v14 }
 0x39b   : > { %4546 = vrcp.f32 %v5799_v57 }
 0x39c   : > { %4548 = vrcp.f32 %v5781_v7 }
 0x39d   : > { %1254 = vadd.xlane.f32.xlu1 %v1253_v49  ;;  %v4539_v20 = vpop.eup %4538  ;;  %1251 = vadd.xlane.f32.xlu0 %v1250_v31  ;;  %4550 = vrcp.f32 %v5773_v16 }
 0x39e   : > { %v5912_v39 = vpop.eup %4540  ;;  %v1354_v44 = vmul.f32 %v4539_v20, %v5703_v19  ;;  %v1355_v57 = vmul.f32 %v4539_v20, %v5705_v9  ;;  %v8389_v19 = vld [vmem:[#allocation40_spill] sm:$0xff]  ;;  %4552 = vrcp.f32 %v5759_v6  ;;  %v8391_v20 = vld [vmem:[#allocation39_spill] sm:$0xff]  ;;  %v8394_v6 = vld [vmem:[#allocation34_spill] sm:$0xff] }
 0x39f   : > { %v5918_v52 = vpop.eup %4542  ;;  %v1247_v7 = vadd.f32 %v5912_v39, %v5909_v60  ;;  %4554 = vrcp.f32 %v5833_v33 }
 0x3a0   : > { %v5920_v40 = vpop.eup %4544  ;;  %v1402_v37 = vpack.c.bf16 %v1354_v44, %v1352_v3  ;;  %v1403_v14 = vpack.c.bf16 %v1355_v57, %v1353_v22  ;;  %4556 = vrcp.f32 %v5815_v26 }
 0x3a1   : > { %v4547_v29 = vpop.eup %4546  ;;  %v1244_v63 = vadd.f32 %v5920_v40, %v5918_v52  ;;  %4558 = vrcp.f32 %v5854_v36 }
 0x3a2   : > { %1420 = vmatpush.bf16.xpose.msrb.mxu0 %v1402_v37  ;;  %1433 = vmatpush.bf16.xpose.msrb.mxu1 %v1403_v14  ;;  %v4549_v49 = vpop.eup %4548  ;;  %v1350_v4 = vmul.f32 %v4547_v29, %v5617_v30  ;;  %v1351_v9 = vmul.f32 %v4547_v29, %v8389_v19  ;;  %v8392_v30 = vld [vmem:[#allocation36_spill] sm:$0xff]  ;;  %v8393_v14 = vld [vmem:[#allocation37_spill] sm:$0xff]  ;;  %4560 = vrcp.f32 %v5860_v53 }
 0x3a3   : > { %v1348_v31 = vmul.f32 %v4549_v49, %v8390_v48  ;;  %v1349_v3 = vmul.f32 %v4549_v49, %v8391_v20  ;;  %v4551_v57 = vpop.eup %4550  ;;  %v8398_v53 = vld [vmem:[#allocation45_spill] sm:$0xff] }
 0x3a4   : > { %v4553_v16 = vpop.eup %4552  ;;  %v1346_v37 = vmul.f32 %v4551_v57, %v8392_v30  ;;  %v1347_v29 = vmul.f32 %v4551_v57, %v8393_v14  ;;  %v1213_v57 = vpop.xlane.xlu1 %1212 }
 0x3a5   : > { %1248 = vadd.xlane.f32.xlu1 %v1247_v7  ;;  %1245 = vadd.xlane.f32.xlu0 %v1244_v63  ;;  %v1400_v44 = vpack.c.bf16 %v1350_v4, %v1348_v31  ;;  %v1401_v22 = vpack.c.bf16 %v1351_v9, %v1349_v3  ;;  %v1344_v7 = vmul.f32 %v4553_v16, %v8394_v6  ;;  %v8395_v63 = vld [vmem:[#allocation35_spill] sm:$0xff]  ;;  %v4555_v48 = vpop.eup %4554  ;;  %v8396_v31 = vld [vmem:[#allocation41_spill] sm:$0xff]  ;;  %v8397_v3 = vld [vmem:[#allocation42_spill] sm:$0xff]  ;;  %4562 = vrcp.f32 %v1213_v57 }
 0x3a6   : > { %v1345_v19 = vmul.f32 %v4553_v16, %v8395_v63  ;;  %v4557_v9 = vpop.eup %4556  ;;  %v1340_v33 = vmul.f32 %v4555_v48, %v5631_v13  ;;  %v1341_v20 = vmul.f32 %v4555_v48, %v8396_v31  ;;  %v298_v13 = vld [vmem:[%s8194_s3 + $0x38] sm:$0xff]  ;;  %4564 = vrcp.f32 %v5880_v58  ;;  %v8402_v58 = vld [vmem:[#allocation49_spill] sm:$0xff]  ;;  %v8405_v57 = vld [vmem:[#allocation48_spill] sm:$0xff] }
 0x3a7   : > { %v1398_v49 = vpack.c.bf16 %v1346_v37, %v1344_v7  ;;  %v1342_v26 = vmul.f32 %v4557_v9, %v5635_v12  ;;  %v4559_v37 = vpop.eup %4558  ;;  %v8400_v7 = vld [vmem:[#allocation43_spill] sm:$0xff] }
 0x3a8   : > { %v1399_v4 = vpack.c.bf16 %v1347_v29, %v1345_v19  ;;  %v4561_v12 = vpop.eup %4560  ;;  %v1338_v14 = vmul.f32 %v4559_v37, %v8398_v53  ;;  %v8399_v29 = vld [vmem:[#allocation46_spill] sm:$0xff]  ;;  %v8401_v19 = vld [vmem:[#allocation44_spill] sm:$0xff] }
 0x3a9   : > { %v1396_v16 = vpack.c.bf16 %v1342_v26, %v1340_v33  ;;  %v1339_v6 = vmul.f32 %v4559_v37, %v8399_v29  ;;  %v1336_v63 = vmul.f32 %v4561_v12, %v8400_v7  ;;  %v1337_v48 = vmul.f32 %v4561_v12, %v8401_v19  ;;  %v8406_v29 = vld [vmem:[#allocation9_spill] sm:$0xff]  ;;  %v8407_v7 = vld [vmem:[#allocation10_spill] sm:$0xff] }
 0x3aa   : > { %1421 = vmatpush.bf16.xpose.msrb.mxu0 %v1400_v44  ;;  %1434 = vmatpush.bf16.xpose.msrb.mxu1 %v1401_v22  ;;  %v1343_v44 = vmul.f32 %v4557_v9, %v8397_v3  ;;  %v294_v22 = vld [vmem:[%s8194_s3 + $0x18] sm:$0xff] }
 0x3ab   : > { %v1395_v9 = vpack.c.bf16 %v1339_v6, %v1337_v48  ;;  %v3974_v6 = vsub.f32 1.0, %v8406_v29 }
 0x3ac   : > { %v1397_v30 = vpack.c.bf16 %v1343_v44, %v1341_v20  ;;  %v8403_v20 = vld [vmem:[#allocation47_spill] sm:$0xff]  ;;  %v8404_v44 = vld [vmem:[#allocation50_spill] sm:$0xff] }
 0x3ad   : > { %v5967_v48 = vperm.slane %v3974_v6, 0 }
 0x3ae   : > { %v5951_v36 = vpop.xlane.xlu2 %1269 }
 0x3af   : > { %8408 = vst [vmem:[#allocation33_spill] sm:$0xff] %v5967_v48 }
 0x3b2   : > { %1422 = vmatpush.bf16.xpose.msrb.mxu0 %v1398_v49  ;;  %1435 = vmatpush.bf16.xpose.msrb.mxu1 %v1399_v4  ;;  %v4563_v49 = vpop.eup %4562  ;;  %v1394_v4 = vpack.c.bf16 %v1338_v14, %v1336_v63  ;;  %v3975_v63 = vsub.f32 1.0, %v8407_v7 }
 0x3b3   : > { %v4565_v33 = vpop.eup %4564  ;;  %v1334_v3 = vmul.f32 %v4563_v49, %v8403_v20 }
 0x3b4   : > { %v1332_v31 = vmul.f32 %v4565_v33, %v8402_v58 }
 0x3b9   : > { %322 = vperm.xlu0 %4395, %v294_v22   ;;  %v1333_v22 = vmul.f32 %v4565_v33, %v8404_v44  ;;  %v8411_v33 = vld [vmem:[#allocation20_spill] sm:$0xff] }
 0x3ba   : > { %1423 = vmatpush.bf16.xpose.msrb.mxu0 %v1396_v16  ;;  %1436 = vmatpush.bf16.xpose.msrb.mxu1 %v1397_v30  ;;  %v1335_v16 = vmul.f32 %v4563_v49, %v8405_v57  ;;  %v1392_v30 = vpack.c.bf16 %v1334_v3, %v1332_v31  ;;  %v5973_v31 = vpop.xlane.xlu0 %1272 }
 0x3bc   : > { %v1393_v37 = vpack.c.bf16 %v1335_v16, %v1333_v22 }
 0x3be   : > { %342 = vperm.xlu1 %4396, %v298_v13   ;;  %v1276_v14 = vpop.xlane.xlu1 %1275 }
 0x3c2   : > { %1424 = vmatpush.bf16.xpose.msrb.mxu0 %v1394_v4  ;;  %1437 = vmatpush.bf16.xpose.msrb.mxu1 %v1395_v9  ;;  %v5969_v4 = vperm.slane %v3975_v63, 0  ;;  %v8410_v9 = vld [vmem:[#allocation19_spill] sm:$0xff] }
 0x3c4   : > { %8409 = vst [vmem:[#allocation31_spill] sm:$0xff] %v5969_v4 }
 0x3c6   : > { %v5957_v26 = vpop.xlane.xlu2 %1278 }
 0x3ca   : > { %1425 = vmatpush.bf16.xpose.msrb.mxu0 %v1392_v30  ;;  %1438 = vmatpush.bf16.xpose.msrb.mxu1 %v1393_v37 }
 0x3ce   : > { %v1207_v13 = vpop.xlane.xlu2 %1206 }
 0x3cf   : > { %4566 = vrcp.f32 %v1207_v13 }
 0x3d5   : > { %v4567_v37 = vpop.eup %4566 }
 0x3d6   : > { %v1198_v12 = vpop.xlane.xlu2 %1197  ;;  %v1330_v7 = vmul.f32 %v4567_v37, %v5755_v28 }
 0x3de   : > { %v5963_v53 = vpop.xlane.xlu2 %1260 }
 0x3e0   : > { %v1282_v20 = vpop.xlane.xlu1 %1281 }
 0x3e6   : > { %v358_v19 = vpop.permute.xlu2 %357 }
 0x3e7   : > { %v487_v49 = vadd.f32 %v8410_v9, %v358_v19  ;;  %v531_v58 = vadd.f32 %v8411_v33, %v358_v19  ;;  %v1331_v19 = vmul.f32 %v4567_v37, %v5757_v43 }
 0x3e8   : > { %v1285_v22 = vpop.xlane.xlu0 %1284 }
 0x3e9   : > { %v5976_v3 = vmul.f32 %v5967_v48, %v487_v49  ;;  %v5979_v44 = vmul.f32 %v5969_v4, %v531_v58 }
 0x3eb   : > { %8412 = vst [vmem:[#allocation32_spill] sm:$0xff] %v5979_v44 }
 0x3f0   : > { %v1288_v57 = vpop.xlane.xlu1 %1287  ;;  %v5981_v30 = vpop.xlane.xlu0 %1263 }
 0x3f8   : > { %v1204_v16 = vpop.xlane.xlu1 %1203 }
 0x3f9   : > { %4568 = vrcp.f32 %v1204_v16 }
 0x3fa   : > { %4570 = vrcp.f32 %v1198_v12 }
 0x3ff   : > { %v4569_v29 = vpop.eup %4568 }
 0x400   : > { %v1328_v6 = vmul.f32 %v4569_v29, %v5829_v18  ;;  %v1329_v63 = vmul.f32 %v4569_v29, %v5831_v35  ;;  %v1291_v9 = vpop.xlane.xlu0 %1290  ;;  %v4571_v16 = vpop.eup %4570 }
 0x401   : > { %4572 = vrcp.f32 %v1291_v9  ;;  %v1324_v43 = vmul.f32 %v4571_v16, %v5767_v41  ;;  %v1325_v12 = vmul.f32 %v4571_v16, %v5769_v25 }
 0x402   : > { %v1390_v33 = vpack.c.bf16 %v1330_v7, %v1328_v6  ;;  %v1391_v4 = vpack.c.bf16 %v1331_v19, %v1329_v63  ;;  %4574 = vrcp.f32 %v1288_v57 }
 0x404   : > { %1426 = vmatpush.bf16.xpose.msrb.mxu0 %v1390_v33  ;;  %1439 = vmatpush.bf16.xpose.msrb.mxu1 %v1391_v4 }
 0x407   : > { %v4573_v48 = vpop.eup %4572 }
 0x408   : > { %v1201_v13 = vpop.xlane.xlu0 %1200  ;;  %v4575_v44 = vpop.eup %4574  ;;  %v1386_v28 = vmul.f32 %v4573_v48, %v5862_v42  ;;  %v1387_v35 = vmul.f32 %v4573_v48, %v5868_v55 }
 0x409   : > { %4576 = vrcp.f32 %v1201_v13  ;;  %v1384_v57 = vmul.f32 %v4575_v44, %v5817_v2  ;;  %v1385_v29 = vmul.f32 %v4575_v44, %v5821_v11  ;;  %v1267_v2 = vpop.xlane.xlu1 %1266  ;;  %v5998_v11 = vpack.c.bf16 %v487_v49, %v487_v49 }
 0x40a   : > { %4578 = vrcp.f32 %v1285_v22 }
 0x40b   : > { %4580 = vrcp.f32 %v1282_v20  ;;  %v1418_v7 = vpack.c.bf16 %v1386_v28, %v1384_v57  ;;  %v1419_v63 = vpack.c.bf16 %v1387_v35, %v1385_v29 }
 0x40c   : > { %4582 = vrcp.f32 %v5957_v26 }
 0x40d   : > { %4584 = vrcp.f32 %v1276_v14 }
 0x40e   : > { %4586 = vrcp.f32 %v5973_v31 }
 0x40f   : > { %v4577_v18 = vpop.eup %4576  ;;  %4588 = vrcp.f32 %v5951_v36 }
 0x410   : > { %v1326_v37 = vmul.f32 %v4577_v18, %v5882_v59  ;;  %v1327_v4 = vmul.f32 %v4577_v18, %v5884_v5  ;;  %v4579_v42 = vpop.eup %4578  ;;  %v1252_v59 = vpop.xlane.xlu0 %1251  ;;  %v6000_v5 = vpack.c.bf16 %v531_v58, %v531_v58  ;;  %4590 = vrcp.f32 %v1267_v2  ;;  %v8417_v2 = vld [vmem:[#allocation51_spill] sm:$0xff] }
 0x411   : > { %v4581_v41 = vpop.eup %4580  ;;  %v1382_v25 = vmul.f32 %v4579_v42, %v5805_v54  ;;  %v1383_v55 = vmul.f32 %v4579_v42, %v5807_v56  ;;  %v1258_v58 = vpop.xlane.xlu1 %1257  ;;  %4592 = vrcp.f32 %v5981_v30  ;;  %v8416_v30 = vld [vmem:[#allocation12_spill] sm:$0xff] }
 0x412   : > { %v1388_v6 = vpack.c.bf16 %v1326_v37, %v1324_v43  ;;  %v1389_v22 = vpack.c.bf16 %v1327_v4, %v1325_v12  ;;  %v1380_v48 = vmul.f32 %v4581_v41, %v5783_v38  ;;  %v1381_v20 = vmul.f32 %v4581_v41, %v5791_v0  ;;  %v4583_v54 = vpop.eup %4582  ;;  %v8413_v43 = vld [vmem:[#allocation3_spill] sm:$0xff]  ;;  %v8414_v12 = vld [vmem:[#allocation4_spill] sm:$0xff] }
 0x413   : > { %v4585_v56 = vpop.eup %4584  ;;  %v1378_v14 = vmul.f32 %v4583_v54, %v5745_v23  ;;  %v1379_v49 = vmul.f32 %v4583_v54, %v5749_v34  ;;  %4594 = vrcp.f32 %v1258_v58 }
 0x414   : > { %1427 = vmatpush.bf16.xpose.msrb.mxu0 %v1388_v6  ;;  %1440 = vmatpush.bf16.xpose.msrb.mxu1 %v1389_v22  ;;  %v1416_v26 = vpack.c.bf16 %v1382_v25, %v1380_v48  ;;  %v1417_v44 = vpack.c.bf16 %v1383_v55, %v1381_v20  ;;  %v1376_v38 = vmul.f32 %v4585_v56, %v5735_v47  ;;  %v4587_v13 = vpop.eup %4586  ;;  %4596 = vrcp.f32 %v5963_v53  ;;  %v8418_v20 = vld [vmem:[#allocation52_spill] sm:$0xff] }
 0x415   : > { %v1377_v0 = vmul.f32 %v4585_v56, %v5739_v45  ;;  %v4589_v16 = vpop.eup %4588  ;;  %v1374_v31 = vmul.f32 %v4587_v13, %v5727_v1  ;;  %v1375_v23 = vmul.f32 %v4587_v13, %v5729_v32  ;;  %v8415_v32 = vld [vmem:[#allocation11_spill] sm:$0xff] }
 0x416   : > { %v1414_v9 = vpack.c.bf16 %v1378_v14, %v1376_v38  ;;  %v1372_v34 = vmul.f32 %v4589_v16, %v5719_v21  ;;  %v1373_v47 = vmul.f32 %v4589_v16, %v5721_v10  ;;  %v4591_v28 = vpop.eup %4590  ;;  %v522_v38 = vpop.f32.mrf.mxu1 }
 0x417   : > { %v1415_v33 = vpack.c.bf16 %v1379_v49, %v1377_v0  ;;  %v4593_v1 = vpop.eup %4592  ;;  %v1370_v21 = vmul.f32 %v4591_v28, %v5850_v8  ;;  %v1371_v10 = vmul.f32 %v4591_v28, %v5852_v61  ;;  %v478_v49 = vpop.f32.mrf.mxu0 }
 0x418   : > { %v1246_v19 = vpop.xlane.xlu0 %1245  ;;  %v1412_v36 = vpack.c.bf16 %v1374_v31, %v1372_v34  ;;  %v1413_v18 = vpack.c.bf16 %v1375_v23, %v1373_v47  ;;  %v8419_v31 = vld [vmem:[#allocation13_spill] sm:$0xff] }
 0x419   : > { %v1255_v35 = vpop.xlane.xlu1 %1254  ;;  %v4595_v25 = vpop.eup %4594 }
 0x41a   : > { %4598 = vrcp.f32 %v1255_v35  ;;  %v4597_v55 = vpop.eup %4596  ;;  %v1364_v61 = vmul.f32 %v4595_v25, %v5874_v15  ;;  %v1365_v53 = vmul.f32 %v4595_v25, %v5876_v50 }
 0x41b   : > { %1428 = vmatmul.bf16.vlgmr.msrb.gmra.mxu0 %v5998_v11  ;;  %1441 = vmatmul.bf16.vlgmr.msrb.gmra.mxu1 %v6000_v5  ;;  %4600 = vrcp.f32 %v1252_v59  ;;  %v1366_v48 = vmul.f32 %v4597_v55, %v8417_v2 }
 0x41c   : > { %1446 = vmatpush.bf16.xpose.msra.mxu0 %v1418_v7  ;;  %1459 = vmatpush.bf16.xpose.msra.mxu1 %v1419_v63  ;;  %v1368_v7 = vmul.f32 %v4593_v1, %v5811_v46  ;;  %v1369_v63 = vmul.f32 %v4593_v1, %v5813_v62  ;;  %v1367_v46 = vmul.f32 %v4597_v55, %v8418_v20 }
 0x41d   : > { %v1408_v62 = vpack.c.bf16 %v1366_v48, %v1364_v61 }
 0x41e   : > { %v1410_v42 = vpack.c.bf16 %v1370_v21, %v1368_v7  ;;  %v1411_v41 = vpack.c.bf16 %v1371_v10, %v1369_v63 }
 0x421   : > { %v1249_v8 = vpop.xlane.xlu1 %1248 }
 0x422   : > { %4602 = vrcp.f32 %v1249_v8 }
 0x423   : > { %4604 = vrcp.f32 %v1246_v19  ;;  %v8420_v19 = vld [vmem:[#allocation14_spill] sm:$0xff] }
 0x424   : > { %1447 = vmatpush.bf16.xpose.msra.mxu0 %v1416_v26  ;;  %1460 = vmatpush.bf16.xpose.msra.mxu1 %v1417_v44  ;;  %v4599_v26 = vpop.eup %4598  ;;  %v1409_v44 = vpack.c.bf16 %v1367_v46, %v1365_v53 }
 0x425   : > { %v4601_v54 = vpop.eup %4600  ;;  %v1362_v14 = vmul.f32 %v4599_v26, %v5896_v17  ;;  %v1363_v50 = vmul.f32 %v4599_v26, %v5898_v51 }
 0x426   : > { %v1360_v59 = vmul.f32 %v4601_v54, %v5900_v24  ;;  %v1361_v15 = vmul.f32 %v4601_v54, %v5902_v27 }
 0x428   : > { %v1407_v13 = vpack.c.bf16 %v1363_v50, %v1361_v15 }
 0x42b   : > { %v323_v45 = vpop.permute.xlu0 %322 }
 0x42c   : > { %1448 = vmatpush.bf16.xpose.msra.mxu0 %v1414_v9  ;;  %1461 = vmatpush.bf16.xpose.msra.mxu1 %v1415_v33  ;;  %v469_v37 = vadd.f32 %v8413_v43, %v323_v45  ;;  %v513_v4 = vadd.f32 %v8414_v12, %v323_v45  ;;  %v4603_v9 = vpop.eup %4602  ;;  %v1406_v33 = vpack.c.bf16 %v1362_v14, %v1360_v59 }
 0x42d   : > { %v4605_v16 = vpop.eup %4604  ;;  %v1358_v17 = vmul.f32 %v4603_v9, %v5909_v60  ;;  %v1359_v27 = vmul.f32 %v4603_v9, %v5912_v39 }
 0x42e   : > { %v629_v57 = vmul.f32 %v8415_v32, %v469_v37  ;;  %v630_v29 = vmul.f32 %v8416_v30, %v513_v4  ;;  %v1356_v24 = vmul.f32 %v4605_v16, %v5918_v52  ;;  %v1357_v51 = vmul.f32 %v4605_v16, %v5920_v40 }
 0x430   : > { %v1474_v6 = vpack.c.bf16 %v629_v57, %v629_v57  ;;  %v1475_v22 = vpack.c.bf16 %v630_v29, %v630_v29  ;;  %v343_v56 = vpop.permute.xlu1 %342 }
 0x431   : > { %v479_v0 = vadd.f32 %v478_v49, %v343_v56  ;;  %v523_v58 = vadd.f32 %v522_v38, %v343_v56 }
 0x432   : > { %1480 = vxpose.binary.xlu2.c.b16.start.end [1/2] (short) %v1475_v22, %v1474_v6, 128 }
 0x433   : > { %v639_v23 = vmul.f32 %v8419_v31, %v479_v0  ;;  %v640_v34 = vmul.f32 %v8420_v19, %v523_v58 }
 0x434   : > { %1449 = vmatpush.bf16.xpose.msra.mxu0 %v1412_v36  ;;  %1462 = vmatpush.bf16.xpose.msra.mxu1 %v1413_v18  ;;  %v1404_v36 = vpack.c.bf16 %v1358_v17, %v1356_v24  ;;  %v1405_v18 = vpack.c.bf16 %v1359_v27, %v1357_v51 }
 0x435   : > { %v1476_v47 = vpack.c.bf16 %v639_v23, %v639_v23  ;;  %v1477_v45 = vpack.c.bf16 %v640_v34, %v640_v34 }
 0x437   : > { %v1553_v28 = vsel %vm544_vm1, %v1476_v47, 0  ;;  %v1556_v35 = vsel %vm544_vm1, %v1477_v45, 0 }
 0x43c   : > { %1450 = vmatpush.bf16.xpose.msra.mxu0 %v1410_v42  ;;  %1463 = vmatpush.bf16.xpose.msra.mxu1 %v1411_v41 }
 0x444   : > { %1451 = vmatpush.bf16.xpose.msra.mxu0 %v1408_v62  ;;  %1464 = vmatpush.bf16.xpose.msra.mxu1 %v1409_v44 }
 0x44c   : > { %1452 = vmatpush.bf16.xpose.msra.mxu0 %v1406_v33  ;;  %1465 = vmatpush.bf16.xpose.msra.mxu1 %v1407_v13 }
 0x454   : > { %1453 = vmatpush.bf16.xpose.msra.mxu0 %v1404_v36  ;;  %1466 = vmatpush.bf16.xpose.msra.mxu1 %v1405_v18 }
 0x45b   : > { %1454 = vmatmul.bf16.vlgmr.msra.gmra.mxu0 %v5998_v11  ;;  %1467 = vmatmul.bf16.vlgmr.msra.gmra.mxu1 %v6000_v5  ;;  %v8422_v11 = vld [vmem:[#allocation32_spill] sm:$0xff] }
 0x45c   : > { %1565 = vmatpush.bf16.msrb.mxu0 %v1553_v28  ;;  %1654 = vmatpush.bf16.msrb.mxu1 %v1556_v35 }
 0x498   : > { %v1429_v60 = vpop.f32.mrf.mxu0  ;;  %v1442_v52 = vpop.f32.mrf.mxu1 }
 0x499   : > { %v1443_v40 = vadd.f32 %v1442_v52, %v1429_v60 }
 0x49b   : > { %v3966_v39 = vmul.f32 %v1443_v40, %v8415_v32 }
 0x49d   : > { %v6046_v43 = vadd.f32 %v5976_v3, %v3966_v39 }
 0x49f   : > { %8421 = vst [vmem:[#allocation29_spill] sm:$0xff] %v6046_v43 }
 0x4a0   : > { %v1431_v37 = vpop.f32.mrf.mxu0  ;;  %v1444_v12 = vpop.f32.mrf.mxu1 }
 0x4d3   : > { %v1488_v29 = vpop.trf.xlu2 }
 0x4d4   : > { %4256 = vmatmul.msk.bf16.vlgmr.msrb.gmra.mxu0 %vm675_vm2, %v1488_v29  ;;  %4272 = vmatmul.msk.bf16.vlgmr.msrb.gmra.mxu1 %vm675_vm2, %v1488_v29 }
 0x4d8   : > { %v1455_v4 = vpop.f32.mrf.mxu0  ;;  %v1468_v1 = vpop.f32.mrf.mxu1 }
 0x4d9   : > { %v1469_v57 = vadd.f32 %v1468_v1, %v1455_v4 }
 0x4db   : > { %v3967_v21 = vmul.f32 %v1469_v57, %v8416_v30  ;;  %v1489_v22 = vpop.trf.xlu2 }
 0x4dd   : > { %v6052_v5 = vadd.f32 %v8422_v11, %v3967_v21 }
 0x4df   : > { %8423 = vst [vmem:[#allocation30_spill] sm:$0xff] %v6052_v5 }
 0x4e0   : > { %v1457_v10 = vpop.f32.mrf.mxu0  ;;  %v1470_v6 = vpop.f32.mrf.mxu1 }
 0x4e3   : > { %v1490_v3 = vpop.trf.xlu2 }
 0x4e4   : > { %4257 = vmatmul.msk.bf16.gmra.mxu0 %vm675_vm2, %v1490_v3  ;;  %4273 = vmatmul.msk.bf16.gmra.mxu1 %vm675_vm2, %v1490_v3 }
 0x4eb   : > { %v1491_v7 = vpop.trf.xlu2 }
 0x4f3   : > { %v1492_v63 = vpop.trf.xlu2 }
 0x4f4   : > { %4258 = vmatmul.msk.bf16.gmra.mxu0 %vm675_vm2, %v1492_v63  ;;  %4274 = vmatmul.msk.bf16.gmra.mxu1 %vm675_vm2, %v1492_v63 }
 0x4fb   : > { %v1493_v42 = vpop.trf.xlu2 }
 0x503   : > { %v1494_v41 = vpop.trf.xlu2 }
 0x504   : > { %4259 = vmatmul.msk.bf16.gmra.mxu0 %vm675_vm2, %v1494_v41  ;;  %4275 = vmatmul.msk.bf16.gmra.mxu1 %vm675_vm2, %v1494_v41 }
 0x50b   : > { %v1495_v25 = vpop.trf.xlu2 }
 0x513   : > { %v1496_v55 = vpop.trf.xlu2 }
 0x514   : > { %4260 = vmatmul.msk.bf16.gmra.mxu0 %vm675_vm2, %v1496_v55  ;;  %4276 = vmatmul.msk.bf16.gmra.mxu1 %vm675_vm2, %v1496_v55 }
 0x51b   : > { %v1497_v8 = vpop.trf.xlu2 }
 0x523   : > { %v1498_v61 = vpop.trf.xlu2 }
 0x524   : > { %4261 = vmatmul.msk.bf16.gmra.mxu0 %vm675_vm2, %v1498_v61  ;;  %4277 = vmatmul.msk.bf16.gmra.mxu1 %vm675_vm2, %v1498_v61 }
 0x52b   : > { %v1499_v53 = vpop.trf.xlu2 }
 0x533   : > { %v1500_v2 = vpop.trf.xlu2 }
 0x534   : > { %4262 = vmatmul.msk.bf16.gmra.mxu0 %vm675_vm2, %v1500_v2  ;;  %4278 = vmatmul.msk.bf16.gmra.mxu1 %vm675_vm2, %v1500_v2 }
 0x53b   : > { %v1501_v48 = vpop.trf.xlu2 }
 0x543   : > { %v1502_v20 = vpop.trf.xlu2 }
 0x544   : > { %4263 = vmatmul.msk.bf16.gmra.mxu0 %vm675_vm2, %v1502_v20  ;;  %4279 = vmatmul.msk.bf16.gmra.mxu1 %vm675_vm2, %v1502_v20 }
 0x551   : > { %v6068_v46 = vpop.f32.mrf.mxu0  ;;  %v6070_v26 = vpop.f32.mrf.mxu1 }
 0x552   : > { %v1736_v10 = vmax.f32 %v6068_v46, %v6070_v26 }
 0x554   : > { %4264 = vmatmul.msk.bf16.gmra.mxu0 %vm675_vm2, %v1489_v22  ;;  %4280 = vmatmul.msk.bf16.gmra.mxu1 %vm675_vm2, %v1489_v22 }
 0x559   : > { %v6074_v62 = vpop.f32.mrf.mxu0  ;;  %v6076_v44 = vpop.f32.mrf.mxu1 }
 0x55a   : > { %v1739_v63 = vmax.f32 %v6074_v62, %v6076_v44 }
 0x561   : > { %v6078_v54 = vpop.f32.mrf.mxu0  ;;  %v6080_v56 = vpop.f32.mrf.mxu1 }
 0x562   : > { %v1742_v57 = vmax.f32 %v6078_v54, %v6080_v56 }
 0x564   : > { %4265 = vmatmul.msk.bf16.gmra.mxu0 %vm675_vm2, %v1491_v7  ;;  %4281 = vmatmul.msk.bf16.gmra.mxu1 %vm675_vm2, %v1491_v7 }
 0x569   : > { %v6084_v59 = vpop.f32.mrf.mxu0  ;;  %v6086_v14 = vpop.f32.mrf.mxu1 }
 0x56a   : > { %v1745_v6 = vmax.f32 %v6084_v59, %v6086_v14 }
 0x571   : > { %v6088_v15 = vpop.f32.mrf.mxu0  ;;  %v6090_v50 = vpop.f32.mrf.mxu1 }
 0x572   : > { %v1748_v37 = vmax.f32 %v6088_v15, %v6090_v50 }
 0x574   : > { %4266 = vmatmul.msk.bf16.gmra.mxu0 %vm675_vm2, %v1493_v42  ;;  %4282 = vmatmul.msk.bf16.gmra.mxu1 %vm675_vm2, %v1493_v42 }
 0x579   : > { %v6094_v49 = vpop.f32.mrf.mxu0  ;;  %v6096_v38 = vpop.f32.mrf.mxu1 }
 0x57a   : > { %v1751_v29 = vmax.f32 %v6094_v49, %v6096_v38 }
 0x581   : > { %v6098_v0 = vpop.f32.mrf.mxu0  ;;  %v6100_v58 = vpop.f32.mrf.mxu1 }
 0x582   : > { %v1754_v35 = vmax.f32 %v6098_v0, %v6100_v58 }
 0x584   : > { %4267 = vmatmul.msk.bf16.gmra.mxu0 %vm675_vm2, %v1495_v25  ;;  %4283 = vmatmul.msk.bf16.gmra.mxu1 %vm675_vm2, %v1495_v25 }
 0x589   : > { %v6104_v9 = vpop.f32.mrf.mxu0  ;;  %v6106_v33 = vpop.f32.mrf.mxu1 }
 0x58a   : > { %v1757_v12 = vmax.f32 %v6104_v9, %v6106_v33 }
 0x591   : > { %v6108_v13 = vpop.f32.mrf.mxu0  ;;  %v6110_v16 = vpop.f32.mrf.mxu1 }
 0x592   : > { %v1760_v45 = vmax.f32 %v6108_v13, %v6110_v16 }
 0x594   : > { %4268 = vmatmul.msk.bf16.gmra.mxu0 %vm675_vm2, %v1497_v8  ;;  %4284 = vmatmul.msk.bf16.gmra.mxu1 %vm675_vm2, %v1497_v8  ;;  %v1503_v8 = vpop.trf.xlu2 }
 0x599   : > { %v6114_v23 = vpop.f32.mrf.mxu0  ;;  %v6116_v34 = vpop.f32.mrf.mxu1 }
 0x59a   : > { %v1763_v60 = vmax.f32 %v6114_v23, %v6116_v34 }
 0x5a1   : > { %v6118_v24 = vpop.f32.mrf.mxu0  ;;  %v6120_v17 = vpop.f32.mrf.mxu1 }
 0x5a2   : > { %v1766_v51 = vmax.f32 %v6118_v24, %v6120_v17 }
 0x5a4   : > { %1767 = vmax.xlane.f32.xlu1 %v1766_v51  ;;  %4269 = vmatmul.msk.bf16.gmra.mxu0 %vm675_vm2, %v1499_v53 }
 0x5a5   : > { %4285 = vmatmul.msk.bf16.gmra.mxu1 %vm675_vm2, %v1499_v53 }
 0x5a9   : > { %v6126_v27 = vpop.f32.mrf.mxu0  ;;  %v6128_v47 = vpop.f32.mrf.mxu1 }
 0x5aa   : > { %v1769_v36 = vmax.f32 %v6126_v27, %v6128_v47 }
 0x5ac   : > { %1761 = vmax.xlane.f32.xlu1 %v1760_v45  ;;  %1770 = vmax.xlane.f32.xlu0 %v1769_v36 }
 0x5b1   : > { %v6134_v18 = vpop.f32.mrf.mxu0  ;;  %v6136_v28 = vpop.f32.mrf.mxu1 }
 0x5b2   : > { %v1772_v52 = vmax.f32 %v6134_v18, %v6136_v28 }
 0x5b4   : > { %1755 = vmax.xlane.f32.xlu1 %v1754_v35  ;;  %1764 = vmax.xlane.f32.xlu0 %v1763_v60 }
 0x5b5   : > { %1773 = vmax.xlane.f32.xlu2 %v1772_v52  ;;  %4270 = vmatmul.msk.bf16.gmra.mxu0 %vm675_vm2, %v1501_v48 }
 0x5b6   : > { %4286 = vmatmul.msk.bf16.gmra.mxu1 %vm675_vm2, %v1501_v48 }
 0x5b9   : > { %v6146_v40 = vpop.f32.mrf.mxu0  ;;  %v6148_v39 = vpop.f32.mrf.mxu1 }
 0x5ba   : > { %v1775_v42 = vmax.f32 %v6146_v40, %v6148_v39 }
 0x5bc   : > { %1749 = vmax.xlane.f32.xlu1 %v1748_v37  ;;  %1758 = vmax.xlane.f32.xlu0 %v1757_v12 }
 0x5c1   : > { %v6154_v4 = vpop.f32.mrf.mxu0  ;;  %v6156_v1 = vpop.f32.mrf.mxu1 }
 0x5c2   : > { %v1778_v61 = vmax.f32 %v6154_v4, %v6156_v1 }
 0x5c4   : > { %1743 = vmax.xlane.f32.xlu1 %v1742_v57  ;;  %1752 = vmax.xlane.f32.xlu0 %v1751_v29 }
 0x5c5   : > { %4271 = vmatmul.msk.bf16.gmra.mxu0 %vm675_vm2, %v1503_v8 }
 0x5c6   : > { %4287 = vmatmul.msk.bf16.gmra.mxu1 %vm675_vm2, %v1503_v8 }
 0x5c9   : > { %v6162_v21 = vpop.f32.mrf.mxu0  ;;  %v6164_v11 = vpop.f32.mrf.mxu1 }
 0x5ca   : > { %v1781_v22 = vmax.f32 %v6162_v21, %v6164_v11 }
 0x5cc   : > { %1737 = vmax.xlane.f32.xlu1 %v1736_v10  ;;  %1746 = vmax.xlane.f32.xlu0 %v1745_v6 }
 0x5d1   : > { %v6172_v3 = vpop.f32.mrf.mxu0  ;;  %v6174_v7 = vpop.f32.mrf.mxu1 }
 0x5d2   : > { %8424 = vst [vmem:[#allocation27_spill] sm:$0xff] %v6172_v3  ;;  %v1784_v55 = vmax.f32 %v6172_v3, %v6174_v7 }
 0x5d3   : > { %8425 = vst [vmem:[#allocation28_spill] sm:$0xff] %v6174_v7 }
 0x5d4   : > { %1740 = vmax.xlane.f32.xlu0 %v1739_v63  ;;  %1782 = vmax.xlane.f32.xlu1 %v1781_v22 }
 0x5d9   : > { %v6180_v41 = vpop.f32.mrf.mxu0  ;;  %v6182_v25 = vpop.f32.mrf.mxu1 }
 0x5da   : > { %v1787_v45 = vmax.f32 %v6180_v41, %v6182_v25 }
 0x5dc   : > { %1776 = vmax.xlane.f32.xlu0 %v1775_v42  ;;  %1785 = vmax.xlane.f32.xlu1 %v1784_v55 }
 0x5e1   : > { %v6190_v53 = vpop.f32.mrf.mxu0  ;;  %v6192_v2 = vpop.f32.mrf.mxu1 }
 0x5e2   : > { %v1790_v48 = vmax.f32 %v6190_v53, %v6192_v2 }
 0x5e4   : > { %1779 = vmax.xlane.f32.xlu0 %v1778_v61  ;;  %1791 = vmax.xlane.f32.xlu1 %v1790_v48 }
 0x5e9   : > { %v6196_v20 = vpop.f32.mrf.mxu0  ;;  %v6198_v51 = vpop.f32.mrf.mxu1 }
 0x5ea   : > { %v1793_v60 = vmax.f32 %v6196_v20, %v6198_v51 }
 0x5ec   : > { %1788 = vmax.xlane.f32.xlu0 %v1787_v45 }
 0x5f1   : > { %v6202_v36 = vpop.f32.mrf.mxu0  ;;  %v6204_v35 = vpop.f32.mrf.mxu1 }
 0x5f2   : > { %v1796_v52 = vmax.f32 %v6202_v36, %v6204_v35 }
 0x5f4   : > { %1794 = vmax.xlane.f32.xlu0 %v1793_v60  ;;  %1797 = vmax.xlane.f32.xlu1 %v1796_v52 }
 0x5f9   : > { %v6210_v37 = vpop.f32.mrf.mxu0  ;;  %v6212_v12 = vpop.f32.mrf.mxu1 }
 0x5fa   : > { %v1799_v57 = vmax.f32 %v6210_v37, %v6212_v12 }
 0x5fc   : > { %1800 = vmax.xlane.f32.xlu0 %v1799_v57 }
 0x601   : > { %v6224_v48 = vpop.f32.mrf.mxu0  ;;  %v6226_v52 = vpop.f32.mrf.mxu1 }
 0x609   : > { %v6238_v30 = vpop.f32.mrf.mxu0 }
 0x617   : > { %v6216_v29 = vpop.xlane.xlu1 %1767 }
 0x61f   : > { %v1762_v10 = vpop.xlane.xlu1 %1761  ;;  %v6218_v6 = vpop.xlane.xlu0 %1770 }
 0x627   : > { %v1756_v22 = vpop.xlane.xlu1 %1755  ;;  %v6220_v63 = vpop.xlane.xlu0 %1764 }
 0x62f   : > { %v1750_v42 = vpop.xlane.xlu1 %1749  ;;  %v1759_v55 = vpop.xlane.xlu0 %1758 }
 0x630   : > { %v1840_v8 = vsub.f32 %v6088_v15, %v1750_v42  ;;  %v1841_v61 = vsub.f32 %v6090_v50, %v1750_v42  ;;  %v1844_v15 = vsub.f32 %v6098_v0, %v1756_v22 }
 0x632   : > { %v1912_v45 = vmul.f32 1.442695, %v1840_v8  ;;  %v1914_v60 = vmul.f32 1.442695, %v1841_v61  ;;  %v1845_v8 = vsub.f32 %v6100_v58, %v1756_v22  ;;  %v1802_v58 = vmax.f32 %v6224_v48, %v6226_v52 }
 0x634   : > { %4606 = vpow2.f32 %v1912_v45 }
 0x635   : > { %4608 = vpow2.f32 %v1914_v60  ;;  %v6242_v60 = vpop.f32.mrf.mxu1 }
 0x637   : > { %v6228_v57 = vpop.xlane.xlu1 %1743  ;;  %v1753_v5 = vpop.xlane.xlu0 %1752 }
 0x638   : > { %v1842_v43 = vsub.f32 %v6094_v49, %v1753_v5  ;;  %v1843_v19 = vsub.f32 %v6096_v38, %v1753_v5  ;;  %v1920_v49 = vmul.f32 1.442695, %v1844_v15  ;;  %v1922_v5 = vmul.f32 1.442695, %v1845_v8 }
 0x639   : > { %v1847_v15 = vsub.f32 %v6106_v33, %v1759_v55  ;;  %v1849_v33 = vsub.f32 %v6110_v16, %v1762_v10 }
 0x63a   : > { %v6232_v31 = vpop.eup %4606  ;;  %v1916_v50 = vmul.f32 1.442695, %v1842_v43  ;;  %v1918_v61 = vmul.f32 1.442695, %v1843_v19  ;;  %v1846_v19 = vsub.f32 %v6104_v9, %v1759_v55 }
 0x63b   : > { %8426 = vst [vmem:[#allocation40_spill] sm:$0xff] %v6232_v31  ;;  %v6235_v42 = vpop.eup %4608  ;;  %v1926_v32 = vmul.f32 1.442695, %v1847_v15 }
 0x63c   : > { %8427 = vst [vmem:[#allocation38_spill] sm:$0xff] %v6235_v42  ;;  %v2036_v45 = vadd.f32 %v6235_v42, %v6232_v31  ;;  %4610 = vpow2.f32 %v1916_v50  ;;  %v6256_v50 = vpop.f32.mrf.mxu0  ;;  %v1924_v9 = vmul.f32 1.442695, %v1846_v19  ;;  %v1848_v42 = vsub.f32 %v6108_v13, %v1762_v10 }
 0x63d   : > { %4612 = vpow2.f32 %v1918_v61  ;;  %v6260_v61 = vpop.f32.mrf.mxu1  ;;  %v1805_v19 = vmax.f32 %v6238_v30, %v6242_v60 }
 0x63e   : > { %2037 = vadd.xlane.f32.xlu1 %v2036_v45  ;;  %4614 = vpow2.f32 %v1920_v49  ;;  %v1928_v31 = vmul.f32 1.442695, %v1848_v42  ;;  %v1808_v42 = vmax.f32 %v6256_v50, %v6260_v61 }
 0x63f   : > { %v6244_v38 = vpop.xlane.xlu0 %1746  ;;  %v6246_v43 = vpop.xlane.xlu1 %1737  ;;  %4616 = vpow2.f32 %v1922_v5 }
 0x640   : > { %4618 = vpow2.f32 %v1924_v9  ;;  %v1851_v9 = vsub.f32 %v6116_v34, %v6220_v63  ;;  %v1853_v34 = vsub.f32 %v6120_v17, %v6216_v29 }
 0x641   : > { %4620 = vpow2.f32 %v1926_v32  ;;  %v1850_v32 = vsub.f32 %v6114_v23, %v6220_v63 }
 0x642   : > { %v6248_v0 = vpop.eup %4610  ;;  %4622 = vpow2.f32 %v1928_v31  ;;  %v1934_v23 = vmul.f32 1.442695, %v1851_v9 }
 0x643   : > { %8428 = vst [vmem:[#allocation39_spill] sm:$0xff] %v6248_v0  ;;  %v6253_v22 = vpop.eup %4612 }
 0x644   : > { %8429 = vst [vmem:[#allocation36_spill] sm:$0xff] %v6253_v22  ;;  %v2039_v8 = vadd.f32 %v6253_v22, %v6248_v0  ;;  %v6264_v49 = vpop.eup %4614  ;;  %v6278_v15 = vpop.f32.mrf.mxu0 }
 0x645   : > { %8430 = vst [vmem:[#allocation37_spill] sm:$0xff] %v6264_v49  ;;  %v6266_v5 = vpop.eup %4616  ;;  %v6280_v13 = vpop.f32.mrf.mxu1 }
 0x646   : > { %1803 = vmax.xlane.f32.xlu1 %v1802_v58  ;;  %2040 = vadd.xlane.f32.xlu0 %v2039_v8  ;;  %8431 = vst [vmem:[#allocation34_spill] sm:$0xff] %v6266_v5  ;;  %v2042_v58 = vadd.f32 %v6266_v5, %v6264_v49  ;;  %v1930_v8 = vmul.f32 1.442695, %v1849_v33  ;;  %v6282_v16 = vpop.eup %4618  ;;  %v1852_v5 = vsub.f32 %v6118_v24, %v6216_v29 }
 0x647   : > { %v6262_v45 = vpop.xlane.xlu0 %1740  ;;  %v6270_v55 = vpop.xlane.xlu1 %1782  ;;  %8432 = vst [vmem:[#allocation35_spill] sm:$0xff] %v6282_v16  ;;  %v1811_v9 = vmax.f32 %v6278_v15, %v6280_v13 }
 0x648   : > { %v6284_v10 = vpop.eup %4620  ;;  %4624 = vpow2.f32 %v1930_v8  ;;  %v1932_v8 = vmul.f32 1.442695, %v1850_v32  ;;  %v1936_v32 = vmul.f32 1.442695, %v1852_v5 }
 0x649   : > { %8433 = vst [vmem:[#allocation41_spill] sm:$0xff] %v6284_v10  ;;  %v6298_v31 = vpop.eup %4622 }
 0x64a   : > { %8435 = vst [vmem:[#allocation45_spill] sm:$0xff] %v6298_v31  ;;  %4626 = vpow2.f32 %v1932_v8  ;;  %v1854_v8 = vsub.f32 %v6126_v27, %v6218_v6 }
 0x64b   : > { %4628 = vpow2.f32 %v1934_v23  ;;  %v1855_v23 = vsub.f32 %v6128_v47, %v6218_v6 }
 0x64c   : > { %v6306_v63 = vpop.f32.mrf.mxu0  ;;  %4630 = vpow2.f32 %v1936_v32  ;;  %v1774_v32 = vpop.xlane.xlu2 %1773 }
 0x64d   : > { %v6308_v49 = vpop.f32.mrf.mxu1  ;;  %v1942_v47 = vmul.f32 1.442695, %v1855_v23  ;;  %v1856_v3 = vsub.f32 %v6134_v18, %v1774_v32 }
 0x64e   : > { %2043 = vadd.xlane.f32.xlu1 %v2042_v58  ;;  %1806 = vmax.xlane.f32.xlu0 %v1805_v19  ;;  %v2045_v58 = vadd.f32 %v6284_v10, %v6282_v16  ;;  %v6300_v0 = vpop.eup %4624  ;;  %v1814_v5 = vmax.f32 %v6306_v63, %v6308_v49 }
 0x64f   : > { %v6276_v22 = vpop.xlane.xlu0 %1776  ;;  %v6292_v33 = vpop.xlane.xlu1 %1785  ;;  %8436 = vst [vmem:[#allocation46_spill] sm:$0xff] %v6300_v0 }
 0x650   : > { %8434 = vst [vmem:[#allocation42_spill] sm:$0xff] %v6292_v33  ;;  %v6318_v17 = vpop.eup %4626 }
 0x651   : > { %8437 = vst [vmem:[#allocation43_spill] sm:$0xff] %v6318_v17  ;;  %v6320_v29 = vpop.eup %4628 }
 0x652   : > { %8438 = vst [vmem:[#allocation44_spill] sm:$0xff] %v6320_v29 }
 0x656   : > { %1809 = vmax.xlane.f32.xlu1 %v1808_v42  ;;  %2046 = vadd.xlane.f32.xlu0 %v2045_v58  ;;  %v2048_v42 = vadd.f32 %v6300_v0, %v6298_v31  ;;  %v1938_v58 = vmul.f32 1.442695, %v1853_v34  ;;  %v6328_v34 = vpop.f32.mrf.mxu0  ;;  %v1940_v0 = vmul.f32 1.442695, %v1854_v8 }
 0x657   : > { %v6296_v19 = vpop.xlane.xlu0 %1779  ;;  %v6314_v10 = vpop.xlane.xlu1 %1791 }
 0x658   : > { %4632 = vpow2.f32 %v1938_v58  ;;  %v6334_v58 = vpop.eup %4630 }
 0x659   : > { %4634 = vpow2.f32 %v1940_v0 }
 0x65a   : > { %4636 = vpow2.f32 %v1942_v47 }
 0x65e   : > { %2049 = vadd.xlane.f32.xlu1 %v2048_v42  ;;  %1812 = vmax.xlane.f32.xlu0 %v1811_v9  ;;  %v6330_v42 = vpop.f32.mrf.mxu1  ;;  %v2051_v9 = vadd.f32 %v6320_v29, %v6318_v17  ;;  %v6338_v7 = vpop.eup %4632  ;;  %v1857_v29 = vsub.f32 %v6136_v28, %v1774_v32 }
 0x65f   : > { %v6316_v24 = vpop.xlane.xlu0 %1788  ;;  %v2054_v8 = vadd.f32 %v6338_v7, %v6334_v58  ;;  %v6348_v23 = vpop.f32.mrf.mxu0 }
 0x660   : > { %v1946_v18 = vmul.f32 1.442695, %v1857_v29 }
 0x666   : > { %1815 = vmax.xlane.f32.xlu1 %v1814_v5  ;;  %2052 = vadd.xlane.f32.xlu0 %v2051_v9  ;;  %v6350_v28 = vpop.f32.mrf.mxu1 }
 0x667   : > { %v1798_v16 = vpop.xlane.xlu1 %1797  ;;  %v1795_v6 = vpop.xlane.xlu0 %1794  ;;  %v1820_v9 = vmax.f32 %v6348_v23, %v6350_v28 }
 0x668   : > { %v1872_v27 = vsub.f32 %v6202_v36, %v1798_v16  ;;  %v1873_v31 = vsub.f32 %v6204_v35, %v1798_v16  ;;  %v1870_v17 = vsub.f32 %v6196_v20, %v1795_v6  ;;  %v1871_v36 = vsub.f32 %v6198_v51, %v1795_v6 }
 0x669   : > { %v1944_v35 = vmul.f32 1.442695, %v1856_v3  ;;  %v1817_v16 = vmax.f32 %v6328_v34, %v6330_v42  ;;  %v1858_v3 = vsub.f32 %v6146_v40, %v6276_v22  ;;  %v1867_v40 = vsub.f32 %v6182_v25, %v6316_v24 }
 0x66a   : > { %v1976_v33 = vmul.f32 1.442695, %v1872_v27  ;;  %v1978_v5 = vmul.f32 1.442695, %v1873_v31  ;;  %v1972_v0 = vmul.f32 1.442695, %v1870_v17  ;;  %v6352_v31 = vpop.eup %4634  ;;  %v1866_v17 = vsub.f32 %v6180_v41, %v6316_v24 }
 0x66b   : > { %v1974_v20 = vmul.f32 1.442695, %v1871_v36  ;;  %v6356_v51 = vpop.eup %4636  ;;  %v1948_v27 = vmul.f32 1.442695, %v1858_v3  ;;  %v1966_v24 = vmul.f32 1.442695, %v1867_v40 }
 0x66c   : > { %4638 = vpow2.f32 %v1976_v33  ;;  %v1859_v33 = vsub.f32 %v6148_v39, %v6276_v22  ;;  %v2057_v39 = vadd.f32 %v6356_v51, %v6352_v31 }
 0x66d   : > { %4640 = vpow2.f32 %v1978_v5  ;;  %v1964_v5 = vmul.f32 1.442695, %v1866_v17 }
 0x66e   : > { %2055 = vadd.xlane.f32.xlu1 %v2054_v8  ;;  %1818 = vmax.xlane.f32.xlu0 %v1817_v16  ;;  %4642 = vpow2.f32 %v1944_v35  ;;  %v1950_v22 = vmul.f32 1.442695, %v1859_v33  ;;  %v6378_v8 = vpop.f32.mrf.mxu0  ;;  %v6380_v25 = vpop.f32.mrf.mxu1  ;;  %v1836_v35 = vsub.f32 %v6078_v54, %v6228_v57 }
 0x66f   : > { %4644 = vpow2.f32 %v1946_v18  ;;  %v1837_v18 = vsub.f32 %v6080_v56, %v6228_v57  ;;  %v1823_v3 = vmax.f32 %v6378_v8, %v6380_v25 }
 0x670   : > { %4646 = vpow2.f32 %v1972_v0 }
 0x671   : > { %4648 = vpow2.f32 %v1974_v20  ;;  %v1904_v20 = vmul.f32 1.442695, %v1836_v35  ;;  %v1906_v54 = vmul.f32 1.442695, %v1837_v18 }
 0x672   : > { %v6360_v29 = vpop.eup %4638  ;;  %4650 = vpow2.f32 %v1948_v27  ;;  %v1860_v27 = vsub.f32 %v6154_v4, %v6296_v19 }
 0x673   : > { %8439 = vst [vmem:[#allocation49_spill] sm:$0xff] %v6360_v29  ;;  %v6366_v32 = vpop.eup %4640  ;;  %4652 = vpow2.f32 %v1950_v22  ;;  %v1861_v22 = vsub.f32 %v6156_v1, %v6296_v19  ;;  %v1862_v19 = vsub.f32 %v6162_v21, %v6270_v55 }
 0x674   : > { %8440 = vst [vmem:[#allocation47_spill] sm:$0xff] %v6366_v32  ;;  %v2084_v47 = vadd.f32 %v6366_v32, %v6360_v29  ;;  %v6374_v6 = vpop.eup %4642  ;;  %4654 = vpow2.f32 %v1964_v5  ;;  %v1838_v5 = vsub.f32 %v6084_v59, %v6244_v38  ;;  %v1952_v35 = vmul.f32 1.442695, %v1860_v27 }
 0x675   : > { %v6376_v41 = vpop.eup %4644  ;;  %4656 = vpow2.f32 %v1966_v24  ;;  %v1839_v24 = vsub.f32 %v6086_v14, %v6244_v38 }
 0x676   : > { %1821 = vmax.xlane.f32.xlu1 %v1820_v9  ;;  %2085 = vadd.xlane.f32.xlu2 %v2084_v47  ;;  %v6382_v36 = vpop.eup %4646  ;;  %v2060_v0 = vadd.f32 %v6376_v41, %v6374_v6  ;;  %v6400_v57 = vpop.f32.mrf.mxu0  ;;  %4658 = vpow2.f32 %v1904_v20 }
 0x677   : > { %2058 = vadd.xlane.f32.xlu0 %v2057_v39  ;;  %8441 = vst [vmem:[#allocation50_spill] sm:$0xff] %v6382_v36  ;;  %v6386_v16 = vpop.eup %4648  ;;  %v6402_v17 = vpop.f32.mrf.mxu1  ;;  %4660 = vpow2.f32 %v1906_v54  ;;  %v1910_v59 = vmul.f32 1.442695, %v1839_v24  ;;  %v1863_v54 = vsub.f32 %v6164_v11, %v6270_v55 }
 0x678   : > { %8442 = vst [vmem:[#allocation48_spill] sm:$0xff] %v6386_v16  ;;  %v2081_v33 = vadd.f32 %v6386_v16, %v6382_v36  ;;  %v6396_v9 = vpop.eup %4650  ;;  %v1826_v47 = vmax.f32 %v6400_v57, %v6402_v17  ;;  %4662 = vpow2.f32 %v1952_v35 }
 0x679   : > { %v6398_v56 = vpop.eup %4652  ;;  %v1958_v24 = vmul.f32 1.442695, %v1863_v54 }
 0x67a   : > { %v6404_v40 = vpop.eup %4654  ;;  %v2063_v4 = vadd.f32 %v6398_v56, %v6396_v9 }
 0x67b   : > { %8443 = vst [vmem:[#allocation9_spill] sm:$0xff] %v6404_v40  ;;  %v6410_v39 = vpop.eup %4656 }
 0x67c   : > { %8444 = vst [vmem:[#allocation10_spill] sm:$0xff] %v6410_v39  ;;  %v2075_v18 = vadd.f32 %v6410_v39, %v6404_v40  ;;  %v6422_v20 = vpop.eup %4658 }
 0x67d   : > { %v6424_v1 = vpop.eup %4660 }
 0x67e   : > { %2061 = vadd.xlane.f32.xlu1 %v2060_v0  ;;  %2082 = vadd.xlane.f32.xlu2 %v2081_v33  ;;  %v1954_v0 = vmul.f32 1.442695, %v1861_v22  ;;  %v6426_v14 = vpop.f32.mrf.mxu0  ;;  %v2030_v33 = vadd.f32 %v6424_v1, %v6422_v20  ;;  %v1956_v22 = vmul.f32 1.442695, %v1862_v19  ;;  %v6461_v19 = vpop.xlane.xlu0 %1800 }
 0x67f   : > { %1824 = vmax.xlane.f32.xlu0 %v1823_v3  ;;  %v1908_v3 = vmul.f32 1.442695, %v1838_v5  ;;  %v6428_v38 = vpop.f32.mrf.mxu1 }
 0x680   : > { %4664 = vpow2.f32 %v1954_v0  ;;  %v1829_v27 = vmax.f32 %v6426_v14, %v6428_v38  ;;  %v299_v0 = vld [vmem:[%s8194_s3 + $0x40] sm:$0xff] }
 0x681   : > { %4666 = vpow2.f32 %v1908_v3 }
 0x682   : > { %4668 = vpow2.f32 %v1910_v59 }
 0x683   : > { %4670 = vpow2.f32 %v1956_v22 }
 0x684   : > { %4672 = vpow2.f32 %v1958_v24 }
 0x686   : > { %1827 = vmax.xlane.f32.xlu1 %v1826_v47  ;;  %2076 = vadd.xlane.f32.xlu2 %v2075_v18  ;;  %v6438_v47 = vpop.eup %4662 }
 0x687   : > { %2064 = vadd.xlane.f32.xlu0 %v2063_v4  ;;  %v6440_v5 = vpop.eup %4664 }
 0x688   : > { %v6442_v35 = vpop.eup %4666  ;;  %v2066_v18 = vadd.f32 %v6440_v5, %v6438_v47 }
 0x689   : > { %v6444_v21 = vpop.eup %4668 }
 0x68a   : > { %v2033_v11 = vadd.f32 %v6444_v21, %v6442_v35  ;;  %v6450_v55 = vpop.eup %4670 }
 0x68b   : > { %v6452_v4 = vpop.eup %4672 }
 0x68c   : > { %v2069_v3 = vadd.f32 %v6452_v4, %v6450_v55 }
 0x68e   : > { %2031 = vadd.xlane.f32.xlu1 %v2030_v33 }
 0x68f   : > { %1830 = vmax.xlane.f32.xlu0 %v1829_v27 }
 0x696   : > { %2067 = vadd.xlane.f32.xlu1 %v2066_v18 }
 0x697   : > { %2034 = vadd.xlane.f32.xlu0 %v2033_v11 }
 0x69e   : > { %347 = vperm.xlu2 %4397, %v299_v0  }
 0x69f   : > { %2070 = vadd.xlane.f32.xlu0 %v2069_v3 }
 0x6b1   : > { %v6459_v59 = vpop.xlane.xlu1 %2037 }
 0x6b9   : > { %v1804_v33 = vpop.xlane.xlu1 %1803  ;;  %v6465_v22 = vpop.xlane.xlu0 %2040 }
 0x6ba   : > { %v1876_v54 = vsub.f32 %v6224_v48, %v1804_v33  ;;  %v1877_v27 = vsub.f32 %v6226_v52, %v1804_v33 }
 0x6bc   : > { %v1984_v24 = vmul.f32 1.442695, %v1876_v54  ;;  %v1986_v18 = vmul.f32 1.442695, %v1877_v27 }
 0x6be   : > { %4674 = vpow2.f32 %v1984_v24 }
 0x6bf   : > { %4676 = vpow2.f32 %v1986_v18 }
 0x6c1   : > { %v6467_v11 = vpop.xlane.xlu1 %2043  ;;  %v1807_v39 = vpop.xlane.xlu0 %1806 }
 0x6c2   : > { %v1878_v3 = vsub.f32 %v6238_v30, %v1807_v39  ;;  %v1879_v40 = vsub.f32 %v6242_v60, %v1807_v39 }
 0x6c4   : > { %v6469_v0 = vpop.eup %4674  ;;  %v1988_v48 = vmul.f32 1.442695, %v1878_v3  ;;  %v1990_v36 = vmul.f32 1.442695, %v1879_v40 }
 0x6c5   : > { %8445 = vst [vmem:[#allocation19_spill] sm:$0xff] %v6469_v0  ;;  %v6473_v16 = vpop.eup %4676 }
 0x6c6   : > { %8446 = vst [vmem:[#allocation20_spill] sm:$0xff] %v6473_v16  ;;  %v2090_v52 = vadd.f32 %v6473_v16, %v6469_v0  ;;  %4678 = vpow2.f32 %v1988_v48 }
 0x6c7   : > { %4680 = vpow2.f32 %v1990_v36 }
 0x6c8   : > { %2091 = vadd.xlane.f32.xlu1 %v2090_v52 }
 0x6c9   : > { %v1810_v33 = vpop.xlane.xlu1 %1809  ;;  %v6479_v24 = vpop.xlane.xlu0 %2046 }
 0x6ca   : > { %v1880_v54 = vsub.f32 %v6256_v50, %v1810_v33  ;;  %v1881_v27 = vsub.f32 %v6260_v61, %v1810_v33 }
 0x6cc   : > { %v1992_v30 = vmul.f32 1.442695, %v1880_v54  ;;  %v1994_v18 = vmul.f32 1.442695, %v1881_v27  ;;  %v6481_v60 = vpop.eup %4678 }
 0x6cd   : > { %8447 = vst [vmem:[#allocation3_spill] sm:$0xff] %v6481_v60  ;;  %v6483_v39 = vpop.eup %4680 }
 0x6ce   : > { %4682 = vpow2.f32 %v1992_v30  ;;  %8448 = vst [vmem:[#allocation4_spill] sm:$0xff] %v6483_v39  ;;  %v2093_v40 = vadd.f32 %v6483_v39, %v6481_v60 }
 0x6cf   : > { %4684 = vpow2.f32 %v1994_v18 }
 0x6d0   : > { %2094 = vadd.xlane.f32.xlu0 %v2093_v40 }
 0x6d1   : > { %v6487_v3 = vpop.xlane.xlu1 %2049  ;;  %v1813_v36 = vpop.xlane.xlu0 %1812 }
 0x6d2   : > { %v1882_v61 = vsub.f32 %v6278_v15, %v1813_v36  ;;  %v1883_v48 = vsub.f32 %v6280_v13, %v1813_v36 }
 0x6d4   : > { %v6489_v50 = vpop.eup %4682  ;;  %v1996_v33 = vmul.f32 1.442695, %v1882_v61  ;;  %v1998_v54 = vmul.f32 1.442695, %v1883_v48 }
 0x6d5   : > { %v6493_v52 = vpop.eup %4684 }
 0x6d6   : > { %v2096_v27 = vadd.f32 %v6493_v52, %v6489_v50  ;;  %4686 = vpow2.f32 %v1996_v33 }
 0x6d7   : > { %4688 = vpow2.f32 %v1998_v54 }
 0x6d8   : > { %2097 = vadd.xlane.f32.xlu1 %v2096_v27 }
 0x6d9   : > { %v1816_v30 = vpop.xlane.xlu1 %1815  ;;  %v6499_v32 = vpop.xlane.xlu0 %2052 }
 0x6da   : > { %v1884_v18 = vsub.f32 %v6306_v63, %v1816_v30  ;;  %v1885_v40 = vsub.f32 %v6308_v49, %v1816_v30 }
 0x6dc   : > { %v2000_v15 = vmul.f32 1.442695, %v1884_v18  ;;  %v2002_v29 = vmul.f32 1.442695, %v1885_v40  ;;  %v6501_v13 = vpop.eup %4686 }
 0x6dd   : > { %v6503_v36 = vpop.eup %4688 }
 0x6de   : > { %4690 = vpow2.f32 %v2000_v15  ;;  %v2099_v61 = vadd.f32 %v6503_v36, %v6501_v13 }
 0x6df   : > { %4692 = vpow2.f32 %v2002_v29 }
 0x6e0   : > { %2100 = vadd.xlane.f32.xlu0 %v2099_v61 }
 0x6e1   : > { %v6507_v48 = vpop.xlane.xlu1 %2055  ;;  %v1819_v33 = vpop.xlane.xlu0 %1818 }
 0x6e2   : > { %v1886_v49 = vsub.f32 %v6328_v34, %v1819_v33  ;;  %v1887_v54 = vsub.f32 %v6330_v42, %v1819_v33 }
 0x6e4   : > { %v6509_v63 = vpop.eup %4690  ;;  %v2004_v30 = vmul.f32 1.442695, %v1886_v49  ;;  %v2006_v18 = vmul.f32 1.442695, %v1887_v54 }
 0x6e5   : > { %v6513_v27 = vpop.eup %4692 }
 0x6e6   : > { %v2102_v29 = vadd.f32 %v6513_v27, %v6509_v63  ;;  %4694 = vpow2.f32 %v2004_v30 }
 0x6e7   : > { %4696 = vpow2.f32 %v2006_v18 }
 0x6e8   : > { %2103 = vadd.xlane.f32.xlu1 %v2102_v29 }
 0x6e9   : > { %v1822_v40 = vpop.xlane.xlu1 %1821 }
 0x6ea   : > { %v1888_v15 = vsub.f32 %v6348_v23, %v1822_v40  ;;  %v1889_v61 = vsub.f32 %v6350_v28, %v1822_v40  ;;  %v6519_v16 = vpop.xlane.xlu0 %2058 }
 0x6ec   : > { %v2008_v34 = vmul.f32 1.442695, %v1888_v15  ;;  %v2010_v0 = vmul.f32 1.442695, %v1889_v61  ;;  %v6521_v42 = vpop.eup %4694 }
 0x6ed   : > { %v6523_v33 = vpop.eup %4696 }
 0x6ee   : > { %4698 = vpow2.f32 %v2008_v34  ;;  %v2105_v49 = vadd.f32 %v6523_v33, %v6521_v42 }
 0x6ef   : > { %4700 = vpow2.f32 %v2010_v0 }
 0x6f0   : > { %2106 = vadd.xlane.f32.xlu0 %v2105_v49 }
 0x6f1   : > { %v6527_v54 = vpop.xlane.xlu1 %2061 }
 0x6f2   : > { %v1825_v30 = vpop.xlane.xlu0 %1824 }
 0x6f3   : > { %v1890_v28 = vsub.f32 %v6378_v8, %v1825_v30  ;;  %v1891_v18 = vsub.f32 %v6380_v25, %v1825_v30  ;;  %v1832_v25 = vsub.f32 %v6068_v46, %v6246_v43  ;;  %v1834_v46 = vsub.f32 %v6074_v62, %v6262_v45 }
 0x6f4   : > { %v6529_v23 = vpop.eup %4698  ;;  %v1835_v62 = vsub.f32 %v6076_v44, %v6262_v45  ;;  %v1868_v44 = vsub.f32 %v6190_v53, %v6314_v10 }
 0x6f5   : > { %v6533_v29 = vpop.eup %4700  ;;  %v2012_v40 = vmul.f32 1.442695, %v1890_v28  ;;  %v2014_v15 = vmul.f32 1.442695, %v1891_v18  ;;  %v1833_v28 = vsub.f32 %v6070_v26, %v6246_v43 }
 0x6f6   : > { %v2108_v0 = vadd.f32 %v6533_v29, %v6529_v23 }
 0x6f7   : > { %4702 = vpow2.f32 %v2012_v40  ;;  %v1898_v40 = vmul.f32 1.442695, %v1833_v28 }
 0x6f8   : > { %2109 = vadd.xlane.f32.xlu1 %v2108_v0  ;;  %4704 = vpow2.f32 %v2014_v15 }
 0x6f9   : > { %v1828_v61 = vpop.xlane.xlu1 %1827 }
 0x6fa   : > { %v1892_v34 = vsub.f32 %v6400_v57, %v1828_v61  ;;  %v1893_v49 = vsub.f32 %v6402_v17, %v1828_v61  ;;  %v6539_v39 = vpop.xlane.xlu0 %2064  ;;  %v1896_v17 = vmul.f32 1.442695, %v1832_v25 }
 0x6fc   : > { %v2016_v8 = vmul.f32 1.442695, %v1892_v34  ;;  %v2018_v60 = vmul.f32 1.442695, %v1893_v49  ;;  %v1875_v49 = vsub.f32 %v6212_v12, %v6461_v19 }
 0x6fd   : > { %v6543_v30 = vpop.eup %4702 }
 0x6fe   : > { %4706 = vpow2.f32 %v2016_v8  ;;  %v6547_v18 = vpop.eup %4704 }
 0x6ff   : > { %4708 = vpow2.f32 %v2018_v60  ;;  %v2111_v57 = vadd.f32 %v6547_v18, %v6543_v30  ;;  %v1874_v60 = vsub.f32 %v6210_v37, %v6461_v19  ;;  %v1982_v37 = vmul.f32 1.442695, %v1875_v49 }
 0x700   : > { %4710 = vpow2.f32 %v1896_v17  ;;  %v1902_v17 = vmul.f32 1.442695, %v1835_v62  ;;  %v1968_v49 = vmul.f32 1.442695, %v1868_v44 }
 0x701   : > { %2112 = vadd.xlane.f32.xlu0 %v2111_v57  ;;  %v6561_v34 = vpop.xlane.xlu1 %2031  ;;  %4712 = vpow2.f32 %v1898_v40  ;;  %v1980_v28 = vmul.f32 1.442695, %v1874_v60 }
 0x702   : > { %v1831_v15 = vpop.xlane.xlu0 %1830 }
 0x703   : > { %v1894_v61 = vsub.f32 %v6426_v14, %v1831_v15  ;;  %v1895_v26 = vsub.f32 %v6428_v38, %v1831_v15  ;;  %v1900_v38 = vmul.f32 1.442695, %v1834_v46  ;;  %v1869_v15 = vsub.f32 %v6192_v2, %v6314_v10  ;;  %v8450_v10 = vld [vmem:[#allocation42_spill] sm:$0xff] }
 0x704   : > { %v6551_v0 = vpop.eup %4706 }
 0x705   : > { %v6557_v43 = vpop.eup %4708  ;;  %v2020_v8 = vmul.f32 1.442695, %v1894_v61  ;;  %v2022_v25 = vmul.f32 1.442695, %v1895_v26 }
 0x706   : > { %v2114_v14 = vadd.f32 %v6557_v43, %v6551_v0  ;;  %v6569_v57 = vpop.eup %4710 }
 0x707   : > { %4714 = vpow2.f32 %v2020_v8  ;;  %v6573_v12 = vpop.eup %4712  ;;  %v1970_v8 = vmul.f32 1.442695, %v1869_v15 }
 0x708   : > { %4716 = vpow2.f32 %v2022_v25  ;;  %2115 = vadd.xlane.f32.xlu1 %v2114_v14  ;;  %v2024_v61 = vadd.f32 %v6573_v12, %v6569_v57  ;;  %v8451_v14 = vld [vmem:[#allocation27_spill] sm:$0xff] }
 0x709   : > { %4718 = vpow2.f32 %v1900_v38  ;;  %v2068_v46 = vpop.xlane.xlu1 %2067  ;;  %v1864_v38 = vsub.f32 %v8451_v14, %v8450_v10 }
 0x70a   : > { %v6571_v40 = vpop.xlane.xlu0 %2034  ;;  %4720 = vpow2.f32 %v1980_v28  ;;  %v8452_v28 = vld [vmem:[#allocation28_spill] sm:$0xff] }
 0x70b   : > { %4722 = vpow2.f32 %v1982_v37  ;;  %v1865_v37 = vsub.f32 %v8452_v28, %v8450_v10 }
 0x70c   : > { %4724 = vpow2.f32 %v1902_v17 }
 0x70d   : > { %v6575_v19 = vpop.eup %4714  ;;  %4726 = vrcp.f32 %v2068_v46 }
 0x70e   : > { %v6579_v45 = vpop.eup %4716 }
 0x70f   : > { %v2117_v26 = vadd.f32 %v6579_v45, %v6575_v19  ;;  %v6587_v60 = vpop.eup %4718 }
 0x710   : > { %2025 = vadd.xlane.f32.xlu1 %v2024_v61  ;;  %v6589_v53 = vpop.eup %4720  ;;  %v1960_v61 = vmul.f32 1.442695, %v1864_v38 }
 0x711   : > { %2118 = vadd.xlane.f32.xlu0 %v2117_v26  ;;  %v6591_v62 = vpop.eup %4722  ;;  %v1962_v26 = vmul.f32 1.442695, %v1865_v37 }
 0x712   : > { %v2071_v25 = vpop.xlane.xlu0 %2070  ;;  %8449 = vst [vmem:[#allocation51_spill] sm:$0xff] %v6591_v62  ;;  %v6593_v2 = vpop.eup %4724  ;;  %v2087_v17 = vadd.f32 %v6591_v62, %v6589_v53 }
 0x713   : > { %4728 = vrcp.f32 %v2071_v25  ;;  %v4727_v44 = vpop.eup %4726  ;;  %v2027_v15 = vadd.f32 %v6593_v2, %v6587_v60 }
 0x714   : > { %4730 = vpow2.f32 %v1968_v49  ;;  %v2180_v25 = vmul.f32 %v4727_v44, %v6438_v47  ;;  %v2181_v49 = vmul.f32 %v4727_v44, %v6440_v5 }
 0x715   : > { %4732 = vpow2.f32 %v1970_v8 }
 0x716   : > { %4734 = vrcp.f32 %v6539_v39 }
 0x717   : > { %4736 = vrcp.f32 %v6527_v54 }
 0x718   : > { %2088 = vadd.xlane.f32.xlu1 %v2087_v17  ;;  %4738 = vpow2.f32 %v1960_v61 }
 0x719   : > { %v4729_v46 = vpop.eup %4728  ;;  %2028 = vadd.xlane.f32.xlu0 %v2027_v15  ;;  %4740 = vpow2.f32 %v1962_v26 }
 0x71a   : > { %v2182_v8 = vmul.f32 %v4729_v46, %v6450_v55  ;;  %v2183_v10 = vmul.f32 %v4729_v46, %v6452_v4  ;;  %v6609_v14 = vpop.eup %4730  ;;  %4742 = vrcp.f32 %v6519_v16 }
 0x71b   : > { %v6611_v39 = vpop.eup %4732  ;;  %4744 = vrcp.f32 %v6507_v48 }
 0x71c   : > { %v2230_v28 = vpack.c.bf16 %v2182_v8, %v2180_v25  ;;  %v2231_v17 = vpack.c.bf16 %v2183_v10, %v2181_v49  ;;  %v4735_v62 = vpop.eup %4734  ;;  %v2078_v47 = vadd.f32 %v6611_v39, %v6609_v14  ;;  %4746 = vrcp.f32 %v6499_v32  ;;  %v302_v32 = vld [vmem:[%s8194_s3 + $0x58] sm:$0xff] }
 0x71d   : > { %v4737_v54 = vpop.eup %4736  ;;  %v2178_v5 = vmul.f32 %v4735_v62, %v6396_v9  ;;  %v2179_v55 = vmul.f32 %v4735_v62, %v6398_v56  ;;  %4748 = vrcp.f32 %v6487_v3  ;;  %v8454_v3 = vld [vmem:[#allocation44_spill] sm:$0xff]  ;;  %v8456_v10 = vld [vmem:[#allocation46_spill] sm:$0xff] }
 0x71e   : > { %2248 = vmatpush.bf16.xpose.msra.mxu2 %v2230_v28  ;;  %2261 = vmatpush.bf16.xpose.msra.mxu3 %v2231_v17  ;;  %v2176_v4 = vmul.f32 %v4737_v54, %v6374_v6  ;;  %v2177_v38 = vmul.f32 %v4737_v54, %v6376_v41  ;;  %v6621_v37 = vpop.eup %4738  ;;  %4750 = vrcp.f32 %v6479_v24  ;;  %v8457_v24 = vld [vmem:[#allocation35_spill] sm:$0xff] }
 0x71f   : > { %v6623_v44 = vpop.eup %4740  ;;  %4752 = vrcp.f32 %v6467_v11  ;;  %v295_v11 = vld [vmem:[%s8194_s3 + $0x20] sm:$0xff] }
 0x720   : > { %v2228_v15 = vpack.c.bf16 %v2178_v5, %v2176_v4  ;;  %v2229_v16 = vpack.c.bf16 %v2179_v55, %v2177_v38  ;;  %v4743_v46 = vpop.eup %4742  ;;  %v2072_v9 = vadd.f32 %v6623_v44, %v6621_v37  ;;  %4754 = vrcp.f32 %v6465_v22  ;;  %v8458_v4 = vld [vmem:[#allocation41_spill] sm:$0xff] }
 0x721   : > { %2079 = vadd.xlane.f32.xlu0 %v2078_v47  ;;  %v4745_v61 = vpop.eup %4744  ;;  %v2174_v56 = vmul.f32 %v4743_v46, %v6352_v31  ;;  %v2175_v6 = vmul.f32 %v4743_v46, %v6356_v51  ;;  %v8453_v31 = vld [vmem:[#allocation43_spill] sm:$0xff]  ;;  %4756 = vrcp.f32 %v6459_v59  ;;  %v8460_v46 = vld [vmem:[#allocation34_spill] sm:$0xff]  ;;  %v8462_v59 = vld [vmem:[#allocation36_spill] sm:$0xff] }
 0x722   : > { %v2172_v41 = vmul.f32 %v4745_v61, %v6334_v58  ;;  %v2173_v48 = vmul.f32 %v4745_v61, %v6338_v7  ;;  %v4747_v25 = vpop.eup %4746  ;;  %v8455_v7 = vld [vmem:[#allocation45_spill] sm:$0xff]  ;;  %4758 = vrcp.f32 %v6571_v40 }
 0x723   : > { %v4749_v49 = vpop.eup %4748  ;;  %v2170_v51 = vmul.f32 %v4747_v25, %v8453_v31  ;;  %v2171_v8 = vmul.f32 %v4747_v25, %v8454_v3  ;;  %4760 = vrcp.f32 %v6561_v34 }
 0x724   : > { %v2226_v62 = vpack.c.bf16 %v2174_v56, %v2172_v41  ;;  %v2227_v26 = vpack.c.bf16 %v2175_v6, %v2173_v48  ;;  %v2168_v58 = vmul.f32 %v4749_v49, %v8455_v7  ;;  %v2169_v28 = vmul.f32 %v4749_v49, %v8456_v10  ;;  %v4751_v47 = vpop.eup %4750  ;;  %v8461_v41 = vld [vmem:[#allocation39_spill] sm:$0xff] }
 0x725   : > { %v4753_v5 = vpop.eup %4752  ;;  %v2166_v55 = vmul.f32 %v4751_v47, %v8457_v24  ;;  %v2167_v38 = vmul.f32 %v4751_v47, %v8458_v4 }
 0x726   : > { %2249 = vmatpush.bf16.xpose.msra.mxu2 %v2228_v15  ;;  %2262 = vmatpush.bf16.xpose.msra.mxu3 %v2229_v16  ;;  %v2224_v17 = vpack.c.bf16 %v2170_v51, %v2168_v58  ;;  %v2225_v54 = vpack.c.bf16 %v2171_v8, %v2169_v28  ;;  %v8459_v15 = vld [vmem:[#allocation37_spill] sm:$0xff]  ;;  %v2165_v61 = vmul.f32 %v4753_v5, %v8460_v46  ;;  %v4755_v6 = vpop.eup %4754 }
 0x727   : > { %v2164_v16 = vmul.f32 %v4753_v5, %v8459_v15  ;;  %v4757_v22 = vpop.eup %4756  ;;  %v2162_v48 = vmul.f32 %v4755_v6, %v8461_v41 }
 0x728   : > { %v2223_v56 = vpack.c.bf16 %v2167_v38, %v2165_v61  ;;  %v4759_v3 = vpop.eup %4758 }
 0x729   : > { %2073 = vadd.xlane.f32.xlu0 %v2072_v9  ;;  %v2222_v9 = vpack.c.bf16 %v2166_v55, %v2164_v16  ;;  %v4761_v8 = vpop.eup %4760  ;;  %v2158_v7 = vmul.f32 %v4759_v3, %v6442_v35  ;;  %v2159_v40 = vmul.f32 %v4759_v3, %v6444_v21 }
 0x72a   : > { %v2156_v58 = vmul.f32 %v4761_v8, %v6422_v20  ;;  %v2157_v10 = vmul.f32 %v4761_v8, %v6424_v1 }
 0x72c   : > { %v2218_v28 = vpack.c.bf16 %v2158_v7, %v2156_v58  ;;  %v2219_v34 = vpack.c.bf16 %v2159_v40, %v2157_v10  ;;  %v8465_v40 = vld [vmem:[#allocation21_spill] sm:$0xff]  ;;  %v8466_v10 = vld [vmem:[#allocation22_spill] sm:$0xff] }
 0x72e   : > { %2250 = vmatpush.bf16.xpose.msra.mxu2 %v2226_v62  ;;  %2263 = vmatpush.bf16.xpose.msra.mxu3 %v2227_v26  ;;  %v2163_v62 = vmul.f32 %v4755_v6, %v8462_v59  ;;  %v8463_v26 = vld [vmem:[#allocation40_spill] sm:$0xff] }
 0x72f   : > { %v2160_v25 = vmul.f32 %v4757_v22, %v8463_v26 }
 0x731   : > { %362 = vperm.xlu1 %4396, %v302_v32   ;;  %v8464_v32 = vld [vmem:[#allocation38_spill] sm:$0xff]  ;;  %v2220_v31 = vpack.c.bf16 %v2162_v48, %v2160_v25 }
 0x732   : > { %v2161_v49 = vmul.f32 %v4757_v22, %v8464_v32 }
 0x734   : > { %v2221_v51 = vpack.c.bf16 %v2163_v62, %v2161_v49 }
 0x736   : > { %2251 = vmatpush.bf16.xpose.msra.mxu2 %v2224_v17  ;;  %2264 = vmatpush.bf16.xpose.msra.mxu3 %v2225_v54 }
 0x73b   : > { %v6661_v17 = vpop.xlane.xlu1 %2091 }
 0x73d   : > { %327 = vperm.xlu0 %4395, %v295_v11  }
 0x73e   : > { %2252 = vmatpush.bf16.xpose.msra.mxu2 %v2222_v9  ;;  %2265 = vmatpush.bf16.xpose.msra.mxu3 %v2223_v56 }
 0x743   : > { %v6663_v54 = vpop.xlane.xlu0 %2094 }
 0x746   : > { %2253 = vmatpush.bf16.xpose.msra.mxu2 %v2220_v31  ;;  %2266 = vmatpush.bf16.xpose.msra.mxu3 %v2221_v51 }
 0x74b   : > { %v2098_v47 = vpop.xlane.xlu1 %2097 }
 0x74e   : > { %2254 = vmatpush.bf16.xpose.msra.mxu2 %v2218_v28  ;;  %2267 = vmatpush.bf16.xpose.msra.mxu3 %v2219_v34 }
 0x753   : > { %v2101_v5 = vpop.xlane.xlu0 %2100 }
 0x75b   : > { %v2104_v24 = vpop.xlane.xlu1 %2103 }
 0x763   : > { %v2107_v55 = vpop.xlane.xlu0 %2106 }
 0x76b   : > { %v2110_v4 = vpop.xlane.xlu1 %2109 }
 0x774   : > { %v2113_v35 = vpop.xlane.xlu0 %2112 }
 0x77b   : > { %v2116_v38 = vpop.xlane.xlu1 %2115 }
 0x783   : > { %v2026_v11 = vpop.xlane.xlu1 %2025 }
 0x784   : > { %v2119_v21 = vpop.xlane.xlu0 %2118 }
 0x785   : > { %4762 = vrcp.f32 %v2119_v21 }
 0x786   : > { %4764 = vrcp.f32 %v2026_v11 }
 0x787   : > { %4766 = vrcp.f32 %v2116_v38 }
 0x78b   : > { %v4763_v1 = vpop.eup %4762 }
 0x78c   : > { %v2029_v20 = vpop.xlane.xlu0 %2028  ;;  %v4765_v15 = vpop.eup %4764  ;;  %v2214_v61 = vmul.f32 %v4763_v1, %v6575_v19  ;;  %v2215_v9 = vmul.f32 %v4763_v1, %v6579_v45 }
 0x78d   : > { %4768 = vrcp.f32 %v2029_v20  ;;  %v4767_v16 = vpop.eup %4766  ;;  %v2152_v56 = vmul.f32 %v4765_v15, %v6569_v57  ;;  %v2153_v22 = vmul.f32 %v4765_v15, %v6573_v12  ;;  %v2089_v57 = vpop.xlane.xlu1 %2088 }
 0x78e   : > { %4770 = vrcp.f32 %v2113_v35  ;;  %v2212_v48 = vmul.f32 %v4767_v16, %v6551_v0  ;;  %v2213_v59 = vmul.f32 %v4767_v16, %v6557_v43 }
 0x78f   : > { %4772 = vrcp.f32 %v2110_v4 }
 0x790   : > { %v2246_v25 = vpack.c.bf16 %v2214_v61, %v2212_v48  ;;  %v2247_v32 = vpack.c.bf16 %v2215_v9, %v2213_v59  ;;  %4774 = vrcp.f32 %v2107_v55  ;;  %v8469_v9 = vld [vmem:[#allocation5_spill] sm:$0xff] }
 0x791   : > { %4776 = vrcp.f32 %v2104_v24 }
 0x792   : > { %4778 = vrcp.f32 %v2101_v5  ;;  %v8467_v5 = vld [vmem:[#allocation33_spill] sm:$0xff] }
 0x793   : > { %v4769_v46 = vpop.eup %4768  ;;  %4780 = vrcp.f32 %v2098_v47 }
 0x794   : > { %v2154_v6 = vmul.f32 %v4769_v46, %v6587_v60  ;;  %v2155_v41 = vmul.f32 %v4769_v46, %v6593_v2  ;;  %v4771_v49 = vpop.eup %4770  ;;  %v6675_v0 = vpop.xlane.xlu0 %2079  ;;  %4782 = vrcp.f32 %v6663_v54 }
 0x795   : > { %v4773_v19 = vpop.eup %4772  ;;  %v2210_v12 = vmul.f32 %v4771_v49, %v6543_v30  ;;  %v2211_v45 = vmul.f32 %v4771_v49, %v6547_v18  ;;  %v2086_v18 = vpop.xlane.xlu2 %2085  ;;  %4784 = vrcp.f32 %v6661_v17  ;;  %v8472_v17 = vld [vmem:[#allocation12_spill] sm:$0xff] }
 0x796   : > { %v2216_v62 = vpack.c.bf16 %v2154_v6, %v2152_v56  ;;  %v2217_v26 = vpack.c.bf16 %v2155_v41, %v2153_v22  ;;  %v2208_v43 = vmul.f32 %v4773_v19, %v6529_v23  ;;  %v2209_v60 = vmul.f32 %v4773_v19, %v6533_v29  ;;  %v4775_v51 = vpop.eup %4774  ;;  %v8470_v6 = vld [vmem:[#allocation6_spill] sm:$0xff]  ;;  %v8476_v49 = vld [vmem:[#allocation20_spill] sm:$0xff] }
 0x797   : > { %v4777_v3 = vpop.eup %4776  ;;  %v2206_v7 = vmul.f32 %v4775_v51, %v6521_v42  ;;  %v2207_v30 = vmul.f32 %v4775_v51, %v6523_v33  ;;  %v8468_v42 = vld [vmem:[#allocation31_spill] sm:$0xff]  ;;  %4786 = vrcp.f32 %v2089_v57 }
 0x798   : > { %2255 = vmatpush.bf16.xpose.msra.mxu2 %v2216_v62  ;;  %2268 = vmatpush.bf16.xpose.msra.mxu3 %v2217_v26  ;;  %v2244_v2 = vpack.c.bf16 %v2210_v12, %v2208_v43  ;;  %v2245_v31 = vpack.c.bf16 %v2211_v45, %v2209_v60  ;;  %v2204_v29 = vmul.f32 %v4777_v3, %v6509_v63  ;;  %v4779_v38 = vpop.eup %4778  ;;  %4788 = vrcp.f32 %v2086_v18 }
 0x799   : > { %v2205_v28 = vmul.f32 %v4777_v3, %v6513_v27  ;;  %v4781_v63 = vpop.eup %4780  ;;  %v2202_v27 = vmul.f32 %v4779_v38, %v6501_v13  ;;  %v2203_v21 = vmul.f32 %v4779_v38, %v6503_v36  ;;  %v8471_v36 = vld [vmem:[#allocation11_spill] sm:$0xff]  ;;  %4790 = vrcp.f32 %v6675_v0  ;;  %v8478_v3 = vld [vmem:[#allocation49_spill] sm:$0xff]  ;;  %v8482_v38 = vld [vmem:[#allocation50_spill] sm:$0xff] }
 0x79a   : > { %v2242_v47 = vpack.c.bf16 %v2206_v7, %v2204_v29  ;;  %v2200_v11 = vmul.f32 %v4781_v63, %v6489_v50  ;;  %v2201_v20 = vmul.f32 %v4781_v63, %v6493_v52  ;;  %v4783_v61 = vpop.eup %4782  ;;  %v8473_v50 = vld [vmem:[#allocation3_spill] sm:$0xff]  ;;  %v8474_v52 = vld [vmem:[#allocation4_spill] sm:$0xff] }
 0x79b   : > { %v2243_v35 = vpack.c.bf16 %v2207_v30, %v2205_v28  ;;  %v4785_v13 = vpop.eup %4784  ;;  %v2198_v48 = vmul.f32 %v4783_v61, %v8473_v50  ;;  %v2199_v59 = vmul.f32 %v4783_v61, %v8474_v52  ;;  %v8479_v7 = vld [vmem:[#allocation47_spill] sm:$0xff] }
 0x79c   : > { %v2074_v33 = vpop.xlane.xlu0 %2073  ;;  %v2240_v16 = vpack.c.bf16 %v2202_v27, %v2200_v11  ;;  %v2241_v46 = vpack.c.bf16 %v2203_v21, %v2201_v20  ;;  %v2197_v19 = vmul.f32 %v4785_v13, %v8476_v49  ;;  %v8483_v27 = vld [vmem:[#allocation48_spill] sm:$0xff] }
 0x79d   : > { %v2083_v1 = vpop.xlane.xlu2 %2082  ;;  %v4787_v43 = vpop.eup %4786 }
 0x79e   : > { %v2239_v45 = vpack.c.bf16 %v2199_v59, %v2197_v19  ;;  %v4789_v60 = vpop.eup %4788  ;;  %4792 = vrcp.f32 %v2083_v1 }
 0x79f   : > { %v2193_v30 = vmul.f32 %v4789_v60, %v8479_v7  ;;  %4794 = vrcp.f32 %v2074_v33 }
 0x7a0   : > { %2274 = vmatpush.bf16.xpose.msrb.mxu2 %v2246_v25  ;;  %2287 = vmatpush.bf16.xpose.msrb.mxu3 %v2247_v32  ;;  %v8475_v25 = vld [vmem:[#allocation19_spill] sm:$0xff] }
 0x7a1   : > { %v2196_v32 = vmul.f32 %v4785_v13, %v8475_v25 }
 0x7a3   : > { %v363_v8 = vpop.permute.xlu1 %362  ;;  %v2238_v12 = vpack.c.bf16 %v2198_v48, %v2196_v32 }
 0x7a4   : > { %v489_v58 = vadd.f32 %v8465_v40, %v363_v8  ;;  %v533_v23 = vadd.f32 %v8466_v10, %v363_v8  ;;  %v2192_v8 = vmul.f32 %v4789_v60, %v8478_v3 }
 0x7a5   : > { %v2077_v57 = vpop.xlane.xlu2 %2076 }
 0x7a6   : > { %v6685_v34 = vpack.c.bf16 %v489_v58, %v489_v58  ;;  %v6687_v24 = vpack.c.bf16 %v533_v23, %v533_v23  ;;  %v6690_v55 = vmul.f32 %v8467_v5, %v489_v58  ;;  %v6693_v4 = vmul.f32 %v8468_v42, %v533_v23  ;;  %v4791_v58 = vpop.eup %4790 }
 0x7a7   : > { %v4793_v10 = vpop.eup %4792  ;;  %v2188_v29 = vmul.f32 %v4791_v58, %v6609_v14  ;;  %v2189_v0 = vmul.f32 %v4791_v58, %v6611_v39  ;;  %4796 = vrcp.f32 %v2077_v57 }
 0x7a8   : > { %2275 = vmatpush.bf16.xpose.msrb.mxu2 %v2244_v2  ;;  %2288 = vmatpush.bf16.xpose.msrb.mxu3 %v2245_v31  ;;  %v2194_v2 = vmul.f32 %v4787_v43, %v6589_v53  ;;  %v8477_v31 = vld [vmem:[#allocation51_spill] sm:$0xff]  ;;  %v2190_v63 = vmul.f32 %v4793_v10, %v8482_v38  ;;  %v2191_v21 = vmul.f32 %v4793_v10, %v8483_v27  ;;  %v4795_v1 = vpop.eup %4794 }
 0x7a9   : > { %2256 = vmatmul.bf16.vlgmr.msra.gmra.mxu2 %v6685_v34  ;;  %2269 = vmatmul.bf16.vlgmr.msra.gmra.mxu3 %v6687_v24  ;;  %v2195_v51 = vmul.f32 %v4787_v43, %v8477_v31  ;;  %v8480_v53 = vld [vmem:[#allocation15_spill] sm:$0xff]  ;;  %v2184_v39 = vmul.f32 %v4795_v1, %v6621_v37  ;;  %v2185_v61 = vmul.f32 %v4795_v1, %v6623_v44 }
 0x7aa   : > { %v2236_v18 = vpack.c.bf16 %v2194_v2, %v2192_v8  ;;  %v2234_v11 = vpack.c.bf16 %v2190_v63, %v2188_v29  ;;  %v2235_v20 = vpack.c.bf16 %v2191_v21, %v2189_v0 }
 0x7ab   : > { %v2237_v40 = vpack.c.bf16 %v2195_v51, %v2193_v30 }
 0x7ad   : > { %v348_v23 = vpop.permute.xlu2 %347  ;;  %v4797_v14 = vpop.eup %4796 }
 0x7ae   : > { %v482_v28 = vadd.f32 %v8480_v53, %v348_v23 }
 0x7af   : > { %v328_v15 = vpop.permute.xlu0 %327 }
 0x7b0   : > { %2276 = vmatpush.bf16.xpose.msrb.mxu2 %v2242_v47  ;;  %2289 = vmatpush.bf16.xpose.msrb.mxu3 %v2243_v35  ;;  %v472_v56 = vadd.f32 %v8469_v9, %v328_v15  ;;  %v516_v22 = vadd.f32 %v8470_v6, %v328_v15  ;;  %v8481_v47 = vld [vmem:[#allocation16_spill] sm:$0xff]  ;;  %v8484_v15 = vld [vmem:[#allocation13_spill] sm:$0xff]  ;;  %v8487_v6 = vld [vmem:[#allocation10_spill] sm:$0xff] }
 0x7b1   : > { %v526_v35 = vadd.f32 %v8481_v47, %v348_v23  ;;  %v8486_v9 = vld [vmem:[#allocation9_spill] sm:$0xff] }
 0x7b2   : > { %v631_v54 = vmul.f32 %v8471_v36, %v472_v56  ;;  %v632_v41 = vmul.f32 %v8472_v17, %v516_v22  ;;  %v2186_v56 = vmul.f32 %v4797_v14, %v8486_v9  ;;  %v2187_v22 = vmul.f32 %v4797_v14, %v8487_v6 }
 0x7b4   : > { %v2302_v62 = vpack.c.bf16 %v631_v54, %v631_v54  ;;  %v2303_v26 = vpack.c.bf16 %v632_v41, %v632_v41  ;;  %v2232_v41 = vpack.c.bf16 %v2186_v56, %v2184_v39  ;;  %v2233_v50 = vpack.c.bf16 %v2187_v22, %v2185_v61 }
 0x7b6   : > { %2308 = vxpose.binary.xlu1.c.b16.start.end [1/2] (short) %v2303_v26, %v2302_v62, 128 }
 0x7b8   : > { %2277 = vmatpush.bf16.xpose.msrb.mxu2 %v2240_v16  ;;  %2290 = vmatpush.bf16.xpose.msrb.mxu3 %v2241_v46  ;;  %v641_v16 = vmul.f32 %v8484_v15, %v482_v28  ;;  %v8485_v46 = vld [vmem:[#allocation14_spill] sm:$0xff] }
 0x7b9   : > { %v642_v33 = vmul.f32 %v8485_v46, %v526_v35 }
 0x7ba   : > { %v2304_v13 = vpack.c.bf16 %v641_v16, %v641_v16 }
 0x7bb   : > { %v2305_v54 = vpack.c.bf16 %v642_v33, %v642_v33 }
 0x7bc   : > { %v2381_v48 = vsel %vm544_vm1, %v2304_v13, 0 }
 0x7bd   : > { %v2384_v52 = vsel %vm544_vm1, %v2305_v54, 0 }
 0x7c0   : > { %2278 = vmatpush.bf16.xpose.msrb.mxu2 %v2238_v12  ;;  %2291 = vmatpush.bf16.xpose.msrb.mxu3 %v2239_v45 }
 0x7c8   : > { %2279 = vmatpush.bf16.xpose.msrb.mxu2 %v2236_v18  ;;  %2292 = vmatpush.bf16.xpose.msrb.mxu3 %v2237_v40 }
 0x7d0   : > { %2280 = vmatpush.bf16.xpose.msrb.mxu2 %v2234_v11  ;;  %2293 = vmatpush.bf16.xpose.msrb.mxu3 %v2235_v20 }
 0x7d8   : > { %2281 = vmatpush.bf16.xpose.msrb.mxu2 %v2232_v41  ;;  %2294 = vmatpush.bf16.xpose.msrb.mxu3 %v2233_v50 }
 0x7df   : > { %2282 = vmatmul.bf16.vlgmr.msrb.gmra.mxu2 %v6685_v34  ;;  %2295 = vmatmul.bf16.vlgmr.msrb.gmra.mxu3 %v6687_v24 }
 0x7e0   : > { %2393 = vmatpush.bf16.msra.mxu2 %v2381_v48  ;;  %2482 = vmatpush.bf16.msra.mxu3 %v2384_v52 }
 0x82c   : > { %v2257_v37 = vpop.f32.mrf.mxu2  ;;  %v2270_v44 = vpop.f32.mrf.mxu3 }
 0x82d   : > { %v2271_v59 = vadd.f32 %v2270_v44, %v2257_v37 }
 0x82f   : > { %v3968_v62 = vmul.f32 %v2271_v59, %v8471_v36 }
 0x831   : > { %v6734_v26 = vadd.f32 %v6690_v55, %v3968_v62 }
 0x833   : > { %8488 = vst [vmem:[#allocation52_spill] sm:$0xff] %v6734_v26 }
 0x834   : > { %v2259_v49 = vpop.f32.mrf.mxu2  ;;  %v2272_v19 = vpop.f32.mrf.mxu3 }
 0x862   : > { %v2283_v12 = vpop.f32.mrf.mxu2  ;;  %v2296_v45 = vpop.f32.mrf.mxu3 }
 0x863   : > { %v2297_v43 = vadd.f32 %v2296_v45, %v2283_v12  ;;  %v2316_v57 = vpop.trf.xlu1 }
 0x864   : > { %4288 = vmatmul.msk.bf16.vlgmr.msra.gmra.mxu2 %vm675_vm2, %v2316_v57  ;;  %4304 = vmatmul.msk.bf16.vlgmr.msra.gmra.mxu3 %vm675_vm2, %v2316_v57 }
 0x865   : > { %v3969_v34 = vmul.f32 %v2297_v43, %v8472_v17 }
 0x867   : > { %v6740_v24 = vadd.f32 %v6693_v4, %v3969_v34 }
 0x869   : > { %8490 = vst [vmem:[#allocation32_spill] sm:$0xff] %v6740_v24 }
 0x86a   : > { %v2285_v31 = vpop.f32.mrf.mxu2  ;;  %v2298_v55 = vpop.f32.mrf.mxu3 }
 0x86b   : > { %v2317_v51 = vpop.trf.xlu1 }
 0x873   : > { %v2318_v3 = vpop.trf.xlu1 }
 0x874   : > { %4289 = vmatmul.msk.bf16.gmra.mxu2 %vm675_vm2, %v2318_v3  ;;  %4305 = vmatmul.msk.bf16.gmra.mxu3 %vm675_vm2, %v2318_v3 }
 0x87b   : > { %v2319_v8 = vpop.trf.xlu1 }
 0x883   : > { %v2320_v7 = vpop.trf.xlu1 }
 0x884   : > { %4290 = vmatmul.msk.bf16.gmra.mxu2 %vm675_vm2, %v2320_v7  ;;  %4306 = vmatmul.msk.bf16.gmra.mxu3 %vm675_vm2, %v2320_v7 }
 0x88b   : > { %v2321_v4 = vpop.trf.xlu1 }
 0x893   : > { %v2322_v30 = vpop.trf.xlu1 }
 0x894   : > { %4291 = vmatmul.msk.bf16.gmra.mxu2 %vm675_vm2, %v2322_v30  ;;  %4307 = vmatmul.msk.bf16.gmra.mxu3 %vm675_vm2, %v2322_v30 }
 0x89b   : > { %v2323_v18 = vpop.trf.xlu1 }
 0x8a3   : > { %v2324_v40 = vpop.trf.xlu1 }
 0x8a4   : > { %4292 = vmatmul.msk.bf16.gmra.mxu2 %vm675_vm2, %v2324_v40  ;;  %4308 = vmatmul.msk.bf16.gmra.mxu3 %vm675_vm2, %v2324_v40 }
 0x8ab   : > { %v2325_v58 = vpop.trf.xlu1 }
 0x8b3   : > { %v2326_v10 = vpop.trf.xlu1 }
 0x8b4   : > { %4293 = vmatmul.msk.bf16.gmra.mxu2 %vm675_vm2, %v2326_v10  ;;  %4309 = vmatmul.msk.bf16.gmra.mxu3 %vm675_vm2, %v2326_v10 }
 0x8bb   : > { %v2327_v23 = vpop.trf.xlu1 }
 0x8c3   : > { %v2328_v29 = vpop.trf.xlu1 }
 0x8c4   : > { %4294 = vmatmul.msk.bf16.gmra.mxu2 %vm675_vm2, %v2328_v29  ;;  %4310 = vmatmul.msk.bf16.gmra.mxu3 %vm675_vm2, %v2328_v29 }
 0x8cb   : > { %v2329_v0 = vpop.trf.xlu1 }
 0x8d3   : > { %v2330_v53 = vpop.trf.xlu1 }
 0x8d4   : > { %4295 = vmatmul.msk.bf16.gmra.mxu2 %vm675_vm2, %v2330_v53  ;;  %4311 = vmatmul.msk.bf16.gmra.mxu3 %vm675_vm2, %v2330_v53 }
 0x8e4   : > { %4296 = vmatmul.msk.bf16.gmra.mxu2 %vm675_vm2, %v2317_v51  ;;  %4312 = vmatmul.msk.bf16.gmra.mxu3 %vm675_vm2, %v2317_v51 }
 0x8e7   : > { %v6762_v28 = vpop.f32.mrf.mxu2  ;;  %v6764_v47 = vpop.f32.mrf.mxu3 }
 0x8e8   : > { %v2564_v57 = vmax.f32 %v6762_v28, %v6764_v47 }
 0x8ef   : > { %v6766_v35 = vpop.f32.mrf.mxu2  ;;  %v6768_v38 = vpop.f32.mrf.mxu3 }
 0x8f0   : > { %v2567_v51 = vmax.f32 %v6766_v35, %v6768_v38 }
 0x8f4   : > { %4297 = vmatmul.msk.bf16.gmra.mxu2 %vm675_vm2, %v2319_v8  ;;  %4313 = vmatmul.msk.bf16.gmra.mxu3 %vm675_vm2, %v2319_v8  ;;  %v2331_v8 = vpop.trf.xlu1 }
 0x8f7   : > { %v6772_v63 = vpop.f32.mrf.mxu2  ;;  %v6774_v27 = vpop.f32.mrf.mxu3 }
 0x8f8   : > { %v2570_v12 = vmax.f32 %v6772_v63, %v6774_v27 }
 0x8ff   : > { %v6776_v21 = vpop.f32.mrf.mxu2  ;;  %v6778_v11 = vpop.f32.mrf.mxu3 }
 0x900   : > { %v2573_v34 = vmax.f32 %v6776_v21, %v6778_v11 }
 0x904   : > { %4298 = vmatmul.msk.bf16.gmra.mxu2 %vm675_vm2, %v2321_v4  ;;  %4314 = vmatmul.msk.bf16.gmra.mxu3 %vm675_vm2, %v2321_v4 }
 0x907   : > { %v6782_v20 = vpop.f32.mrf.mxu2  ;;  %v6784_v1 = vpop.f32.mrf.mxu3 }
 0x908   : > { %v2576_v59 = vmax.f32 %v6782_v20, %v6784_v1 }
 0x90f   : > { %v6786_v16 = vpop.f32.mrf.mxu2  ;;  %v6788_v33 = vpop.f32.mrf.mxu3 }
 0x910   : > { %v2579_v19 = vmax.f32 %v6786_v16, %v6788_v33 }
 0x914   : > { %4299 = vmatmul.msk.bf16.gmra.mxu2 %vm675_vm2, %v2323_v18  ;;  %4315 = vmatmul.msk.bf16.gmra.mxu3 %vm675_vm2, %v2323_v18 }
 0x917   : > { %v6792_v14 = vpop.f32.mrf.mxu2  ;;  %v6794_v39 = vpop.f32.mrf.mxu3 }
 0x918   : > { %v2582_v50 = vmax.f32 %v6792_v14, %v6794_v39 }
 0x91f   : > { %v6796_v61 = vpop.f32.mrf.mxu2  ;;  %v6798_v9 = vpop.f32.mrf.mxu3 }
 0x920   : > { %v2585_v37 = vmax.f32 %v6796_v61, %v6798_v9 }
 0x924   : > { %4300 = vmatmul.msk.bf16.gmra.mxu2 %vm675_vm2, %v2325_v58  ;;  %4316 = vmatmul.msk.bf16.gmra.mxu3 %vm675_vm2, %v2325_v58 }
 0x927   : > { %v6802_v56 = vpop.f32.mrf.mxu2  ;;  %v6804_v6 = vpop.f32.mrf.mxu3 }
 0x928   : > { %v2588_v22 = vmax.f32 %v6802_v56, %v6804_v6 }
 0x92a   : > { %2589 = vmax.xlane.f32.xlu2 %v2588_v22 }
 0x92f   : > { %v6808_v13 = vpop.f32.mrf.mxu2  ;;  %v6810_v54 = vpop.f32.mrf.mxu3 }
 0x930   : > { %v2591_v41 = vmax.f32 %v6808_v13, %v6810_v54 }
 0x932   : > { %2583 = vmax.xlane.f32.xlu2 %v2582_v50  ;;  %2592 = vmax.xlane.f32.xlu0 %v2591_v41 }
 0x934   : > { %4301 = vmatmul.msk.bf16.gmra.mxu2 %vm675_vm2, %v2327_v23  ;;  %4317 = vmatmul.msk.bf16.gmra.mxu3 %vm675_vm2, %v2327_v23 }
 0x937   : > { %v6818_v48 = vpop.f32.mrf.mxu2  ;;  %v6820_v52 = vpop.f32.mrf.mxu3 }
 0x938   : > { %v2594_v44 = vmax.f32 %v6818_v48, %v6820_v52 }
 0x93a   : > { %2577 = vmax.xlane.f32.xlu2 %v2576_v59  ;;  %2586 = vmax.xlane.f32.xlu0 %v2585_v37 }
 0x93b   : > { %2595 = vmax.xlane.f32.xlu1 %v2594_v44 }
 0x93f   : > { %v6828_v62 = vpop.f32.mrf.mxu2  ;;  %v6830_v49 = vpop.f32.mrf.mxu3 }
 0x940   : > { %v2597_v30 = vmax.f32 %v6828_v62, %v6830_v49 }
 0x942   : > { %2571 = vmax.xlane.f32.xlu2 %v2570_v12  ;;  %2580 = vmax.xlane.f32.xlu0 %v2579_v19 }
 0x944   : > { %4302 = vmatmul.msk.bf16.gmra.mxu2 %vm675_vm2, %v2329_v0  ;;  %4318 = vmatmul.msk.bf16.gmra.mxu3 %vm675_vm2, %v2329_v0 }
 0x947   : > { %v6838_v45 = vpop.f32.mrf.mxu2  ;;  %v6840_v43 = vpop.f32.mrf.mxu3 }
 0x948   : > { %v2600_v58 = vmax.f32 %v6838_v45, %v6840_v43 }
 0x94a   : > { %2565 = vmax.xlane.f32.xlu2 %v2564_v57  ;;  %2574 = vmax.xlane.f32.xlu0 %v2573_v34 }
 0x94f   : > { %v6846_v31 = vpop.f32.mrf.mxu2  ;;  %v6848_v55 = vpop.f32.mrf.mxu3 }
 0x950   : > { %v2603_v3 = vmax.f32 %v6846_v31, %v6848_v55 }
 0x952   : > { %2568 = vmax.xlane.f32.xlu0 %v2567_v51  ;;  %2604 = vmax.xlane.f32.xlu2 %v2603_v3 }
 0x954   : > { %4303 = vmatmul.msk.bf16.gmra.mxu2 %vm675_vm2, %v2331_v8  ;;  %4319 = vmatmul.msk.bf16.gmra.mxu3 %vm675_vm2, %v2331_v8 }
 0x957   : > { %v6856_v7 = vpop.f32.mrf.mxu2  ;;  %v6858_v4 = vpop.f32.mrf.mxu3 }
 0x958   : > { %v2606_v23 = vmax.f32 %v6856_v7, %v6858_v4 }
 0x95a   : > { %2598 = vmax.xlane.f32.xlu0 %v2597_v30 }
 0x95f   : > { %v6862_v18 = vpop.f32.mrf.mxu2  ;;  %v6864_v40 = vpop.f32.mrf.mxu3 }
 0x960   : > { %v2609_v10 = vmax.f32 %v6862_v18, %v6864_v40 }
 0x962   : > { %2601 = vmax.xlane.f32.xlu0 %v2600_v58  ;;  %2610 = vmax.xlane.f32.xlu2 %v2609_v10 }
 0x967   : > { %v6872_v29 = vpop.f32.mrf.mxu2  ;;  %v6874_v0 = vpop.f32.mrf.mxu3 }
 0x968   : > { %v2612_v53 = vmax.f32 %v6872_v29, %v6874_v0 }
 0x96a   : > { %2607 = vmax.xlane.f32.xlu0 %v2606_v23  ;;  %2613 = vmax.xlane.f32.xlu2 %v2612_v53 }
 0x96f   : > { %v6878_v22 = vpop.f32.mrf.mxu2  ;;  %v6880_v41 = vpop.f32.mrf.mxu3 }
 0x970   : > { %8492 = vst [vmem:[#allocation42_spill] sm:$0xff] %v6878_v22  ;;  %v2615_v50 = vmax.f32 %v6878_v22, %v6880_v41 }
 0x971   : > { %8493 = vst [vmem:[#allocation27_spill] sm:$0xff] %v6880_v41 }
 0x972   : > { %2616 = vmax.xlane.f32.xlu0 %v2615_v50 }
 0x977   : > { %v6884_v37 = vpop.f32.mrf.mxu2  ;;  %v6886_v44 = vpop.f32.mrf.mxu3 }
 0x978   : > { %v2618_v59 = vmax.f32 %v6884_v37, %v6886_v44 }
 0x97a   : > { %2619 = vmax.xlane.f32.xlu2 %v2618_v59 }
 0x97f   : > { %v6890_v19 = vpop.f32.mrf.mxu2  ;;  %v6892_v12 = vpop.f32.mrf.mxu3 }
 0x980   : > { %8494 = vst [vmem:[#allocation28_spill] sm:$0xff] %v6890_v19  ;;  %v2621_v34 = vmax.f32 %v6890_v19, %v6892_v12 }
 0x981   : > { %8495 = vst [vmem:[#allocation43_spill] sm:$0xff] %v6892_v12 }
 0x982   : > { %2622 = vmax.xlane.f32.xlu0 %v2621_v34 }
 0x987   : > { %v6896_v57 = vpop.f32.mrf.mxu2  ;;  %v6898_v51 = vpop.f32.mrf.mxu3 }
 0x988   : > { %8496 = vst [vmem:[#allocation44_spill] sm:$0xff] %v6898_v51  ;;  %v2624_v3 = vmax.f32 %v6896_v57, %v6898_v51 }
 0x98a   : > { %2625 = vmax.xlane.f32.xlu2 %v2624_v3 }
 0x98f   : > { %v6902_v8 = vpop.f32.mrf.mxu2  ;;  %v6904_v30 = vpop.f32.mrf.mxu3 }
 0x990   : > { %v2627_v58 = vmax.f32 %v6902_v8, %v6904_v30 }
 0x992   : > { %2628 = vmax.xlane.f32.xlu0 %v2627_v58 }
 0x997   : > { %v6908_v10 = vpop.f32.mrf.mxu2  ;;  %v6910_v23 = vpop.f32.mrf.mxu3 }
 0x998   : > { %v2630_v53 = vmax.f32 %v6908_v10, %v6910_v23 }
 0x99a   : > { %2631 = vmax.xlane.f32.xlu2 %v2630_v53 }
 0x99d   : > { %v2590_v50 = vpop.xlane.xlu2 %2589 }
 0x99f   : > { %v6914_v59 = vpop.f32.mrf.mxu2  ;;  %v6916_v34 = vpop.f32.mrf.mxu3 }
 0x9a0   : > { %v2633_v3 = vmax.f32 %v6914_v59, %v6916_v34 }
 0x9a2   : > { %2634 = vmax.xlane.f32.xlu0 %v2633_v3 }
 0x9a5   : > { %v2584_v2 = vpop.xlane.xlu2 %2583  ;;  %v2593_v32 = vpop.xlane.xlu0 %2592 }
 0x9a6   : > { %v2672_v58 = vsub.f32 %v6792_v14, %v2584_v2  ;;  %v2673_v60 = vsub.f32 %v6794_v39, %v2584_v2  ;;  %v2678_v24 = vsub.f32 %v6808_v13, %v2593_v32  ;;  %v2679_v25 = vsub.f32 %v6810_v54, %v2593_v32 }
 0x9a7   : > { %v6924_v53 = vpop.f32.mrf.mxu2  ;;  %v6926_v26 = vpop.f32.mrf.mxu3  ;;  %v2676_v32 = vsub.f32 %v6802_v56, %v2590_v50 }
 0x9a8   : > { %v2748_v46 = vmul.f32 1.442695, %v2672_v58  ;;  %v2750_v15 = vmul.f32 1.442695, %v2673_v60  ;;  %v2760_v42 = vmul.f32 1.442695, %v2678_v24 }
 0x9a9   : > { %v2762_v3 = vmul.f32 1.442695, %v2679_v25  ;;  %v2756_v25 = vmul.f32 1.442695, %v2676_v32 }
 0x9aa   : > { %4798 = vpow2.f32 %v2748_v46 }
 0x9ab   : > { %4800 = vpow2.f32 %v2750_v15  ;;  %v2677_v15 = vsub.f32 %v6804_v6, %v2590_v50  ;;  %v2636_v50 = vmax.f32 %v6924_v53, %v6926_v26 }
 0x9ac   : > { %4802 = vpow2.f32 %v2760_v42 }
 0x9ad   : > { %v6928_v5 = vpop.xlane.xlu0 %2586  ;;  %4804 = vpow2.f32 %v2762_v3  ;;  %v6946_v24 = vpop.xlane.xlu2 %2577  ;;  %v2758_v56 = vmul.f32 1.442695, %v2677_v15 }
 0x9ae   : > { %4806 = vpow2.f32 %v2756_v25  ;;  %v2596_v32 = vpop.xlane.xlu1 %2595 }
 0x9af   : > { %v6930_v14 = vpop.f32.mrf.mxu2  ;;  %v6932_v2 = vpop.f32.mrf.mxu3  ;;  %4808 = vpow2.f32 %v2758_v56  ;;  %v2680_v56 = vsub.f32 %v6818_v48, %v2596_v32 }
 0x9b0   : > { %v6934_v39 = vpop.eup %4798  ;;  %v2639_v13 = vmax.f32 %v6930_v14, %v6932_v2 }
 0x9b1   : > { %8497 = vst [vmem:[#allocation45_spill] sm:$0xff] %v6934_v39  ;;  %v6939_v60 = vpop.eup %4800 }
 0x9b2   : > { %8498 = vst [vmem:[#allocation46_spill] sm:$0xff] %v6939_v60  ;;  %2640 = vmax.xlane.f32.xlu0 %v2639_v13  ;;  %v2870_v42 = vadd.f32 %v6939_v60, %v6934_v39  ;;  %v6944_v46 = vpop.eup %4802 }
 0x9b3   : > { %8499 = vst [vmem:[#allocation35_spill] sm:$0xff] %v6944_v46  ;;  %v6948_v54 = vpop.eup %4804 }
 0x9b4   : > { %2871 = vadd.xlane.f32.xlu2 %v2870_v42  ;;  %8500 = vst [vmem:[#allocation41_spill] sm:$0xff] %v6948_v54  ;;  %v2879_v6 = vadd.f32 %v6948_v54, %v6944_v46  ;;  %v6962_v15 = vpop.eup %4806  ;;  %v2764_v54 = vmul.f32 1.442695, %v2680_v56 }
 0x9b5   : > { %v6950_v58 = vpop.xlane.xlu0 %2580  ;;  %8501 = vst [vmem:[#allocation37_spill] sm:$0xff] %v6962_v15  ;;  %v6964_v42 = vpop.xlane.xlu2 %2571 }
 0x9b6   : > { %v6966_v36 = vpop.eup %4808  ;;  %4810 = vpow2.f32 %v2764_v54 }
 0x9b7   : > { %v6952_v3 = vpop.f32.mrf.mxu2  ;;  %v6954_v17 = vpop.f32.mrf.mxu3  ;;  %8502 = vst [vmem:[#allocation34_spill] sm:$0xff] %v6966_v36 }
 0x9ba   : > { %2880 = vadd.xlane.f32.xlu0 %v2879_v6  ;;  %v2681_v6 = vsub.f32 %v6820_v52, %v2596_v32  ;;  %v2642_v52 = vmax.f32 %v6952_v3, %v6954_v17 }
 0x9bc   : > { %2637 = vmax.xlane.f32.xlu2 %v2636_v50  ;;  %v2876_v50 = vadd.f32 %v6966_v36, %v6962_v15  ;;  %v2766_v46 = vmul.f32 1.442695, %v2681_v6  ;;  %v6984_v32 = vpop.eup %4810 }
 0x9bd   : > { %v6960_v13 = vpop.xlane.xlu0 %2574  ;;  %v6980_v51 = vpop.xlane.xlu2 %2565 }
 0x9be   : > { %4812 = vpow2.f32 %v2766_v46 }
 0x9bf   : > { %v6968_v60 = vpop.f32.mrf.mxu2  ;;  %v6970_v25 = vpop.f32.mrf.mxu3 }
 0x9c0   : > { %v2645_v39 = vmax.f32 %v6968_v60, %v6970_v25 }
 0x9c2   : > { %2646 = vmax.xlane.f32.xlu0 %v2645_v39 }
 0x9c4   : > { %2877 = vadd.xlane.f32.xlu2 %v2876_v50 }
 0x9c5   : > { %v2569_v41 = vpop.xlane.xlu0 %2568 }
 0x9c6   : > { %v2662_v22 = vsub.f32 %v6766_v35, %v2569_v41  ;;  %v2663_v12 = vsub.f32 %v6768_v38, %v2569_v41  ;;  %v6988_v38 = vpop.eup %4812 }
 0x9c7   : > { %v6994_v54 = vpop.f32.mrf.mxu2  ;;  %v2882_v6 = vadd.f32 %v6988_v38, %v6984_v32  ;;  %v7000_v50 = vpop.f32.mrf.mxu3 }
 0x9c8   : > { %v2728_v19 = vmul.f32 1.442695, %v2662_v22  ;;  %v2730_v48 = vmul.f32 1.442695, %v2663_v12 }
 0x9ca   : > { %4814 = vpow2.f32 %v2728_v19 }
 0x9cb   : > { %4816 = vpow2.f32 %v2730_v48 }
 0x9cc   : > { %2643 = vmax.xlane.f32.xlu2 %v2642_v52 }
 0x9cd   : > { %v2599_v39 = vpop.xlane.xlu0 %2598 }
 0x9ce   : > { %v2682_v56 = vsub.f32 %v6828_v62, %v2599_v39  ;;  %v2683_v35 = vsub.f32 %v6830_v49, %v2599_v39  ;;  %v2605_v62 = vpop.xlane.xlu2 %2604 }
 0x9d0   : > { %v6990_v22 = vpop.eup %4814  ;;  %v2768_v41 = vmul.f32 1.442695, %v2682_v56  ;;  %v2770_v12 = vmul.f32 1.442695, %v2683_v35  ;;  %v2686_v56 = vsub.f32 %v6846_v31, %v2605_v62 }
 0x9d1   : > { %8503 = vst [vmem:[#allocation39_spill] sm:$0xff] %v6990_v22  ;;  %v6992_v46 = vpop.eup %4816 }
 0x9d2   : > { %8504 = vst [vmem:[#allocation36_spill] sm:$0xff] %v6992_v46  ;;  %4818 = vpow2.f32 %v2768_v41  ;;  %v2855_v19 = vadd.f32 %v6992_v46, %v6990_v22  ;;  %v2687_v22 = vsub.f32 %v6848_v55, %v2605_v62 }
 0x9d3   : > { %4820 = vpow2.f32 %v2770_v12  ;;  %v2648_v12 = vmax.f32 %v6994_v54, %v7000_v50 }
 0x9d4   : > { %2856 = vadd.xlane.f32.xlu1 %v2855_v19  ;;  %2883 = vadd.xlane.f32.xlu2 %v2882_v6  ;;  %v7016_v6 = vpop.f32.mrf.mxu2  ;;  %v2778_v31 = vmul.f32 1.442695, %v2687_v22 }
 0x9d5   : > { %v2602_v49 = vpop.xlane.xlu0 %2601 }
 0x9d6   : > { %v2684_v48 = vsub.f32 %v6838_v45, %v2602_v49  ;;  %v2685_v52 = vsub.f32 %v6840_v43, %v2602_v49  ;;  %v7014_v45 = vpop.xlane.xlu2 %2610  ;;  %v2776_v43 = vmul.f32 1.442695, %v2686_v56  ;;  %v7018_v49 = vpop.f32.mrf.mxu3 }
 0x9d7   : > { %v2651_v56 = vmax.f32 %v7016_v6, %v7018_v49 }
 0x9d8   : > { %v7004_v39 = vpop.eup %4818  ;;  %v2772_v35 = vmul.f32 1.442695, %v2684_v48  ;;  %v2774_v41 = vmul.f32 1.442695, %v2685_v52 }
 0x9d9   : > { %v7007_v46 = vpop.eup %4820 }
 0x9da   : > { %4822 = vpow2.f32 %v2772_v35  ;;  %v2885_v19 = vadd.f32 %v7007_v46, %v7004_v39 }
 0x9db   : > { %4824 = vpow2.f32 %v2774_v41 }
 0x9dc   : > { %2886 = vadd.xlane.f32.xlu0 %v2885_v19  ;;  %2649 = vmax.xlane.f32.xlu2 %v2648_v12  ;;  %4826 = vpow2.f32 %v2776_v43  ;;  %v7030_v12 = vpop.f32.mrf.mxu2 }
 0x9dd   : > { %v2608_v48 = vpop.xlane.xlu0 %2607  ;;  %4828 = vpow2.f32 %v2778_v31 }
 0x9de   : > { %v2688_v62 = vsub.f32 %v6856_v7, %v2608_v48  ;;  %v2689_v35 = vsub.f32 %v6858_v4, %v2608_v48  ;;  %v2614_v43 = vpop.xlane.xlu2 %2613  ;;  %v7032_v36 = vpop.f32.mrf.mxu3  ;;  %v2668_v4 = vsub.f32 %v6782_v20, %v6946_v24  ;;  %v2669_v48 = vsub.f32 %v6784_v1, %v6946_v24 }
 0x9e0   : > { %v7020_v55 = vpop.eup %4822  ;;  %v2780_v22 = vmul.f32 1.442695, %v2688_v62  ;;  %v2782_v19 = vmul.f32 1.442695, %v2689_v35  ;;  %v2674_v62 = vsub.f32 %v6796_v61, %v6928_v5  ;;  %v2654_v35 = vmax.f32 %v7030_v12, %v7032_v36 }
 0x9e1   : > { %v7023_v52 = vpop.eup %4824  ;;  %v2742_v15 = vmul.f32 1.442695, %v2669_v48  ;;  %v2664_v61 = vsub.f32 %v6772_v63, %v6964_v42  ;;  %v2670_v48 = vsub.f32 %v6786_v16, %v6950_v58 }
 0x9e2   : > { %8505 = vst [vmem:[#allocation40_spill] sm:$0xff] %v7023_v52  ;;  %v2888_v41 = vadd.f32 %v7023_v52, %v7020_v55  ;;  %v7034_v7 = vpop.eup %4826  ;;  %4830 = vpow2.f32 %v2780_v22  ;;  %v2752_v52 = vmul.f32 1.442695, %v2674_v62 }
 0x9e3   : > { %v7038_v31 = vpop.eup %4828  ;;  %4832 = vpow2.f32 %v2782_v19 }
 0x9e4   : > { %2889 = vadd.xlane.f32.xlu2 %v2888_v41  ;;  %2652 = vmax.xlane.f32.xlu0 %v2651_v56  ;;  %v2675_v56 = vsub.f32 %v6798_v9, %v6928_v5  ;;  %v2740_v41 = vmul.f32 1.442695, %v2668_v4  ;;  %v2891_v20 = vadd.f32 %v7038_v31, %v7034_v7  ;;  %v2665_v5 = vsub.f32 %v6774_v27, %v6964_v42  ;;  %v7062_v62 = vpop.f32.mrf.mxu2 }
 0x9e5   : > { %v2732_v27 = vmul.f32 1.442695, %v2664_v61 }
 0x9e6   : > { %v2754_v1 = vmul.f32 1.442695, %v2675_v56  ;;  %4834 = vpow2.f32 %v2740_v41  ;;  %v7064_v63 = vpop.f32.mrf.mxu3 }
 0x9e7   : > { %4836 = vpow2.f32 %v2742_v15  ;;  %v2734_v15 = vmul.f32 1.442695, %v2665_v5  ;;  %v2657_v16 = vmax.f32 %v7062_v62, %v7064_v63  ;;  %v2690_v5 = vsub.f32 %v6862_v18, %v7014_v45 }
 0x9e8   : > { %v7052_v22 = vpop.eup %4830  ;;  %4838 = vpow2.f32 %v2752_v52  ;;  %v2744_v52 = vmul.f32 1.442695, %v2670_v48 }
 0x9e9   : > { %v7058_v4 = vpop.eup %4832  ;;  %4840 = vpow2.f32 %v2754_v1 }
 0x9ea   : > { %v2894_v42 = vadd.f32 %v7058_v4, %v7052_v22 }
 0x9ec   : > { %2892 = vadd.xlane.f32.xlu0 %v2891_v20  ;;  %2655 = vmax.xlane.f32.xlu2 %v2654_v35  ;;  %v2692_v35 = vsub.f32 %v6872_v29, %v2614_v43  ;;  %v7074_v29 = vpop.eup %4834 }
 0x9ed   : > { %v2620_v24 = vpop.xlane.xlu2 %2619  ;;  %v7076_v1 = vpop.eup %4836 }
 0x9ee   : > { %v2696_v9 = vsub.f32 %v6884_v37, %v2620_v24  ;;  %v2697_v19 = vsub.f32 %v6886_v44, %v2620_v24  ;;  %v2671_v37 = vsub.f32 %v6788_v33, %v6950_v58  ;;  %v2693_v44 = vsub.f32 %v6874_v0, %v2614_v43  ;;  %8506 = vst [vmem:[#allocation38_spill] sm:$0xff] %v7076_v1  ;;  %v7078_v0 = vpop.eup %4838 }
 0x9ef   : > { %v2788_v20 = vmul.f32 1.442695, %v2692_v35  ;;  %v7080_v43 = vpop.eup %4840  ;;  %v2864_v48 = vadd.f32 %v7076_v1, %v7074_v29 }
 0x9f0   : > { %v2796_v56 = vmul.f32 1.442695, %v2696_v9  ;;  %v2798_v41 = vmul.f32 1.442695, %v2697_v19  ;;  %v2790_v33 = vmul.f32 1.442695, %v2693_v44  ;;  %v2691_v9 = vsub.f32 %v6864_v40, %v7014_v45 }
 0x9f1   : > { %v2746_v58 = vmul.f32 1.442695, %v2671_v37 }
 0x9f2   : > { %4842 = vpow2.f32 %v2796_v56  ;;  %v2873_v56 = vadd.f32 %v7080_v43, %v7078_v0  ;;  %v2786_v45 = vmul.f32 1.442695, %v2691_v9 }
 0x9f3   : > { %4844 = vpow2.f32 %v2798_v41 }
 0x9f4   : > { %2895 = vadd.xlane.f32.xlu2 %v2894_v42  ;;  %2658 = vmax.xlane.f32.xlu0 %v2657_v16  ;;  %4846 = vpow2.f32 %v2732_v27  ;;  %v2784_v27 = vmul.f32 1.442695, %v2690_v5 }
 0x9f5   : > { %4848 = vpow2.f32 %v2734_v15 }
 0x9f6   : > { %4850 = vpow2.f32 %v2744_v52  ;;  %v7114_v52 = vpop.xlane.xlu0 %2616 }
 0x9f7   : > { %4852 = vpow2.f32 %v2788_v20 }
 0x9f8   : > { %v7082_v61 = vpop.eup %4842  ;;  %4854 = vpow2.f32 %v2790_v33 }
 0x9f9   : > { %8507 = vst [vmem:[#allocation21_spill] sm:$0xff] %v7082_v61  ;;  %v7084_v24 = vpop.eup %4844  ;;  %4856 = vpow2.f32 %v2746_v58 }
 0x9fa   : > { %8508 = vst [vmem:[#allocation22_spill] sm:$0xff] %v7084_v24  ;;  %v2906_v19 = vadd.f32 %v7084_v24, %v7082_v61  ;;  %v7094_v35 = vpop.eup %4846  ;;  %4858 = vpow2.f32 %v2784_v27 }
 0x9fb   : > { %8509 = vst [vmem:[#allocation5_spill] sm:$0xff] %v7094_v35  ;;  %v7098_v41 = vpop.eup %4848  ;;  %4860 = vpow2.f32 %v2786_v45 }
 0x9fc   : > { %8510 = vst [vmem:[#allocation6_spill] sm:$0xff] %v7098_v41  ;;  %2907 = vadd.xlane.f32.xlu1 %v2906_v19  ;;  %2865 = vadd.xlane.f32.xlu2 %v2864_v48  ;;  %v7100_v18 = vpop.eup %4850  ;;  %v2858_v16 = vadd.f32 %v7098_v41, %v7094_v35  ;;  %v296_v48 = vld [vmem:[%s8194_s3 + $0x28] sm:$0xff] }
 0x9fd   : > { %2874 = vadd.xlane.f32.xlu0 %v2873_v56  ;;  %v7102_v40 = vpop.eup %4852  ;;  %v7126_v19 = vpop.xlane.xlu2 %2625 }
 0x9fe   : > { %8511 = vst [vmem:[#allocation3_spill] sm:$0xff] %v7102_v40  ;;  %v7104_v37 = vpop.eup %4854  ;;  %v7122_v5 = vpop.xlane.xlu0 %2622 }
 0x9ff   : > { %8512 = vst [vmem:[#allocation4_spill] sm:$0xff] %v7104_v37  ;;  %v7106_v44 = vpop.eup %4856  ;;  %v2900_v15 = vadd.f32 %v7104_v37, %v7102_v40 }
 0xa00   : > { %v2867_v42 = vadd.f32 %v7106_v44, %v7100_v18  ;;  %v7116_v20 = vpop.eup %4858 }
 0xa01   : > { %v7118_v33 = vpop.eup %4860 }
 0xa02   : > { %v2897_v58 = vadd.f32 %v7118_v33, %v7116_v20 }
 0xa04   : > { %2901 = vadd.xlane.f32.xlu1 %v2900_v15  ;;  %2859 = vadd.xlane.f32.xlu2 %v2858_v16 }
 0xa05   : > { %2868 = vadd.xlane.f32.xlu0 %v2867_v42 }
 0xa06   : > { %v7124_v9 = vpop.xlane.xlu0 %2628 }
 0xa0d   : > { %2898 = vadd.xlane.f32.xlu0 %v2897_v58  ;;  %v7133_v27 = vpop.xlane.xlu2 %2631 }
 0xa15   : > { %v7131_v56 = vpop.xlane.xlu0 %2634 }
 0xa1d   : > { %332 = vperm.xlu1 %4396, %v296_v48  }
 0xa25   : > { %v2641_v45 = vpop.xlane.xlu0 %2640 }
 0xa26   : > { %v2710_v15 = vsub.f32 %v6930_v14, %v2641_v45  ;;  %v2711_v16 = vsub.f32 %v6932_v2, %v2641_v45 }
 0xa27   : > { %v7137_v42 = vpop.xlane.xlu2 %2871 }
 0xa28   : > { %v2824_v58 = vmul.f32 1.442695, %v2710_v15  ;;  %v2826_v37 = vmul.f32 1.442695, %v2711_v16 }
 0xa2a   : > { %4862 = vpow2.f32 %v2824_v58 }
 0xa2b   : > { %4864 = vpow2.f32 %v2826_v37 }
 0xa2d   : > { %v7139_v40 = vpop.xlane.xlu0 %2880 }
 0xa2f   : > { %v2638_v24 = vpop.xlane.xlu2 %2637 }
 0xa30   : > { %v7141_v61 = vpop.eup %4862  ;;  %v2708_v48 = vsub.f32 %v6924_v53, %v2638_v24  ;;  %v2709_v41 = vsub.f32 %v6926_v26, %v2638_v24 }
 0xa31   : > { %v7145_v35 = vpop.eup %4864 }
 0xa32   : > { %v2820_v14 = vmul.f32 1.442695, %v2708_v48  ;;  %v2822_v1 = vmul.f32 1.442695, %v2709_v41  ;;  %v2927_v2 = vadd.f32 %v7145_v35, %v7141_v61 }
 0xa34   : > { %4866 = vpow2.f32 %v2820_v14  ;;  %2928 = vadd.xlane.f32.xlu0 %v2927_v2 }
 0xa35   : > { %4868 = vpow2.f32 %v2822_v1  ;;  %v2647_v37 = vpop.xlane.xlu0 %2646 }
 0xa36   : > { %v2714_v45 = vsub.f32 %v6968_v60, %v2647_v37  ;;  %v2715_v15 = vsub.f32 %v6970_v25, %v2647_v37 }
 0xa37   : > { %v7151_v16 = vpop.xlane.xlu2 %2877 }
 0xa38   : > { %v2832_v53 = vmul.f32 1.442695, %v2714_v45  ;;  %v2834_v58 = vmul.f32 1.442695, %v2715_v15 }
 0xa3a   : > { %v7153_v26 = vpop.eup %4866  ;;  %4870 = vpow2.f32 %v2832_v53 }
 0xa3b   : > { %v7155_v24 = vpop.eup %4868  ;;  %4872 = vpow2.f32 %v2834_v58 }
 0xa3c   : > { %v2924_v41 = vadd.f32 %v7155_v24, %v7153_v26 }
 0xa3e   : > { %2925 = vadd.xlane.f32.xlu2 %v2924_v41 }
 0xa3f   : > { %v2644_v1 = vpop.xlane.xlu2 %2643 }
 0xa40   : > { %v7159_v48 = vpop.eup %4870  ;;  %v2712_v60 = vsub.f32 %v6952_v3, %v2644_v1  ;;  %v2713_v25 = vsub.f32 %v6954_v17, %v2644_v1 }
 0xa41   : > { %8513 = vst [vmem:[#allocation19_spill] sm:$0xff] %v7159_v48  ;;  %v7163_v14 = vpop.eup %4872 }
 0xa42   : > { %8514 = vst [vmem:[#allocation20_spill] sm:$0xff] %v7163_v14  ;;  %v2828_v2 = vmul.f32 1.442695, %v2712_v60  ;;  %v2830_v37 = vmul.f32 1.442695, %v2713_v25  ;;  %v2933_v45 = vadd.f32 %v7163_v14, %v7159_v48 }
 0xa44   : > { %4874 = vpow2.f32 %v2828_v2  ;;  %2934 = vadd.xlane.f32.xlu0 %v2933_v45 }
 0xa45   : > { %4876 = vpow2.f32 %v2830_v37 }
 0xa47   : > { %v2884_v15 = vpop.xlane.xlu2 %2883 }
 0xa48   : > { %4878 = vrcp.f32 %v2884_v15 }
 0xa4a   : > { %v7167_v53 = vpop.eup %4874 }
 0xa4b   : > { %v7169_v58 = vpop.eup %4876 }
 0xa4c   : > { %8515 = vst [vmem:[#allocation51_spill] sm:$0xff] %v7169_v58  ;;  %v2930_v3 = vadd.f32 %v7169_v58, %v7167_v53 }
 0xa4e   : > { %2931 = vadd.xlane.f32.xlu2 %v2930_v3  ;;  %v4879_v37 = vpop.eup %4878 }
 0xa4f   : > { %v2887_v17 = vpop.xlane.xlu0 %2886  ;;  %v2650_v41 = vpop.xlane.xlu2 %2649  ;;  %v7178_v58 = vmul.f32 %v4879_v37, %v6984_v32  ;;  %v7184_v3 = vmul.f32 %v4879_v37, %v6988_v38  ;;  %v2704_v37 = vsub.f32 %v6908_v10, %v7133_v27 }
 0xa50   : > { %4880 = vrcp.f32 %v2887_v17  ;;  %v2716_v1 = vsub.f32 %v6994_v54, %v2650_v41  ;;  %v2717_v60 = vsub.f32 %v7000_v50, %v2650_v41 }
 0xa52   : > { %v2836_v25 = vmul.f32 1.442695, %v2716_v1  ;;  %v2838_v2 = vmul.f32 1.442695, %v2717_v60 }
 0xa54   : > { %4882 = vpow2.f32 %v2836_v25 }
 0xa55   : > { %4884 = vpow2.f32 %v2838_v2 }
 0xa56   : > { %v4881_v45 = vpop.eup %4880 }
 0xa57   : > { %v7175_v14 = vpop.xlane.xlu2 %2889  ;;  %v2653_v48 = vpop.xlane.xlu0 %2652  ;;  %v7181_v15 = vmul.f32 %v4881_v45, %v7004_v39  ;;  %v7187_v54 = vmul.f32 %v4881_v45, %v7007_v46 }
 0xa58   : > { %v2718_v50 = vsub.f32 %v7016_v6, %v2653_v48  ;;  %v2719_v17 = vsub.f32 %v7018_v49, %v2653_v48 }
 0xa59   : > { %v3054_v41 = vpack.c.bf16 %v7181_v15, %v7178_v58  ;;  %v3055_v32 = vpack.c.bf16 %v7187_v54, %v7184_v3  ;;  %v8524_v15 = vld [vmem:[#allocation35_spill] sm:$0xff]  ;;  %v8525_v54 = vld [vmem:[#allocation41_spill] sm:$0xff] }
 0xa5a   : > { %v7195_v1 = vpop.eup %4882  ;;  %v2840_v39 = vmul.f32 1.442695, %v2718_v50  ;;  %v2842_v60 = vmul.f32 1.442695, %v2719_v17 }
 0xa5b   : > { %v7197_v25 = vpop.eup %4884 }
 0xa5c   : > { %4886 = vpow2.f32 %v2840_v39  ;;  %v2936_v38 = vadd.f32 %v7197_v25, %v7195_v1  ;;  %v2705_v39 = vsub.f32 %v6910_v23, %v7133_v27  ;;  %v2666_v27 = vsub.f32 %v6776_v21, %v6960_v13 }
 0xa5d   : > { %4888 = vpow2.f32 %v2842_v60 }
 0xa5e   : > { %2937 = vadd.xlane.f32.xlu2 %v2936_v38 }
 0xa5f   : > { %v7201_v46 = vpop.xlane.xlu0 %2892  ;;  %v2656_v6 = vpop.xlane.xlu2 %2655 }
 0xa60   : > { %v2720_v49 = vsub.f32 %v7030_v12, %v2656_v6  ;;  %v2721_v48 = vsub.f32 %v7032_v36, %v2656_v6  ;;  %v2812_v12 = vmul.f32 1.442695, %v2704_v37  ;;  %v2814_v36 = vmul.f32 1.442695, %v2705_v39 }
 0xa61   : > { %v2660_v6 = vsub.f32 %v6762_v28, %v6980_v51  ;;  %v2667_v28 = vsub.f32 %v6778_v11, %v6960_v13  ;;  %v2703_v13 = vsub.f32 %v6904_v30, %v7124_v9 }
 0xa62   : > { %v7205_v2 = vpop.eup %4886  ;;  %v2844_v45 = vmul.f32 1.442695, %v2720_v49  ;;  %v2846_v50 = vmul.f32 1.442695, %v2721_v48  ;;  %v2661_v48 = vsub.f32 %v6764_v47, %v6980_v51  ;;  %v2736_v51 = vmul.f32 1.442695, %v2666_v27 }
 0xa63   : > { %v7209_v17 = vpop.eup %4888  ;;  %v2738_v39 = vmul.f32 1.442695, %v2667_v28  ;;  %v2810_v30 = vmul.f32 1.442695, %v2703_v13  ;;  %v2700_v28 = vsub.f32 %v6896_v57, %v7126_v19 }
 0xa64   : > { %4890 = vpow2.f32 %v2844_v45  ;;  %v2939_v60 = vadd.f32 %v7209_v17, %v7205_v2  ;;  %v2726_v47 = vmul.f32 1.442695, %v2661_v48 }
 0xa65   : > { %4892 = vpow2.f32 %v2846_v50  ;;  %v2804_v13 = vmul.f32 1.442695, %v2700_v28 }
 0xa66   : > { %2940 = vadd.xlane.f32.xlu0 %v2939_v60  ;;  %4894 = vpow2.f32 %v2812_v12  ;;  %v2702_v60 = vsub.f32 %v6902_v8, %v7124_v9  ;;  %v2707_v8 = vsub.f32 %v6916_v34, %v7131_v56 }
 0xa67   : > { %v2659_v38 = vpop.xlane.xlu0 %2658  ;;  %4896 = vpow2.f32 %v2814_v36 }
 0xa68   : > { %v2722_v10 = vsub.f32 %v7062_v62, %v2659_v38  ;;  %v2723_v49 = vsub.f32 %v7064_v63, %v2659_v38  ;;  %v2724_v62 = vmul.f32 1.442695, %v2660_v6  ;;  %v2706_v38 = vsub.f32 %v6914_v59, %v7131_v56 }
 0xa6a   : > { %v7221_v23 = vpop.eup %4890  ;;  %v2848_v37 = vmul.f32 1.442695, %v2722_v10  ;;  %v2850_v45 = vmul.f32 1.442695, %v2723_v49  ;;  %v2808_v10 = vmul.f32 1.442695, %v2702_v60 }
 0xa6b   : > { %v7225_v50 = vpop.eup %4892  ;;  %v2816_v27 = vmul.f32 1.442695, %v2706_v38 }
 0xa6c   : > { %4898 = vpow2.f32 %v2848_v37  ;;  %v2942_v63 = vadd.f32 %v7225_v50, %v7221_v23  ;;  %v7231_v21 = vpop.eup %4894  ;;  %v2818_v37 = vmul.f32 1.442695, %v2707_v8 }
 0xa6d   : > { %4900 = vpow2.f32 %v2850_v45  ;;  %v7237_v11 = vpop.eup %4896 }
 0xa6e   : > { %2943 = vadd.xlane.f32.xlu2 %v2942_v63  ;;  %4902 = vpow2.f32 %v2724_v62  ;;  %v2918_v49 = vadd.f32 %v7237_v11, %v7231_v21  ;;  %v8516_v62 = vld [vmem:[#allocation44_spill] sm:$0xff] }
 0xa6f   : > { %4904 = vpow2.f32 %v2726_v47  ;;  %v2701_v63 = vsub.f32 %v8516_v62, %v7126_v19  ;;  %v2896_v47 = vpop.xlane.xlu2 %2895 }
 0xa70   : > { %v7235_v12 = vpop.xlane.xlu0 %2874  ;;  %4906 = vpow2.f32 %v2736_v51 }
 0xa71   : > { %4908 = vpow2.f32 %v2738_v39  ;;  %v2806_v57 = vmul.f32 1.442695, %v2701_v63 }
 0xa72   : > { %v7241_v36 = vpop.eup %4898  ;;  %4910 = vpow2.f32 %v2808_v10 }
 0xa73   : > { %v7245_v6 = vpop.eup %4900  ;;  %4912 = vpow2.f32 %v2810_v30  ;;  %v8518_v30 = vld [vmem:[#allocation43_spill] sm:$0xff] }
 0xa74   : > { %v2945_v48 = vadd.f32 %v7245_v6, %v7241_v36  ;;  %v7253_v9 = vpop.eup %4902  ;;  %4914 = vpow2.f32 %v2816_v27  ;;  %v2699_v27 = vsub.f32 %v8518_v30, %v7122_v5 }
 0xa75   : > { %v7255_v59 = vpop.eup %4904  ;;  %4916 = vpow2.f32 %v2818_v37 }
 0xa76   : > { %2919 = vadd.xlane.f32.xlu2 %v2918_v49  ;;  %2946 = vadd.xlane.f32.xlu0 %v2945_v48  ;;  %v7257_v45 = vpop.eup %4906  ;;  %v2852_v51 = vadd.f32 %v7255_v59, %v7253_v9  ;;  %4918 = vrcp.f32 %v2896_v47  ;;  %v8517_v49 = vld [vmem:[#allocation28_spill] sm:$0xff] }
 0xa77   : > { %v7261_v56 = vpop.eup %4908  ;;  %v2698_v48 = vsub.f32 %v8517_v49, %v7122_v5  ;;  %v2866_v58 = vpop.xlane.xlu2 %2865 }
 0xa78   : > { %v7259_v34 = vpop.xlane.xlu0 %2868  ;;  %v2861_v39 = vadd.f32 %v7261_v56, %v7257_v45  ;;  %v7271_v60 = vpop.eup %4910 }
 0xa79   : > { %v7273_v38 = vpop.eup %4912  ;;  %v2800_v63 = vmul.f32 1.442695, %v2698_v48 }
 0xa7a   : > { %v7275_v8 = vpop.eup %4914  ;;  %v2915_v37 = vadd.f32 %v7273_v38, %v7271_v60 }
 0xa7b   : > { %v7277_v10 = vpop.eup %4916 }
 0xa7c   : > { %v2921_v28 = vadd.f32 %v7277_v10, %v7275_v8  ;;  %v4919_v62 = vpop.eup %4918 }
 0xa7d   : > { %v3008_v5 = vmul.f32 %v4919_v62, %v7052_v22 }
 0xa7e   : > { %2853 = vadd.xlane.f32.xlu2 %v2852_v51  ;;  %2862 = vadd.xlane.f32.xlu0 %v2861_v39  ;;  %v2802_v51 = vmul.f32 1.442695, %v2699_v27 }
 0xa80   : > { %v2899_v19 = vpop.xlane.xlu0 %2898 }
 0xa81   : > { %4920 = vrcp.f32 %v2899_v19 }
 0xa82   : > { %4922 = vpow2.f32 %v2804_v13  ;;  %v3009_v13 = vmul.f32 %v4919_v62, %v7058_v4 }
 0xa83   : > { %4924 = vpow2.f32 %v2806_v57 }
 0xa84   : > { %4926 = vrcp.f32 %v7201_v46  ;;  %v8519_v46 = vld [vmem:[#allocation42_spill] sm:$0xff] }
 0xa85   : > { %4928 = vrcp.f32 %v7175_v14  ;;  %v2694_v48 = vsub.f32 %v8519_v46, %v7114_v52  ;;  %v8520_v14 = vld [vmem:[#allocation27_spill] sm:$0xff] }
 0xa86   : > { %2916 = vadd.xlane.f32.xlu2 %v2915_v37  ;;  %2922 = vadd.xlane.f32.xlu0 %v2921_v28  ;;  %4930 = vpow2.f32 %v2800_v63  ;;  %v2695_v28 = vsub.f32 %v8520_v14, %v7114_v52  ;;  %v8523_v14 = vld [vmem:[#allocation34_spill] sm:$0xff] }
 0xa87   : > { %v4921_v47 = vpop.eup %4920  ;;  %4932 = vpow2.f32 %v2802_v51 }
 0xa88   : > { %v7289_v39 = vpop.eup %4922  ;;  %v3010_v57 = vmul.f32 %v4921_v47, %v7116_v20  ;;  %v3011_v19 = vmul.f32 %v4921_v47, %v7118_v33  ;;  %v2792_v20 = vmul.f32 1.442695, %v2694_v48  ;;  %v2794_v63 = vmul.f32 1.442695, %v2695_v28  ;;  %v303_v48 = vld [vmem:[%s8194_s3 + $0x60] sm:$0xff] }
 0xa89   : > { %v7295_v49 = vpop.eup %4924 }
 0xa8a   : > { %v3058_v30 = vpack.c.bf16 %v3010_v57, %v3008_v5  ;;  %v3059_v27 = vpack.c.bf16 %v3011_v19, %v3009_v13  ;;  %v4927_v37 = vpop.eup %4926  ;;  %v2912_v22 = vadd.f32 %v7295_v49, %v7289_v39  ;;  %v8521_v13 = vld [vmem:[#allocation40_spill] sm:$0xff]  ;;  %4934 = vpow2.f32 %v2792_v20 }
 0xa8b   : > { %v4929_v4 = vpop.eup %4928  ;;  %v3006_v33 = vmul.f32 %v4927_v37, %v7034_v7  ;;  %v3007_v62 = vmul.f32 %v4927_v37, %v7038_v31  ;;  %4936 = vpow2.f32 %v2794_v63 }
 0xa8c   : > { %3076 = vmatpush.bf16.xpose.msra.mxu0 %v3058_v30  ;;  %3089 = vmatpush.bf16.xpose.msra.mxu1 %v3059_v27  ;;  %v7305_v47 = vpop.eup %4930  ;;  %v3004_v5 = vmul.f32 %v4929_v4, %v7020_v55  ;;  %v3005_v52 = vmul.f32 %v4929_v4, %v8521_v13  ;;  %4938 = vrcp.f32 %v7151_v16  ;;  %v7330_v30 = vpop.xlane.xlu1 %2856  ;;  %v8522_v27 = vld [vmem:[#allocation37_spill] sm:$0xff] }
 0xa8d   : > { %v7309_v51 = vpop.eup %4932  ;;  %4940 = vrcp.f32 %v7139_v40 }
 0xa8e   : > { %2913 = vadd.xlane.f32.xlu0 %v2912_v22  ;;  %v3056_v57 = vpack.c.bf16 %v3006_v33, %v3004_v5  ;;  %v3057_v19 = vpack.c.bf16 %v3007_v62, %v3005_v52  ;;  %v2909_v7 = vadd.f32 %v7309_v51, %v7305_v47  ;;  %4942 = vrcp.f32 %v7235_v12  ;;  %v8527_v5 = vld [vmem:[#allocation46_spill] sm:$0xff]  ;;  %v2860_v52 = vpop.xlane.xlu2 %2859 }
 0xa8f   : > { %4944 = vrcp.f32 %v7137_v42  ;;  %v8526_v42 = vld [vmem:[#allocation45_spill] sm:$0xff] }
 0xa90   : > { %v7315_v31 = vpop.eup %4934  ;;  %4946 = vrcp.f32 %v7259_v34 }
 0xa91   : > { %v7317_v55 = vpop.eup %4936  ;;  %4948 = vrcp.f32 %v2866_v58 }
 0xa92   : > { %v4939_v46 = vpop.eup %4938  ;;  %v2903_v40 = vadd.f32 %v7317_v55, %v7315_v31 }
 0xa93   : > { %v4941_v16 = vpop.eup %4940  ;;  %v2996_v37 = vmul.f32 %v4939_v46, %v8522_v27  ;;  %v2997_v28 = vmul.f32 %v4939_v46, %v8523_v14  ;;  %v8528_v27 = vld [vmem:[#allocation38_spill] sm:$0xff] }
 0xa94   : > { %3077 = vmatpush.bf16.xpose.msra.mxu0 %v3056_v57  ;;  %3090 = vmatpush.bf16.xpose.msra.mxu1 %v3057_v19  ;;  %v2998_v3 = vmul.f32 %v4941_v16, %v8524_v15  ;;  %v4943_v4 = vpop.eup %4942  ;;  %v7338_v12 = vpop.xlane.xlu1 %2907 }
 0xa95   : > { %v4945_v20 = vpop.eup %4944  ;;  %v2994_v33 = vmul.f32 %v4943_v4, %v7078_v0  ;;  %v2995_v62 = vmul.f32 %v4943_v4, %v7080_v43  ;;  %v300_v43 = vld [vmem:[%s8194_s3 + $0x48] sm:$0xff] }
 0xa96   : > { %2910 = vadd.xlane.f32.xlu0 %v2909_v7  ;;  %v2992_v63 = vmul.f32 %v4945_v20, %v8526_v42  ;;  %v2993_v13 = vmul.f32 %v4945_v20, %v8527_v5  ;;  %v4947_v7 = vpop.eup %4946  ;;  %v8530_v4 = vld [vmem:[#allocation8_spill] sm:$0xff] }
 0xa97   : > { %v4949_v46 = vpop.eup %4948  ;;  %v2991_v34 = vmul.f32 %v4947_v7, %v7106_v44 }
 0xa98   : > { %v3050_v57 = vpack.c.bf16 %v2994_v33, %v2992_v63  ;;  %v3051_v19 = vpack.c.bf16 %v2995_v62, %v2993_v13  ;;  %v8531_v62 = vld [vmem:[#allocation11_spill] sm:$0xff] }
 0xa9c   : > { %3078 = vmatpush.bf16.xpose.msra.mxu0 %v3054_v41  ;;  %3091 = vmatpush.bf16.xpose.msra.mxu1 %v3055_v32  ;;  %v2999_v41 = vmul.f32 %v4941_v16, %v8525_v54  ;;  %v3052_v32 = vpack.c.bf16 %v2998_v3, %v2996_v37  ;;  %v7347_v0 = vpop.xlane.xlu1 %2901  ;;  %v2988_v16 = vmul.f32 %v4949_v46, %v7074_v29 }
 0xa9d   : > { %v2989_v37 = vmul.f32 %v4949_v46, %v8528_v27 }
 0xa9e   : > { %367 = vperm.xlu2 %4397, %v303_v48   ;;  %2904 = vadd.xlane.f32.xlu0 %v2903_v40  ;;  %v3053_v22 = vpack.c.bf16 %v2999_v41, %v2997_v28  ;;  %v2990_v40 = vmul.f32 %v4947_v7, %v7100_v18 }
 0xa9f   : > { %v3049_v58 = vpack.c.bf16 %v2991_v34, %v2989_v37  ;;  %v8533_v37 = vld [vmem:[#allocation5_spill] sm:$0xff] }
 0xaa0   : > { %v3048_v28 = vpack.c.bf16 %v2990_v40, %v2988_v16 }
 0xaa4   : > { %3079 = vmatpush.bf16.xpose.msra.mxu0 %v3052_v32  ;;  %3092 = vmatpush.bf16.xpose.msra.mxu1 %v3053_v22  ;;  %v333_v44 = vpop.permute.xlu1 %332  ;;  %v8529_v32 = vld [vmem:[#allocation7_spill] sm:$0xff] }
 0xaa5   : > { %v474_v22 = vadd.f32 %v8529_v32, %v333_v44  ;;  %v518_v20 = vadd.f32 %v8530_v4, %v333_v44 }
 0xaa7   : > { %v2929_v48 = vpop.xlane.xlu0 %2928  ;;  %v633_v42 = vmul.f32 %v8531_v62, %v474_v22 }
 0xaa8   : > { %4950 = vrcp.f32 %v2929_v48 }
 0xaa9   : > { %v3130_v5 = vpack.c.bf16 %v633_v42, %v633_v42 }
 0xaac   : > { %3080 = vmatpush.bf16.xpose.msra.mxu0 %v3050_v57  ;;  %3093 = vmatpush.bf16.xpose.msra.mxu1 %v3051_v19 }
 0xaae   : > { %v4951_v18 = vpop.eup %4950 }
 0xaaf   : > { %v7358_v54 = vmul.f32 %v4951_v18, %v7141_v61  ;;  %v7364_v41 = vmul.f32 %v4951_v18, %v7145_v35  ;;  %v8532_v61 = vld [vmem:[#allocation12_spill] sm:$0xff] }
 0xab0   : > { %v634_v63 = vmul.f32 %v8532_v61, %v518_v20 }
 0xab1   : > { %v2926_v14 = vpop.xlane.xlu2 %2925 }
 0xab2   : > { %4952 = vrcp.f32 %v2926_v14  ;;  %352 = vperm.xlu0 %4395, %v300_v43  }
 0xab3   : > { %4954 = vrcp.f32 %v2860_v52 }
 0xab4   : > { %3081 = vmatpush.bf16.xpose.msra.mxu0 %v3048_v28  ;;  %3094 = vmatpush.bf16.xpose.msra.mxu1 %v3049_v58  ;;  %v8534_v58 = vld [vmem:[#allocation6_spill] sm:$0xff] }
 0xab7   : > { %v2935_v35 = vpop.xlane.xlu0 %2934 }
 0xab8   : > { %v4953_v15 = vpop.eup %4952 }
 0xab9   : > { %v7355_v3 = vmul.f32 %v4953_v15, %v7153_v26  ;;  %v7361_v29 = vmul.f32 %v4953_v15, %v7155_v24  ;;  %v3131_v24 = vpack.c.bf16 %v634_v63, %v634_v63  ;;  %v4955_v43 = vpop.eup %4954 }
 0xaba   : > { %v2984_v14 = vmul.f32 %v4955_v43, %v8533_v37  ;;  %v2985_v18 = vmul.f32 %v4955_v43, %v8534_v58  ;;  %v8538_v43 = vld [vmem:[#allocation36_spill] sm:$0xff]  ;;  %v8539_v37 = vld [vmem:[#allocation33_spill] sm:$0xff] }
 0xabb   : > { %v3068_v33 = vpack.c.bf16 %v7358_v54, %v7355_v3  ;;  %v3069_v26 = vpack.c.bf16 %v7364_v41, %v7361_v29 }
 0xac1   : > { %v2932_v13 = vpop.xlane.xlu2 %2931 }
 0xac4   : > { %3136 = vxpose.binary.xlu2.c.b16.start.end [1/2] (short) %v3131_v24, %v3130_v5, 128  ;;  %v8535_v24 = vld [vmem:[#allocation39_spill] sm:$0xff] }
 0xad1   : > { %v2938_v57 = vpop.xlane.xlu2 %2937 }
 0xad9   : > { %v2941_v19 = vpop.xlane.xlu0 %2940 }
 0xae1   : > { %v2944_v7 = vpop.xlane.xlu2 %2943 }
 0xae9   : > { %v7374_v46 = vpop.xlane.xlu2 %2919  ;;  %v2947_v48 = vpop.xlane.xlu0 %2946 }
 0xaf1   : > { %v2854_v40 = vpop.xlane.xlu2 %2853  ;;  %v2863_v34 = vpop.xlane.xlu0 %2862 }
 0xaf2   : > { %4956 = vrcp.f32 %v2863_v34 }
 0xaf3   : > { %4958 = vrcp.f32 %v7330_v30 }
 0xaf4   : > { %4960 = vrcp.f32 %v2854_v40  ;;  %v8537_v40 = vld [vmem:[#allocation24_spill] sm:$0xff] }
 0xaf5   : > { %4962 = vrcp.f32 %v2947_v48 }
 0xaf6   : > { %4964 = vrcp.f32 %v2944_v7  ;;  %v8536_v7 = vld [vmem:[#allocation23_spill] sm:$0xff] }
 0xaf7   : > { %4966 = vrcp.f32 %v2941_v19 }
 0xaf8   : > { %v4957_v16 = vpop.eup %4956  ;;  %4968 = vrcp.f32 %v2938_v57 }
 0xaf9   : > { %v7377_v27 = vpop.xlane.xlu2 %2916  ;;  %v2986_v28 = vmul.f32 %v4957_v16, %v7257_v45  ;;  %v2987_v52 = vmul.f32 %v4957_v16, %v7261_v56  ;;  %v4959_v44 = vpop.eup %4958  ;;  %4970 = vrcp.f32 %v2932_v13 }
 0xafa   : > { %v4961_v22 = vpop.eup %4960  ;;  %v2982_v56 = vmul.f32 %v4959_v44, %v8535_v24  ;;  %v2983_v16 = vmul.f32 %v4959_v44, %v8538_v43  ;;  %4972 = vrcp.f32 %v2935_v35  ;;  %v2923_v44 = vpop.xlane.xlu0 %2922  ;;  %v8541_v35 = vld [vmem:[#allocation51_spill] sm:$0xff] }
 0xafb   : > { %v3046_v15 = vpack.c.bf16 %v2986_v28, %v2984_v14  ;;  %v3047_v32 = vpack.c.bf16 %v2987_v52, %v2985_v18  ;;  %v4963_v4 = vpop.eup %4962  ;;  %v2980_v20 = vmul.f32 %v4961_v22, %v7253_v9  ;;  %v2981_v42 = vmul.f32 %v4961_v22, %v7255_v59 }
 0xafc   : > { %v4965_v30 = vpop.eup %4964  ;;  %v3042_v63 = vmul.f32 %v4963_v4, %v7241_v36  ;;  %v3043_v45 = vmul.f32 %v4963_v4, %v7245_v6  ;;  %v8540_v36 = vld [vmem:[#allocation31_spill] sm:$0xff]  ;;  %4974 = vrcp.f32 %v2923_v44  ;;  %v8548_v44 = vld [vmem:[#allocation13_spill] sm:$0xff] }
 0xafd   : > { %3082 = vmatpush.bf16.xpose.msra.mxu0 %v3046_v15  ;;  %3095 = vmatpush.bf16.xpose.msra.mxu1 %v3047_v32  ;;  %v3040_v19 = vmul.f32 %v4965_v30, %v7221_v23  ;;  %v3041_v9 = vmul.f32 %v4965_v30, %v7225_v50  ;;  %v3044_v6 = vpack.c.bf16 %v2982_v56, %v2980_v20  ;;  %v4967_v18 = vpop.eup %4966  ;;  %4976 = vrcp.f32 %v7374_v46 }
 0xafe   : > { %v3045_v28 = vpack.c.bf16 %v2983_v16, %v2981_v42  ;;  %v4969_v52 = vpop.eup %4968  ;;  %v3038_v23 = vmul.f32 %v4967_v18, %v7205_v2  ;;  %v3039_v50 = vmul.f32 %v4967_v18, %v7209_v17 }
 0xaff   : > { %v3074_v58 = vpack.c.bf16 %v3042_v63, %v3040_v19  ;;  %v3075_v57 = vpack.c.bf16 %v3043_v45, %v3041_v9  ;;  %v3036_v22 = vmul.f32 %v4969_v52, %v7195_v1  ;;  %v3037_v4 = vmul.f32 %v4969_v52, %v7197_v25  ;;  %v4971_v20 = vpop.eup %4970  ;;  %v8542_v63 = vld [vmem:[#allocation19_spill] sm:$0xff] }
 0xb00   : > { %v4973_v2 = vpop.eup %4972  ;;  %v3032_v17 = vmul.f32 %v4971_v20, %v7167_v53  ;;  %v3033_v42 = vmul.f32 %v4971_v20, %v8541_v35  ;;  %v8551_v35 = vld [vmem:[#allocation4_spill] sm:$0xff] }
 0xb01   : > { %v368_v5 = vpop.permute.xlu2 %367  ;;  %v3072_v30 = vpack.c.bf16 %v3038_v23, %v3036_v22  ;;  %v3073_v13 = vpack.c.bf16 %v3039_v50, %v3037_v4  ;;  %v3034_v45 = vmul.f32 %v4973_v2, %v8542_v63  ;;  %v8549_v4 = vld [vmem:[#allocation14_spill] sm:$0xff] }
 0xb02   : > { %v492_v48 = vadd.f32 %v8536_v7, %v368_v5  ;;  %v536_v34 = vadd.f32 %v8537_v40, %v368_v5  ;;  %v8543_v5 = vld [vmem:[#allocation20_spill] sm:$0xff]  ;;  %v2914_v24 = vpop.xlane.xlu0 %2913  ;;  %v4975_v7 = vpop.eup %4974 }
 0xb03   : > { %v3035_v1 = vmul.f32 %v4973_v2, %v8543_v5  ;;  %v3070_v25 = vpack.c.bf16 %v3034_v45, %v3032_v17  ;;  %v4977_v53 = vpop.eup %4976  ;;  %4978 = vrcp.f32 %v2914_v24  ;;  %v3026_v40 = vmul.f32 %v4975_v7, %v7275_v8  ;;  %v8550_v2 = vld [vmem:[#allocation3_spill] sm:$0xff] }
 0xb04   : > { %v7394_v59 = vmul.f32 %v8539_v37, %v492_v48  ;;  %v7397_v14 = vmul.f32 %v8540_v36, %v536_v34  ;;  %v7401_v15 = vpack.c.bf16 %v492_v48, %v492_v48  ;;  %v7403_v32 = vpack.c.bf16 %v536_v34, %v536_v34 }
 0xb05   : > { %3083 = vmatpush.bf16.xpose.msra.mxu0 %v3044_v6  ;;  %3096 = vmatpush.bf16.xpose.msra.mxu1 %v3045_v28  ;;  %v3071_v56 = vpack.c.bf16 %v3035_v1, %v3033_v42  ;;  %v3027_v34 = vmul.f32 %v4975_v7, %v7277_v10  ;;  %4980 = vrcp.f32 %v7377_v27  ;;  %v3024_v46 = vmul.f32 %v4977_v53, %v7231_v21  ;;  %v8545_v28 = vld [vmem:[#allocation18_spill] sm:$0xff] }
 0xb06   : > { %v3025_v43 = vmul.f32 %v4977_v53, %v7237_v11 }
 0xb07   : > { %v3066_v16 = vpack.c.bf16 %v3026_v40, %v3024_v46 }
 0xb08   : > { %v3067_v19 = vpack.c.bf16 %v3027_v34, %v3025_v43 }
 0xb09   : > { %v4979_v3 = vpop.eup %4978 }
 0xb0a   : > { %v2911_v48 = vpop.xlane.xlu0 %2910  ;;  %v3020_v41 = vmul.f32 %v4979_v3, %v7289_v39  ;;  %v3021_v8 = vmul.f32 %v4979_v3, %v7295_v49  ;;  %v8544_v49 = vld [vmem:[#allocation17_spill] sm:$0xff] }
 0xb0b   : > { %v4981_v54 = vpop.eup %4980  ;;  %4982 = vrcp.f32 %v2911_v48 }
 0xb0c   : > { %3084 = vmatmul.bf16.vlgmr.msra.gmra.mxu0 %v7401_v15  ;;  %3097 = vmatmul.bf16.vlgmr.msra.gmra.mxu1 %v7403_v32  ;;  %4984 = vrcp.f32 %v7338_v12  ;;  %v3022_v10 = vmul.f32 %v4981_v54, %v7271_v60  ;;  %v3023_v21 = vmul.f32 %v4981_v54, %v7273_v38 }
 0xb0d   : > { %3102 = vmatpush.bf16.xpose.msrb.mxu0 %v3074_v58  ;;  %3115 = vmatpush.bf16.xpose.msrb.mxu1 %v3075_v57  ;;  %v8546_v58 = vld [vmem:[#allocation21_spill] sm:$0xff]  ;;  %v8547_v57 = vld [vmem:[#allocation22_spill] sm:$0xff] }
 0xb0e   : > { %v3065_v11 = vpack.c.bf16 %v3023_v21, %v3021_v8 }
 0xb12   : > { %v2905_v29 = vpop.xlane.xlu0 %2904 }
 0xb13   : > { %4986 = vrcp.f32 %v2905_v29 }
 0xb14   : > { %4988 = vrcp.f32 %v7347_v0 }
 0xb15   : > { %3103 = vmatpush.bf16.xpose.msrb.mxu0 %v3072_v30  ;;  %3116 = vmatpush.bf16.xpose.msrb.mxu1 %v3073_v13 }
 0xb1d   : > { %3104 = vmatpush.bf16.xpose.msrb.mxu0 %v3070_v25  ;;  %3117 = vmatpush.bf16.xpose.msrb.mxu1 %v3071_v56 }
 0xb24   : > { %v353_v9 = vpop.permute.xlu0 %352 }
 0xb25   : > { %3105 = vmatpush.bf16.xpose.msrb.mxu0 %v3068_v33  ;;  %3118 = vmatpush.bf16.xpose.msrb.mxu1 %v3069_v26  ;;  %v3064_v33 = vpack.c.bf16 %v3022_v10, %v3020_v41  ;;  %v4983_v26 = vpop.eup %4982  ;;  %v484_v12 = vadd.f32 %v8544_v49, %v353_v9  ;;  %v528_v60 = vadd.f32 %v8545_v28, %v353_v9 }
 0xb26   : > { %v4985_v27 = vpop.eup %4984  ;;  %v3018_v6 = vmul.f32 %v4983_v26, %v7305_v47  ;;  %v3019_v39 = vmul.f32 %v4983_v26, %v7309_v51 }
 0xb27   : > { %v3016_v38 = vmul.f32 %v4985_v27, %v8546_v58  ;;  %v3017_v18 = vmul.f32 %v4985_v27, %v8547_v57  ;;  %v4987_v50 = vpop.eup %4986  ;;  %v643_v22 = vmul.f32 %v8548_v44, %v484_v12  ;;  %v644_v30 = vmul.f32 %v8549_v4, %v528_v60 }
 0xb28   : > { %v4989_v47 = vpop.eup %4988  ;;  %v3014_v51 = vmul.f32 %v4987_v50, %v7315_v31  ;;  %v3015_v0 = vmul.f32 %v4987_v50, %v7317_v55 }
 0xb29   : > { %v3062_v52 = vpack.c.bf16 %v3018_v6, %v3016_v38  ;;  %v3063_v23 = vpack.c.bf16 %v3019_v39, %v3017_v18  ;;  %v3132_v13 = vpack.c.bf16 %v643_v22, %v643_v22  ;;  %v3133_v20 = vpack.c.bf16 %v644_v30, %v644_v30 }
 0xb2a   : > { %v3012_v17 = vmul.f32 %v4989_v47, %v8550_v2  ;;  %v3013_v42 = vmul.f32 %v4989_v47, %v8551_v35 }
 0xb2b   : > { %v3209_v5 = vsel %vm544_vm1, %v3132_v13, 0  ;;  %v3212_v1 = vsel %vm544_vm1, %v3133_v20, 0 }
 0xb2c   : > { %v3060_v63 = vpack.c.bf16 %v3014_v51, %v3012_v17  ;;  %v3061_v45 = vpack.c.bf16 %v3015_v0, %v3013_v42 }
 0xb2d   : > { %3106 = vmatpush.bf16.xpose.msrb.mxu0 %v3066_v16  ;;  %3119 = vmatpush.bf16.xpose.msrb.mxu1 %v3067_v19 }
 0xb35   : > { %3107 = vmatpush.bf16.xpose.msrb.mxu0 %v3064_v33  ;;  %3120 = vmatpush.bf16.xpose.msrb.mxu1 %v3065_v11 }
 0xb3d   : > { %3108 = vmatpush.bf16.xpose.msrb.mxu0 %v3062_v52  ;;  %3121 = vmatpush.bf16.xpose.msrb.mxu1 %v3063_v23 }
 0xb45   : > { %3109 = vmatpush.bf16.xpose.msrb.mxu0 %v3060_v63  ;;  %3122 = vmatpush.bf16.xpose.msrb.mxu1 %v3061_v45 }
 0xb4c   : > { %3110 = vmatmul.bf16.vlgmr.msrb.gmra.mxu0 %v7401_v15  ;;  %3123 = vmatmul.bf16.vlgmr.msrb.gmra.mxu1 %v7403_v32 }
 0xb4d   : > { %3221 = vmatpush.bf16.msra.mxu0 %v3209_v5  ;;  %3310 = vmatpush.bf16.msra.mxu1 %v3212_v1 }
 0xb65   : > { %v3144_v31 = vpop.trf.xlu2 }
 0xb66   : > { %4320 = vmatmul.msk.bf16.vlgmr.msra.gmra.mxu0 %vm675_vm2, %v3144_v31  ;;  %4336 = vmatmul.msk.bf16.vlgmr.msra.gmra.mxu1 %vm675_vm2, %v3144_v31 }
 0xb6d   : > { %v3145_v55 = vpop.trf.xlu2 }
 0xb75   : > { %v3146_v24 = vpop.trf.xlu2 }
 0xb76   : > { %4321 = vmatmul.msk.bf16.gmra.mxu0 %vm675_vm2, %v3146_v24  ;;  %4337 = vmatmul.msk.bf16.gmra.mxu1 %vm675_vm2, %v3146_v24 }
 0xb7d   : > { %v3147_v25 = vpop.trf.xlu2 }
 0xb85   : > { %v3148_v56 = vpop.trf.xlu2 }
 0xb86   : > { %4322 = vmatmul.msk.bf16.gmra.mxu0 %vm675_vm2, %v3148_v56  ;;  %4338 = vmatmul.msk.bf16.gmra.mxu1 %vm675_vm2, %v3148_v56 }
 0xb89   : > { %v3085_v15 = vpop.f32.mrf.mxu0  ;;  %v3098_v7 = vpop.f32.mrf.mxu1 }
 0xb8a   : > { %v3099_v32 = vadd.f32 %v3098_v7, %v3085_v15 }
 0xb8c   : > { %v3970_v48 = vmul.f32 %v3099_v32, %v8531_v62 }
 0xb8d   : > { %v3149_v53 = vpop.trf.xlu2 }
 0xb8e   : > { %v7455_v40 = vadd.f32 %v7394_v59, %v3970_v48 }
 0xb90   : > { %8552 = vst [vmem:[#allocation49_spill] sm:$0xff] %v7455_v40 }
 0xb91   : > { %v3087_v34 = vpop.f32.mrf.mxu0  ;;  %v3100_v46 = vpop.f32.mrf.mxu1 }
 0xb95   : > { %v3150_v43 = vpop.trf.xlu2 }
 0xb96   : > { %4323 = vmatmul.msk.bf16.gmra.mxu0 %vm675_vm2, %v3150_v43  ;;  %4339 = vmatmul.msk.bf16.gmra.mxu1 %vm675_vm2, %v3150_v43 }
 0xb9d   : > { %v3151_v16 = vpop.trf.xlu2 }
 0xba5   : > { %v3152_v19 = vpop.trf.xlu2 }
 0xba6   : > { %4324 = vmatmul.msk.bf16.gmra.mxu0 %vm675_vm2, %v3152_v19  ;;  %4340 = vmatmul.msk.bf16.gmra.mxu1 %vm675_vm2, %v3152_v19 }
 0xbad   : > { %v3153_v3 = vpop.trf.xlu2 }
 0xbb5   : > { %v3154_v54 = vpop.trf.xlu2 }
 0xbb6   : > { %4325 = vmatmul.msk.bf16.gmra.mxu0 %vm675_vm2, %v3154_v54  ;;  %4341 = vmatmul.msk.bf16.gmra.mxu1 %vm675_vm2, %v3154_v54 }
 0xbbd   : > { %v3155_v59 = vpop.trf.xlu2 }
 0xbc5   : > { %v3156_v10 = vpop.trf.xlu2 }
 0xbc6   : > { %4326 = vmatmul.msk.bf16.gmra.mxu0 %vm675_vm2, %v3156_v10  ;;  %4342 = vmatmul.msk.bf16.gmra.mxu1 %vm675_vm2, %v3156_v10 }
 0xbc9   : > { %v3111_v29 = vpop.f32.mrf.mxu0  ;;  %v3124_v41 = vpop.f32.mrf.mxu1 }
 0xbca   : > { %v3125_v8 = vadd.f32 %v3124_v41, %v3111_v29 }
 0xbcc   : > { %v3971_v21 = vmul.f32 %v3125_v8, %v8532_v61 }
 0xbcd   : > { %v3157_v27 = vpop.trf.xlu2 }
 0xbce   : > { %v7467_v33 = vadd.f32 %v7397_v14, %v3971_v21 }
 0xbd0   : > { %8553 = vst [vmem:[#allocation47_spill] sm:$0xff] %v7467_v33 }
 0xbd1   : > { %v3113_v11 = vpop.f32.mrf.mxu0  ;;  %v3126_v26 = vpop.f32.mrf.mxu1 }
 0xbd5   : > { %v3158_v9 = vpop.trf.xlu2 }
 0xbd6   : > { %4327 = vmatmul.msk.bf16.gmra.mxu0 %vm675_vm2, %v3158_v9  ;;  %4343 = vmatmul.msk.bf16.gmra.mxu1 %vm675_vm2, %v3158_v9 }
 0xbdd   : > { %v3159_v15 = vpop.trf.xlu2 }
 0xbe3   : > { %v7471_v6 = vpop.f32.mrf.mxu0  ;;  %v7473_v39 = vpop.f32.mrf.mxu1 }
 0xbe4   : > { %8554 = vst [vmem:[#allocation15_spill] sm:$0xff] %v7471_v6  ;;  %v3392_v43 = vmax.f32 %v7471_v6, %v7473_v39 }
 0xbe5   : > { %8555 = vst [vmem:[#allocation16_spill] sm:$0xff] %v7473_v39 }
 0xbe6   : > { %4328 = vmatmul.msk.bf16.gmra.mxu0 %vm675_vm2, %v3145_v55  ;;  %4344 = vmatmul.msk.bf16.gmra.mxu1 %vm675_vm2, %v3145_v55 }
 0xbeb   : > { %v7477_v49 = vpop.f32.mrf.mxu0  ;;  %v7479_v14 = vpop.f32.mrf.mxu1 }
 0xbf3   : > { %v7481_v12 = vpop.f32.mrf.mxu0  ;;  %v7483_v28 = vpop.f32.mrf.mxu1 }
 0xbf4   : > { %v3398_v48 = vmax.f32 %v7481_v12, %v7483_v28 }
 0xbf6   : > { %4329 = vmatmul.msk.bf16.gmra.mxu0 %vm675_vm2, %v3147_v25  ;;  %4345 = vmatmul.msk.bf16.gmra.mxu1 %vm675_vm2, %v3147_v25 }
 0xbfb   : > { %v7487_v60 = vpop.f32.mrf.mxu0  ;;  %v7489_v58 = vpop.f32.mrf.mxu1 }
 0xbfc   : > { %8556 = vst [vmem:[#allocation50_spill] sm:$0xff] %v7487_v60 }
 0xbfd   : > { %8557 = vst [vmem:[#allocation48_spill] sm:$0xff] %v7489_v58 }
 0xc03   : > { %v7491_v38 = vpop.f32.mrf.mxu0  ;;  %v7493_v57 = vpop.f32.mrf.mxu1 }
 0xc04   : > { %v3404_v25 = vmax.f32 %v7491_v38, %v7493_v57 }
 0xc06   : > { %4330 = vmatmul.msk.bf16.gmra.mxu0 %vm675_vm2, %v3149_v53  ;;  %4346 = vmatmul.msk.bf16.gmra.mxu1 %vm675_vm2, %v3149_v53 }
 0xc0b   : > { %v7497_v18 = vpop.f32.mrf.mxu0  ;;  %v7499_v52 = vpop.f32.mrf.mxu1 }
 0xc0c   : > { %8558 = vst [vmem:[#allocation9_spill] sm:$0xff] %v7497_v18  ;;  %v3407_v53 = vmax.f32 %v7497_v18, %v7499_v52 }
 0xc0d   : > { %8559 = vst [vmem:[#allocation10_spill] sm:$0xff] %v7499_v52 }
 0xc13   : > { %v7501_v23 = vpop.f32.mrf.mxu0  ;;  %v7503_v50 = vpop.f32.mrf.mxu1 }
 0xc14   : > { %v3410_v1 = vmax.f32 %v7501_v23, %v7503_v50 }
 0xc16   : > { %4331 = vmatmul.msk.bf16.gmra.mxu0 %vm675_vm2, %v3151_v16  ;;  %4347 = vmatmul.msk.bf16.gmra.mxu1 %vm675_vm2, %v3151_v16  ;;  %v3401_v16 = vmax.f32 %v7487_v60, %v7489_v58 }
 0xc1b   : > { %v7507_v44 = vpop.f32.mrf.mxu0  ;;  %v7509_v22 = vpop.f32.mrf.mxu1 }
 0xc1c   : > { %v3413_v56 = vmax.f32 %v7507_v44, %v7509_v22 }
 0xc23   : > { %v7511_v4 = vpop.f32.mrf.mxu0  ;;  %v7513_v30 = vpop.f32.mrf.mxu1 }
 0xc24   : > { %v3416_v42 = vmax.f32 %v7511_v4, %v7513_v30 }
 0xc26   : > { %4332 = vmatmul.msk.bf16.gmra.mxu0 %vm675_vm2, %v3153_v3  ;;  %4348 = vmatmul.msk.bf16.gmra.mxu1 %vm675_vm2, %v3153_v3 }
 0xc2b   : > { %v7517_v47 = vpop.f32.mrf.mxu0  ;;  %v7519_v51 = vpop.f32.mrf.mxu1 }
 0xc2c   : > { %v3419_v31 = vmax.f32 %v7517_v47, %v7519_v51 }
 0xc33   : > { %v7521_v0 = vpop.f32.mrf.mxu0  ;;  %v7523_v13 = vpop.f32.mrf.mxu1 }
 0xc34   : > { %v3422_v20 = vmax.f32 %v7521_v0, %v7523_v13 }
 0xc36   : > { %4333 = vmatmul.msk.bf16.gmra.mxu0 %vm675_vm2, %v3155_v59  ;;  %4349 = vmatmul.msk.bf16.gmra.mxu1 %vm675_vm2, %v3155_v59  ;;  %v3395_v59 = vmax.f32 %v7477_v49, %v7479_v14 }
 0xc37   : > { %3423 = vmax.xlane.f32.xlu1 %v3422_v20 }
 0xc3b   : > { %v7529_v2 = vpop.f32.mrf.mxu0  ;;  %v7531_v17 = vpop.f32.mrf.mxu1 }
 0xc3c   : > { %v3425_v35 = vmax.f32 %v7529_v2, %v7531_v17 }
 0xc3e   : > { %3426 = vmax.xlane.f32.xlu0 %v3425_v35 }
 0xc3f   : > { %3417 = vmax.xlane.f32.xlu1 %v3416_v42 }
 0xc43   : > { %v7537_v63 = vpop.f32.mrf.mxu0  ;;  %v7539_v45 = vpop.f32.mrf.mxu1 }
 0xc44   : > { %v3428_v5 = vmax.f32 %v7537_v63, %v7539_v45 }
 0xc46   : > { %4334 = vmatmul.msk.bf16.gmra.mxu0 %vm675_vm2, %v3157_v27  ;;  %4350 = vmatmul.msk.bf16.gmra.mxu1 %vm675_vm2, %v3157_v27 }
 0xc47   : > { %3411 = vmax.xlane.f32.xlu1 %v3410_v1  ;;  %3420 = vmax.xlane.f32.xlu0 %v3419_v31 }
 0xc48   : > { %3429 = vmax.xlane.f32.xlu2 %v3428_v5 }
 0xc4b   : > { %v7549_v55 = vpop.f32.mrf.mxu0  ;;  %v7551_v24 = vpop.f32.mrf.mxu1 }
 0xc4c   : > { %v3431_v8 = vmax.f32 %v7549_v55, %v7551_v24 }
 0xc4f   : > { %3405 = vmax.xlane.f32.xlu1 %v3404_v25  ;;  %3414 = vmax.xlane.f32.xlu0 %v3413_v56 }
 0xc53   : > { %v7557_v7 = vpop.f32.mrf.mxu0  ;;  %v7559_v32 = vpop.f32.mrf.mxu1 }
 0xc54   : > { %v3434_v27 = vmax.f32 %v7557_v7, %v7559_v32 }
 0xc56   : > { %4335 = vmatmul.msk.bf16.gmra.mxu0 %vm675_vm2, %v3159_v15  ;;  %4351 = vmatmul.msk.bf16.gmra.mxu1 %vm675_vm2, %v3159_v15 }
 0xc57   : > { %3399 = vmax.xlane.f32.xlu1 %v3398_v48  ;;  %3408 = vmax.xlane.f32.xlu0 %v3407_v53 }
 0xc5b   : > { %v7567_v34 = vpop.f32.mrf.mxu0  ;;  %v7569_v46 = vpop.f32.mrf.mxu1 }
 0xc5c   : > { %v3437_v19 = vmax.f32 %v7567_v34, %v7569_v46 }
 0xc5f   : > { %3393 = vmax.xlane.f32.xlu1 %v3392_v43  ;;  %3402 = vmax.xlane.f32.xlu0 %v3401_v16 }
 0xc63   : > { %v7577_v3 = vpop.f32.mrf.mxu0  ;;  %v7579_v54 = vpop.f32.mrf.mxu1 }
 0xc64   : > { %v3440_v10 = vmax.f32 %v7577_v3, %v7579_v54 }
 0xc67   : > { %3396 = vmax.xlane.f32.xlu0 %v3395_v59  ;;  %3438 = vmax.xlane.f32.xlu1 %v3437_v19 }
 0xc6b   : > { %v7583_v29 = vpop.f32.mrf.mxu0  ;;  %v7585_v41 = vpop.f32.mrf.mxu1 }
 0xc6f   : > { %3432 = vmax.xlane.f32.xlu0 %v3431_v8  ;;  %3441 = vmax.xlane.f32.xlu1 %v3440_v10 }
 0xc73   : > { %v7591_v21 = vpop.f32.mrf.mxu0  ;;  %v7593_v11 = vpop.f32.mrf.mxu1 }
 0xc74   : > { %v3446_v26 = vmax.f32 %v7591_v21, %v7593_v11 }
 0xc77   : > { %3435 = vmax.xlane.f32.xlu0 %v3434_v27  ;;  %3447 = vmax.xlane.f32.xlu1 %v3446_v26 }
 0xc7b   : > { %v7599_v9 = vpop.f32.mrf.mxu0  ;;  %v7601_v20 = vpop.f32.mrf.mxu1 }
 0xc7c   : > { %8560 = vst [vmem:[#allocation44_spill] sm:$0xff] %v7599_v9  ;;  %v3449_v35 = vmax.f32 %v7599_v9, %v7601_v20 }
 0xc7d   : > { %8561 = vst [vmem:[#allocation28_spill] sm:$0xff] %v7601_v20 }
 0xc7f   : > { %3450 = vmax.xlane.f32.xlu0 %v3449_v35 }
 0xc83   : > { %v7605_v42 = vpop.f32.mrf.mxu0  ;;  %v7607_v5 = vpop.f32.mrf.mxu1 }
 0xc84   : > { %8562 = vst [vmem:[#allocation43_spill] sm:$0xff] %v7605_v42  ;;  %v3452_v1 = vmax.f32 %v7605_v42, %v7607_v5 }
 0xc85   : > { %8563 = vst [vmem:[#allocation42_spill] sm:$0xff] %v7607_v5 }
 0xc86   : > { %3453 = vmax.xlane.f32.xlu1 %v3452_v1 }
 0xc8b   : > { %v7611_v31 = vpop.f32.mrf.mxu0  ;;  %v7613_v25 = vpop.f32.mrf.mxu1 }
 0xc8c   : > { %8564 = vst [vmem:[#allocation27_spill] sm:$0xff] %v7611_v31  ;;  %v3455_v56 = vmax.f32 %v7611_v31, %v7613_v25 }
 0xc8d   : > { %8565 = vst [vmem:[#allocation40_spill] sm:$0xff] %v7613_v25 }
 0xc8e   : > { %3456 = vmax.xlane.f32.xlu0 %v3455_v56 }
 0xc93   : > { %v7617_v15 = vpop.f32.mrf.mxu0  ;;  %v7619_v48 = vpop.f32.mrf.mxu1 }
 0xc94   : > { %v3458_v53 = vmax.f32 %v7617_v15, %v7619_v48 }
 0xc96   : > { %3459 = vmax.xlane.f32.xlu1 %v3458_v53 }
 0xc9b   : > { %v7623_v43 = vpop.f32.mrf.mxu0  ;;  %v7625_v16 = vpop.f32.mrf.mxu1 }
 0xc9c   : > { %8566 = vst [vmem:[#allocation37_spill] sm:$0xff] %v7623_v43  ;;  %v3461_v19 = vmax.f32 %v7623_v43, %v7625_v16 }
 0xc9d   : > { %8567 = vst [vmem:[#allocation34_spill] sm:$0xff] %v7625_v16 }
 0xc9e   : > { %3462 = vmax.xlane.f32.xlu0 %v3461_v19 }
 0xca3   : > { %v7629_v59 = vpop.f32.mrf.mxu0  ;;  %v7631_v8 = vpop.f32.mrf.mxu1 }
 0xca4   : > { %v3464_v10 = vmax.f32 %v7629_v59, %v7631_v8 }
 0xca6   : > { %3465 = vmax.xlane.f32.xlu1 %v3464_v10 }
 0xcaa   : > { %v3424_v26 = vpop.xlane.xlu1 %3423 }
 0xcab   : > { %v3508_v27 = vsub.f32 %v7521_v0, %v3424_v26  ;;  %v3509_v35 = vsub.f32 %v7523_v13, %v3424_v26  ;;  %v7637_v1 = vpop.f32.mrf.mxu0  ;;  %v7639_v56 = vpop.f32.mrf.mxu1 }
 0xcac   : > { %8568 = vst [vmem:[#allocation35_spill] sm:$0xff] %v7637_v1  ;;  %v3467_v53 = vmax.f32 %v7637_v1, %v7639_v56 }
 0xcad   : > { %8569 = vst [vmem:[#allocation41_spill] sm:$0xff] %v7639_v56  ;;  %v3592_v19 = vmul.f32 1.442695, %v3508_v27  ;;  %v3594_v33 = vmul.f32 1.442695, %v3509_v35 }
 0xcae   : > { %3468 = vmax.xlane.f32.xlu0 %v3467_v53 }
 0xcaf   : > { %4990 = vpow2.f32 %v3592_v19 }
 0xcb0   : > { %4992 = vpow2.f32 %v3594_v33 }
 0xcb1   : > { %v3427_v61 = vpop.xlane.xlu0 %3426 }
 0xcb2   : > { %v7643_v40 = vpop.xlane.xlu1 %3417  ;;  %v3510_v10 = vsub.f32 %v7529_v2, %v3427_v61  ;;  %v3511_v26 = vsub.f32 %v7531_v17, %v3427_v61 }
 0xcb3   : > { %v7646_v0 = vpop.f32.mrf.mxu0  ;;  %v7648_v13 = vpop.f32.mrf.mxu1 }
 0xcb4   : > { %v3470_v62 = vmax.f32 %v7646_v0, %v7648_v13  ;;  %v3596_v27 = vmul.f32 1.442695, %v3510_v10  ;;  %v3598_v35 = vmul.f32 1.442695, %v3511_v26 }
 0xcb5   : > { %v7653_v53 = vpop.eup %4990 }
 0xcb6   : > { %3471 = vmax.xlane.f32.xlu1 %v3470_v62  ;;  %v7655_v19 = vpop.eup %4992  ;;  %4994 = vpow2.f32 %v3596_v27 }
 0xcb7   : > { %4996 = vpow2.f32 %v3598_v35  ;;  %v3710_v10 = vadd.f32 %v7655_v19, %v7653_v53 }
 0xcba   : > { %v7657_v36 = vpop.xlane.xlu1 %3411  ;;  %v7659_v33 = vpop.xlane.xlu0 %3420 }
 0xcbb   : > { %v3430_v2 = vpop.xlane.xlu2 %3429  ;;  %v7661_v37 = vpop.f32.mrf.mxu0 }
 0xcbc   : > { %v3512_v61 = vsub.f32 %v7537_v63, %v3430_v2  ;;  %v3513_v17 = vsub.f32 %v7539_v45, %v3430_v2  ;;  %v7665_v62 = vpop.f32.mrf.mxu1  ;;  %v7671_v9 = vpop.eup %4994 }
 0xcbd   : > { %v3473_v26 = vmax.f32 %v7661_v37, %v7665_v62  ;;  %v7673_v5 = vpop.eup %4996 }
 0xcbe   : > { %3711 = vadd.xlane.f32.xlu1 %v3710_v10  ;;  %v3600_v20 = vmul.f32 1.442695, %v3512_v61  ;;  %v3602_v27 = vmul.f32 1.442695, %v3513_v17  ;;  %v3713_v61 = vadd.f32 %v7673_v5, %v7671_v9 }
 0xcbf   : > { %3474 = vmax.xlane.f32.xlu0 %v3473_v26 }
 0xcc0   : > { %4998 = vpow2.f32 %v3600_v20 }
 0xcc1   : > { %5000 = vpow2.f32 %v3602_v27 }
 0xcc2   : > { %v7675_v35 = vpop.xlane.xlu1 %3405  ;;  %v7677_v63 = vpop.xlane.xlu0 %3414 }
 0xcc3   : > { %v7679_v45 = vpop.f32.mrf.mxu0 }
 0xcc4   : > { %v7681_v2 = vpop.f32.mrf.mxu1 }
 0xcc5   : > { %v3476_v10 = vmax.f32 %v7679_v45, %v7681_v2 }
 0xcc6   : > { %v7687_v17 = vpop.eup %4998 }
 0xcc7   : > { %3714 = vadd.xlane.f32.xlu0 %v3713_v61  ;;  %3477 = vmax.xlane.f32.xlu1 %v3476_v10  ;;  %8570 = vst [vmem:[#allocation45_spill] sm:$0xff] %v7687_v17  ;;  %v7689_v26 = vpop.eup %5000 }
 0xcc8   : > { %8571 = vst [vmem:[#allocation46_spill] sm:$0xff] %v7689_v26  ;;  %v3716_v58 = vadd.f32 %v7689_v26, %v7687_v17 }
 0xcca   : > { %v7691_v42 = vpop.xlane.xlu1 %3399  ;;  %v7693_v20 = vpop.xlane.xlu0 %3408 }
 0xccb   : > { %8572 = vst [vmem:[#allocation38_spill] sm:$0xff] %v7693_v20  ;;  %v7695_v16 = vpop.f32.mrf.mxu0 }
 0xccc   : > { %v7697_v27 = vpop.f32.mrf.mxu1 }
 0xccd   : > { %v3479_v43 = vmax.f32 %v7695_v16, %v7697_v27 }
 0xccf   : > { %3717 = vadd.xlane.f32.xlu1 %v3716_v58  ;;  %3480 = vmax.xlane.f32.xlu0 %v3479_v43 }
 0xcd2   : > { %v7703_v10 = vpop.xlane.xlu1 %3393  ;;  %v7705_v61 = vpop.xlane.xlu0 %3402 }
 0xcd3   : > { %8573 = vst [vmem:[#allocation7_spill] sm:$0xff] %v7703_v10  ;;  %v7707_v60 = vpop.f32.mrf.mxu0 }
 0xcd4   : > { %8574 = vst [vmem:[#allocation8_spill] sm:$0xff] %v7705_v61  ;;  %v7709_v56 = vpop.f32.mrf.mxu1 }
 0xcd5   : > { %v3482_v1 = vmax.f32 %v7707_v60, %v7709_v56 }
 0xcd7   : > { %3483 = vmax.xlane.f32.xlu1 %v3482_v1 }
 0xcda   : > { %v3397_v52 = vpop.xlane.xlu0 %3396  ;;  %v7713_v18 = vpop.xlane.xlu1 %3438 }
 0xcdb   : > { %v3490_v20 = vsub.f32 %v7477_v49, %v3397_v52  ;;  %v3491_v58 = vsub.f32 %v7479_v14, %v3397_v52 }
 0xcdd   : > { %v3556_v43 = vmul.f32 1.442695, %v3490_v20  ;;  %v3558_v26 = vmul.f32 1.442695, %v3491_v58 }
 0xcdf   : > { %5002 = vpow2.f32 %v3556_v43 }
 0xce0   : > { %5004 = vpow2.f32 %v3558_v26 }
 0xce2   : > { %v3433_v17 = vpop.xlane.xlu0 %3432  ;;  %v3442_v61 = vpop.xlane.xlu1 %3441 }
 0xce3   : > { %v3514_v25 = vsub.f32 %v7549_v55, %v3433_v17  ;;  %v3515_v31 = vsub.f32 %v7551_v24, %v3433_v17 }
 0xce5   : > { %v7719_v39 = vpop.eup %5002  ;;  %v3604_v1 = vmul.f32 1.442695, %v3514_v25  ;;  %v3606_v6 = vmul.f32 1.442695, %v3515_v31  ;;  %v3504_v31 = vsub.f32 %v7511_v4, %v7643_v40 }
 0xce6   : > { %v7721_v10 = vpop.eup %5004 }
 0xce7   : > { %5006 = vpow2.f32 %v3604_v1  ;;  %v3683_v49 = vadd.f32 %v7721_v10, %v7719_v39  ;;  %v3505_v1 = vsub.f32 %v7513_v30, %v7643_v40  ;;  %v3501_v40 = vsub.f32 %v7503_v50, %v7657_v36 }
 0xce8   : > { %5008 = vpow2.f32 %v3606_v6 }
 0xce9   : > { %3684 = vadd.xlane.f32.xlu2 %v3683_v49  ;;  %v3584_v49 = vmul.f32 1.442695, %v3504_v31  ;;  %v3586_v4 = vmul.f32 1.442695, %v3505_v1 }
 0xcea   : > { %v3436_v14 = vpop.xlane.xlu0 %3435  ;;  %v3448_v52 = vpop.xlane.xlu1 %3447 }
 0xceb   : > { %v3516_v26 = vsub.f32 %v7557_v7, %v3436_v14  ;;  %v3517_v55 = vsub.f32 %v7559_v32, %v3436_v14  ;;  %v3524_v24 = vsub.f32 %v7591_v21, %v3448_v52  ;;  %v3525_v17 = vsub.f32 %v7593_v11, %v3448_v52 }
 0xcec   : > { %v3520_v32 = vsub.f32 %v7577_v3, %v3442_v61  ;;  %v3521_v11 = vsub.f32 %v7579_v54, %v3442_v61  ;;  %v3500_v14 = vsub.f32 %v7501_v23, %v7657_v36  ;;  %v7745_v3 = vpop.f32.mrf.mxu0  ;;  %v3506_v54 = vsub.f32 %v7517_v47, %v7659_v33 }
 0xced   : > { %v7729_v25 = vpop.eup %5006  ;;  %v3608_v20 = vmul.f32 1.442695, %v3516_v26  ;;  %v3610_v58 = vmul.f32 1.442695, %v3517_v55  ;;  %v3624_v43 = vmul.f32 1.442695, %v3524_v24  ;;  %v7747_v26 = vpop.f32.mrf.mxu1  ;;  %v3507_v23 = vsub.f32 %v7519_v51, %v7659_v33 }
 0xcee   : > { %v7733_v6 = vpop.eup %5008  ;;  %v3626_v7 = vmul.f32 1.442695, %v3525_v17  ;;  %v3616_v52 = vmul.f32 1.442695, %v3520_v32  ;;  %v3618_v30 = vmul.f32 1.442695, %v3521_v11  ;;  %v3485_v50 = vmax.f32 %v7745_v3, %v7747_v26 }
 0xcef   : > { %5010 = vpow2.f32 %v3608_v20  ;;  %v3719_v21 = vadd.f32 %v7733_v6, %v7729_v25  ;;  %v3576_v36 = vmul.f32 1.442695, %v3500_v14  ;;  %v3578_v20 = vmul.f32 1.442695, %v3501_v40 }
 0xcf0   : > { %5012 = vpow2.f32 %v3610_v58  ;;  %v3588_v47 = vmul.f32 1.442695, %v3506_v54  ;;  %v3590_v51 = vmul.f32 1.442695, %v3507_v23  ;;  %v3518_v54 = vsub.f32 %v7567_v34, %v7713_v18 }
 0xcf1   : > { %5014 = vpow2.f32 %v3624_v43  ;;  %3720 = vadd.xlane.f32.xlu0 %v3719_v21  ;;  %v3496_v43 = vsub.f32 %v7491_v38, %v7675_v35  ;;  %v3502_v21 = vsub.f32 %v7507_v44, %v7677_v63  ;;  %v3443_v38 = vmax.f32 %v7583_v29, %v7585_v41 }
 0xcf2   : > { %5016 = vpow2.f32 %v3626_v7  ;;  %v3497_v7 = vsub.f32 %v7493_v57, %v7675_v35  ;;  %v3519_v23 = vsub.f32 %v7569_v46, %v7713_v18 }
 0xcf3   : > { %5018 = vpow2.f32 %v3584_v49  ;;  %v3503_v49 = vsub.f32 %v7509_v22, %v7677_v63 }
 0xcf4   : > { %5020 = vpow2.f32 %v3586_v4  ;;  %v3568_v4 = vmul.f32 1.442695, %v3496_v43  ;;  %v3570_v57 = vmul.f32 1.442695, %v3497_v7  ;;  %v7819_v7 = vpop.xlane.xlu0 %3450 }
 0xcf5   : > { %v7749_v55 = vpop.eup %5010  ;;  %5022 = vpow2.f32 %v3616_v52  ;;  %v3580_v52 = vmul.f32 1.442695, %v3502_v21 }
 0xcf6   : > { %v7753_v61 = vpop.eup %5012  ;;  %5024 = vpow2.f32 %v3618_v30  ;;  %v3582_v30 = vmul.f32 1.442695, %v3503_v49 }
 0xcf7   : > { %v7757_v24 = vpop.eup %5014  ;;  %v3722_v17 = vadd.f32 %v7753_v61, %v7749_v55  ;;  %5026 = vpow2.f32 %v3576_v36 }
 0xcf8   : > { %8575 = vst [vmem:[#allocation5_spill] sm:$0xff] %v7757_v24  ;;  %v7763_v31 = vpop.eup %5016  ;;  %5028 = vpow2.f32 %v3578_v20  ;;  %v3612_v20 = vmul.f32 1.442695, %v3518_v54 }
 0xcf9   : > { %8576 = vst [vmem:[#allocation6_spill] sm:$0xff] %v7763_v31  ;;  %v3734_v58 = vadd.f32 %v7763_v31, %v7757_v24  ;;  %3723 = vadd.xlane.f32.xlu1 %v3722_v17  ;;  %3486 = vmax.xlane.f32.xlu0 %v3485_v50  ;;  %v7767_v33 = vpop.eup %5018  ;;  %5030 = vpow2.f32 %v3588_v47  ;;  %v7817_v43 = vpop.xlane.xlu1 %3453 }
 0xcfa   : > { %v7771_v1 = vpop.eup %5020  ;;  %5032 = vpow2.f32 %v3590_v51 }
 0xcfb   : > { %3735 = vadd.xlane.f32.xlu2 %v3734_v58  ;;  %v7775_v32 = vpop.eup %5022  ;;  %v3704_v14 = vadd.f32 %v7771_v1, %v7767_v33  ;;  %5034 = vpow2.f32 %v3568_v4  ;;  %v3614_v58 = vmul.f32 1.442695, %v3519_v23  ;;  %v4002_v4 = vld [vmem:[%s8196_s5] sm:$0xff] }
 0xcfc   : > { %8577 = vst [vmem:[#allocation39_spill] sm:$0xff] %v7775_v32  ;;  %v7779_v11 = vpop.eup %5024  ;;  %5036 = vpow2.f32 %v3570_v57 }
 0xcfd   : > { %8578 = vst [vmem:[#allocation23_spill] sm:$0xff] %v7779_v11  ;;  %v7787_v35 = vpop.eup %5026  ;;  %v3728_v44 = vadd.f32 %v7779_v11, %v7775_v32  ;;  %5038 = vpow2.f32 %v3580_v52 }
 0xcfe   : > { %v7791_v40 = vpop.eup %5028  ;;  %5040 = vpow2.f32 %v3582_v30 }
 0xcff   : > { %v7793_v22 = vpop.eup %5030  ;;  %v3698_v36 = vadd.f32 %v7791_v40, %v7787_v35  ;;  %5042 = vpow2.f32 %v3612_v20 }
 0xd00   : > { %v7795_v63 = vpop.eup %5032  ;;  %5044 = vpow2.f32 %v3614_v58 }
 0xd01   : > { %3705 = vadd.xlane.f32.xlu1 %v3704_v14  ;;  %3444 = vmax.xlane.f32.xlu0 %v3443_v38  ;;  %v3707_v50 = vadd.f32 %v7795_v63, %v7793_v22  ;;  %v7805_v17 = vpop.eup %5034  ;;  %v7832_v57 = vpop.xlane.xlu0 %3456 }
 0xd02   : > { %v7807_v47 = vpop.eup %5036 }
 0xd03   : > { %3729 = vadd.xlane.f32.xlu2 %v3728_v44  ;;  %v7809_v51 = vpop.eup %5038  ;;  %v3692_v18 = vadd.f32 %v7807_v47, %v7805_v17 }
 0xd04   : > { %v7811_v34 = vpop.eup %5040 }
 0xd05   : > { %v3701_v46 = vadd.f32 %v7811_v34, %v7809_v51  ;;  %v7821_v21 = vpop.eup %5042 }
 0xd06   : > { %v7823_v49 = vpop.eup %5044 }
 0xd07   : > { %v3725_v38 = vadd.f32 %v7823_v49, %v7821_v21 }
 0xd09   : > { %3699 = vadd.xlane.f32.xlu1 %v3698_v36  ;;  %3708 = vadd.xlane.f32.xlu0 %v3707_v50  ;;  %v7830_v14 = vpop.xlane.xlu1 %3459 }
 0xd11   : > { %3693 = vadd.xlane.f32.xlu1 %v3692_v18  ;;  %3702 = vadd.xlane.f32.xlu0 %v3701_v46  ;;  %v7836_v44 = vpop.xlane.xlu0 %3462 }
 0xd19   : > { %3726 = vadd.xlane.f32.xlu0 %v3725_v38  ;;  %v7834_v52 = vpop.xlane.xlu1 %3465 }
 0xd1b   : > { %4008 = vperm.xlu2 %4397, %v4002_v4  }
 0xd21   : > { %v7838_v54 = vpop.xlane.xlu0 %3468 }
 0xd29   : > { %v3472_v30 = vpop.xlane.xlu1 %3471 }
 0xd2a   : > { %v3540_v23 = vsub.f32 %v7646_v0, %v3472_v30  ;;  %v3541_v36 = vsub.f32 %v7648_v13, %v3472_v30 }
 0xd2c   : > { %v3656_v50 = vmul.f32 1.442695, %v3540_v23  ;;  %v3658_v20 = vmul.f32 1.442695, %v3541_v36 }
 0xd2e   : > { %5046 = vpow2.f32 %v3656_v50 }
 0xd2f   : > { %5048 = vpow2.f32 %v3658_v20 }
 0xd31   : > { %v3712_v58 = vpop.xlane.xlu1 %3711 }
 0xd32   : > { %v3475_v18 = vpop.xlane.xlu0 %3474 }
 0xd33   : > { %v3542_v46 = vsub.f32 %v7661_v37, %v3475_v18  ;;  %v3543_v38 = vsub.f32 %v7665_v62, %v3475_v18 }
 0xd34   : > { %v7844_v4 = vpop.eup %5046 }
 0xd35   : > { %v7846_v11 = vpop.eup %5048  ;;  %v3660_v32 = vmul.f32 1.442695, %v3542_v46  ;;  %v3662_v31 = vmul.f32 1.442695, %v3543_v38 }
 0xd36   : > { %v3758_v0 = vadd.f32 %v7846_v11, %v7844_v4 }
 0xd37   : > { %5050 = vpow2.f32 %v3660_v32 }
 0xd38   : > { %5052 = vpow2.f32 %v3662_v31  ;;  %3759 = vadd.xlane.f32.xlu1 %v3758_v0 }
 0xd39   : > { %5054 = vrcp.f32 %v3712_v58 }
 0xd3a   : > { %v3715_v13 = vpop.xlane.xlu0 %3714  ;;  %v3478_v30 = vpop.xlane.xlu1 %3477 }
 0xd3b   : > { %5056 = vrcp.f32 %v3715_v13  ;;  %v3544_v37 = vsub.f32 %v7679_v45, %v3478_v30  ;;  %v3545_v62 = vsub.f32 %v7681_v2, %v3478_v30 }
 0xd3d   : > { %v7852_v23 = vpop.eup %5050  ;;  %v3664_v36 = vmul.f32 1.442695, %v3544_v37  ;;  %v3666_v50 = vmul.f32 1.442695, %v3545_v62 }
 0xd3e   : > { %v7854_v20 = vpop.eup %5052 }
 0xd3f   : > { %v5055_v18 = vpop.eup %5054  ;;  %5058 = vpow2.f32 %v3664_v36  ;;  %v3761_v31 = vadd.f32 %v7854_v20, %v7852_v23 }
 0xd40   : > { %5060 = vpow2.f32 %v3666_v50  ;;  %v7861_v45 = vmul.f32 %v5055_v18, %v7653_v53  ;;  %v7867_v38 = vmul.f32 %v5055_v18, %v7655_v19 }
 0xd41   : > { %v5057_v32 = vpop.eup %5056  ;;  %3762 = vadd.xlane.f32.xlu0 %v3761_v31  ;;  %v3536_v31 = vsub.f32 %v7629_v59, %v7834_v52  ;;  %v3492_v59 = vsub.f32 %v7481_v12, %v7691_v42  ;;  %v3532_v12 = vsub.f32 %v7617_v15, %v7830_v14  ;;  %v8584_v15 = vld [vmem:[#allocation16_spill] sm:$0xff] }
 0xd42   : > { %v7858_v58 = vpop.xlane.xlu1 %3717  ;;  %v3481_v46 = vpop.xlane.xlu0 %3480  ;;  %v7864_v2 = vmul.f32 %v5057_v32, %v7671_v9  ;;  %v7870_v0 = vmul.f32 %v5057_v32, %v7673_v5 }
 0xd43   : > { %v3546_v13 = vsub.f32 %v7695_v16, %v3481_v46  ;;  %v3547_v30 = vsub.f32 %v7697_v27, %v3481_v46 }
 0xd45   : > { %v7878_v62 = vpop.eup %5058  ;;  %v3668_v9 = vmul.f32 1.442695, %v3546_v13  ;;  %v3670_v36 = vmul.f32 1.442695, %v3547_v30  ;;  %v3537_v30 = vsub.f32 %v7631_v8, %v7834_v52  ;;  %v3560_v52 = vmul.f32 1.442695, %v3492_v59 }
 0xd46   : > { %v7880_v50 = vpop.eup %5060  ;;  %v8583_v59 = vld [vmem:[#allocation15_spill] sm:$0xff] }
 0xd47   : > { %8579 = vst [vmem:[#allocation24_spill] sm:$0xff] %v7880_v50  ;;  %5062 = vpow2.f32 %v3668_v9  ;;  %v3764_v5 = vadd.f32 %v7880_v50, %v7878_v62  ;;  %v8604_v50 = vld [vmem:[#allocation42_spill] sm:$0xff] }
 0xd48   : > { %5064 = vpow2.f32 %v3670_v36 }
 0xd49   : > { %3765 = vadd.xlane.f32.xlu1 %v3764_v5 }
 0xd4a   : > { %v3484_v16 = vpop.xlane.xlu1 %3483 }
 0xd4b   : > { %v3548_v19 = vsub.f32 %v7707_v60, %v3484_v16  ;;  %v3549_v27 = vsub.f32 %v7709_v56, %v3484_v16  ;;  %v3648_v60 = vmul.f32 1.442695, %v3536_v31  ;;  %v3650_v56 = vmul.f32 1.442695, %v3537_v30 }
 0xd4c   : > { %v3493_v16 = vsub.f32 %v7483_v28, %v7691_v42  ;;  %v3640_v42 = vmul.f32 1.442695, %v3532_v12 }
 0xd4d   : > { %v7886_v18 = vpop.eup %5062  ;;  %v3672_v32 = vmul.f32 1.442695, %v3548_v19  ;;  %v3674_v46 = vmul.f32 1.442695, %v3549_v27 }
 0xd4e   : > { %v7890_v13 = vpop.eup %5064  ;;  %v3562_v19 = vmul.f32 1.442695, %v3493_v16 }
 0xd4f   : > { %5066 = vpow2.f32 %v3672_v32  ;;  %v3767_v9 = vadd.f32 %v7890_v13, %v7886_v18  ;;  %v3533_v32 = vsub.f32 %v7619_v48, %v7830_v14 }
 0xd50   : > { %5068 = vpow2.f32 %v3674_v46 }
 0xd51   : > { %3768 = vadd.xlane.f32.xlu0 %v3767_v9  ;;  %5070 = vpow2.f32 %v3648_v60  ;;  %v3642_v46 = vmul.f32 1.442695, %v3533_v32 }
 0xd52   : > { %5072 = vpow2.f32 %v3650_v56  ;;  %v8582_v56 = vld [vmem:[#allocation7_spill] sm:$0xff] }
 0xd53   : > { %5074 = vpow2.f32 %v3560_v52  ;;  %v3488_v16 = vsub.f32 %v8583_v59, %v8582_v56 }
 0xd54   : > { %5076 = vpow2.f32 %v3562_v19 }
 0xd55   : > { %v7896_v36 = vpop.eup %5066  ;;  %5078 = vpow2.f32 %v3640_v42  ;;  %v3552_v14 = vmul.f32 1.442695, %v3488_v16  ;;  %v8589_v16 = vld [vmem:[#allocation38_spill] sm:$0xff] }
 0xd56   : > { %v7900_v5 = vpop.eup %5068  ;;  %5080 = vpow2.f32 %v3642_v46  ;;  %v8588_v46 = vld [vmem:[#allocation40_spill] sm:$0xff] }
 0xd57   : > { %v3770_v8 = vadd.f32 %v7900_v5, %v7896_v36  ;;  %v7906_v27 = vpop.eup %5070  ;;  %5082 = vpow2.f32 %v3552_v14  ;;  %v8591_v14 = vld [vmem:[#allocation10_spill] sm:$0xff] }
 0xd58   : > { %8580 = vst [vmem:[#allocation36_spill] sm:$0xff] %v7906_v27  ;;  %v7908_v31 = vpop.eup %5072 }
 0xd59   : > { %3771 = vadd.xlane.f32.xlu1 %v3770_v8  ;;  %8581 = vst [vmem:[#allocation51_spill] sm:$0xff] %v7908_v31  ;;  %v3752_v28 = vadd.f32 %v7908_v31, %v7906_v27  ;;  %v7916_v30 = vpop.eup %5074  ;;  %v3489_v8 = vsub.f32 %v8584_v15, %v8582_v56  ;;  %v3531_v15 = vsub.f32 %v8588_v46, %v7832_v57 }
 0xd5a   : > { %v7918_v9 = vpop.eup %5076  ;;  %v3499_v31 = vsub.f32 %v8591_v14, %v8589_v16 }
 0xd5b   : > { %v3686_v48 = vadd.f32 %v7918_v9, %v7916_v30  ;;  %v3554_v52 = vmul.f32 1.442695, %v3489_v8  ;;  %v7928_v19 = vpop.eup %5078 }
 0xd5c   : > { %8585 = vst [vmem:[#allocation19_spill] sm:$0xff] %v7928_v19  ;;  %v7930_v12 = vpop.eup %5080 }
 0xd5d   : > { %8586 = vst [vmem:[#allocation20_spill] sm:$0xff] %v7930_v12  ;;  %5084 = vpow2.f32 %v3554_v52  ;;  %v3746_v24 = vadd.f32 %v7930_v12, %v7928_v19 }
 0xd61   : > { %3753 = vadd.xlane.f32.xlu1 %v3752_v28  ;;  %v8587_v28 = vld [vmem:[#allocation27_spill] sm:$0xff] }
 0xd62   : > { %v3530_v59 = vsub.f32 %v8587_v28, %v7832_v57 }
 0xd64   : > { %v7920_v60 = vpop.xlane.xlu0 %3720  ;;  %v3636_v28 = vmul.f32 1.442695, %v3530_v59 }
 0xd69   : > { %3687 = vadd.xlane.f32.xlu1 %v3686_v48  ;;  %v8590_v48 = vld [vmem:[#allocation9_spill] sm:$0xff] }
 0xd6a   : > { %v3498_v8 = vsub.f32 %v8590_v48, %v8589_v16 }
 0xd6c   : > { %v3487_v32 = vpop.xlane.xlu0 %3486  ;;  %v3572_v52 = vmul.f32 1.442695, %v3498_v8 }
 0xd6d   : > { %v3550_v42 = vsub.f32 %v7745_v3, %v3487_v32  ;;  %v3551_v56 = vsub.f32 %v7747_v26, %v3487_v32  ;;  %v3638_v3 = vmul.f32 1.442695, %v3531_v15  ;;  %v7944_v26 = vpop.eup %5082  ;;  %v3574_v32 = vmul.f32 1.442695, %v3499_v31 }
 0xd6e   : > { %v7946_v57 = vpop.eup %5084 }
 0xd6f   : > { %v3676_v53 = vmul.f32 1.442695, %v3550_v42  ;;  %v3678_v37 = vmul.f32 1.442695, %v3551_v56  ;;  %v8592_v56 = vld [vmem:[#allocation35_spill] sm:$0xff] }
 0xd70   : > { %v3538_v59 = vsub.f32 %v8592_v56, %v7838_v54  ;;  %v8597_v56 = vld [vmem:[#allocation50_spill] sm:$0xff] }
 0xd71   : > { %5086 = vpow2.f32 %v3676_v53  ;;  %3747 = vadd.xlane.f32.xlu1 %v3746_v24  ;;  %v3680_v24 = vadd.f32 %v7946_v57, %v7944_v26  ;;  %v8593_v53 = vld [vmem:[#allocation41_spill] sm:$0xff] }
 0xd72   : > { %5088 = vpow2.f32 %v3678_v37  ;;  %v3539_v15 = vsub.f32 %v8593_v53, %v7838_v54  ;;  %v3652_v48 = vmul.f32 1.442695, %v3538_v59  ;;  %v8598_v53 = vld [vmem:[#allocation48_spill] sm:$0xff] }
 0xd73   : > { %5090 = vpow2.f32 %v3636_v28 }
 0xd74   : > { %v7948_v46 = vpop.xlane.xlu0 %3444  ;;  %5092 = vpow2.f32 %v3638_v3  ;;  %v3654_v14 = vmul.f32 1.442695, %v3539_v15 }
 0xd75   : > { %5094 = vpow2.f32 %v3572_v52 }
 0xd76   : > { %5096 = vpow2.f32 %v3574_v32  ;;  %v8596_v32 = vld [vmem:[#allocation8_spill] sm:$0xff] }
 0xd77   : > { %v7950_v42 = vpop.eup %5086  ;;  %v3494_v54 = vsub.f32 %v8597_v56, %v8596_v32  ;;  %5098 = vpow2.f32 %v3652_v48  ;;  %v3495_v59 = vsub.f32 %v8598_v53, %v8596_v32  ;;  %v8601_v48 = vld [vmem:[#allocation37_spill] sm:$0xff] }
 0xd78   : > { %v7956_v37 = vpop.eup %5088  ;;  %5100 = vpow2.f32 %v3654_v14  ;;  %v8602_v14 = vld [vmem:[#allocation34_spill] sm:$0xff] }
 0xd79   : > { %3681 = vadd.xlane.f32.xlu1 %v3680_v24  ;;  %v3773_v31 = vadd.f32 %v7956_v37, %v7950_v42  ;;  %v7962_v16 = vpop.eup %5090  ;;  %v3566_v12 = vmul.f32 1.442695, %v3495_v59  ;;  %v3535_v32 = vsub.f32 %v8602_v14, %v7836_v44 }
 0xd7a   : > { %8594 = vst [vmem:[#allocation17_spill] sm:$0xff] %v7962_v16  ;;  %v7964_v8 = vpop.eup %5092 }
 0xd7b   : > { %3774 = vadd.xlane.f32.xlu0 %v3773_v31  ;;  %8595 = vst [vmem:[#allocation18_spill] sm:$0xff] %v7964_v8  ;;  %v7968_v3 = vpop.eup %5094  ;;  %v3743_v24 = vadd.f32 %v7964_v8, %v7962_v16  ;;  %v3564_v31 = vmul.f32 1.442695, %v3494_v54  ;;  %v3534_v8 = vsub.f32 %v8601_v48, %v7836_v44  ;;  %v3646_v59 = vmul.f32 1.442695, %v3535_v32  ;;  %v8603_v48 = vld [vmem:[#allocation43_spill] sm:$0xff] }
 0xd7c   : > { %v7966_v28 = vpop.xlane.xlu0 %3708  ;;  %v7970_v52 = vpop.eup %5096  ;;  %v3529_v44 = vsub.f32 %v8604_v50, %v7817_v43 }
 0xd7d   : > { %v3695_v15 = vadd.f32 %v7970_v52, %v7968_v3  ;;  %v7982_v27 = vpop.eup %5098  ;;  %5102 = vpow2.f32 %v3564_v31  ;;  %v3644_v53 = vmul.f32 1.442695, %v3534_v8 }
 0xd7e   : > { %8599 = vst [vmem:[#allocation21_spill] sm:$0xff] %v7982_v27  ;;  %v7984_v56 = vpop.eup %5100  ;;  %5104 = vpow2.f32 %v3566_v12  ;;  %v3528_v12 = vsub.f32 %v8603_v48, %v7817_v43 }
 0xd7f   : > { %8600 = vst [vmem:[#allocation22_spill] sm:$0xff] %v7984_v56  ;;  %v3755_v54 = vadd.f32 %v7984_v56, %v7982_v27 }
 0xd81   : > { %3744 = vadd.xlane.f32.xlu1 %v3743_v24  ;;  %v3724_v24 = vpop.xlane.xlu1 %3723 }
 0xd82   : > { %5106 = vrcp.f32 %v3724_v24  ;;  %v3632_v24 = vmul.f32 1.442695, %v3528_v12 }
 0xd83   : > { %3696 = vadd.xlane.f32.xlu0 %v3695_v15  ;;  %v7992_v16 = vpop.eup %5102 }
 0xd84   : > { %v7980_v19 = vpop.xlane.xlu0 %3702  ;;  %v7994_v31 = vpop.eup %5104 }
 0xd85   : > { %v3689_v8 = vadd.f32 %v7994_v31, %v7992_v16 }
 0xd88   : > { %v5107_v14 = vpop.eup %5106 }
 0xd89   : > { %v3837_v48 = vmul.f32 %v5107_v14, %v7753_v61  ;;  %v3706_v56 = vpop.xlane.xlu1 %3705  ;;  %v8606_v61 = vld [vmem:[#allocation28_spill] sm:$0xff] }
 0xd8b   : > { %3756 = vadd.xlane.f32.xlu0 %v3755_v54  ;;  %v3634_v54 = vmul.f32 1.442695, %v3529_v44  ;;  %v8605_v44 = vld [vmem:[#allocation44_spill] sm:$0xff] }
 0xd8c   : > { %v3727_v15 = vpop.xlane.xlu0 %3726 }
 0xd8d   : > { %5108 = vrcp.f32 %v3727_v15  ;;  %v3836_v15 = vmul.f32 %v5107_v14, %v7749_v55  ;;  %v304_v55 = vld [vmem:[%s8194_s3 + $0x68] sm:$0xff] }
 0xd8e   : > { %5110 = vpow2.f32 %v3644_v53 }
 0xd8f   : > { %5112 = vpow2.f32 %v3646_v59 }
 0xd90   : > { %5114 = vrcp.f32 %v7920_v60 }
 0xd91   : > { %5116 = vrcp.f32 %v7858_v58  ;;  %v3526_v58 = vsub.f32 %v8605_v44, %v7819_v7 }
 0xd92   : > { %5118 = vpow2.f32 %v3632_v24 }
 0xd93   : > { %v5109_v32 = vpop.eup %5108  ;;  %3690 = vadd.xlane.f32.xlu0 %v3689_v8  ;;  %5120 = vpow2.f32 %v3634_v54  ;;  %v3628_v24 = vmul.f32 1.442695, %v3526_v58 }
 0xd94   : > { %v3838_v43 = vmul.f32 %v5109_v32, %v7821_v21  ;;  %v3839_v50 = vmul.f32 %v5109_v32, %v7823_v49  ;;  %v8008_v53 = vpop.eup %5110  ;;  %v3527_v21 = vsub.f32 %v8606_v61, %v7819_v7 }
 0xd95   : > { %v8010_v60 = vpop.eup %5112  ;;  %5122 = vpow2.f32 %v3628_v24 }
 0xd96   : > { %v3886_v59 = vpack.c.bf16 %v3838_v43, %v3836_v15  ;;  %v3887_v27 = vpack.c.bf16 %v3839_v50, %v3837_v48  ;;  %v5115_v12 = vpop.eup %5114  ;;  %v3749_v14 = vadd.f32 %v8010_v60, %v8008_v53  ;;  %v3630_v15 = vmul.f32 1.442695, %v3527_v21  ;;  %v8607_v48 = vld [vmem:[#allocation45_spill] sm:$0xff]  ;;  %v8608_v50 = vld [vmem:[#allocation46_spill] sm:$0xff] }
 0xd97   : > { %v5117_v49 = vpop.eup %5116  ;;  %v3834_v8 = vmul.f32 %v5115_v12, %v7729_v25  ;;  %v3835_v32 = vmul.f32 %v5115_v12, %v7733_v6  ;;  %v3522_v25 = vsub.f32 %v7583_v29, %v7948_v46  ;;  %v4004_v6 = vld [vmem:[%s8196_s5 + $0x10] sm:$0xff]  ;;  %v3523_v12 = vsub.f32 %v7585_v41, %v7948_v46  ;;  %v4005_v41 = vld [vmem:[%s8196_s5 + $0x18] sm:$0xff] }
 0xd98   : > { %3904 = vmatpush.bf16.xpose.msrb.mxu2 %v3886_v59  ;;  %3917 = vmatpush.bf16.xpose.msrb.mxu3 %v3887_v27  ;;  %v3832_v43 = vmul.f32 %v5117_v49, %v8607_v48  ;;  %v3833_v44 = vmul.f32 %v5117_v49, %v8608_v50  ;;  %v8025_v7 = vpop.eup %5118  ;;  %v3700_v27 = vpop.xlane.xlu1 %3699  ;;  %5124 = vpow2.f32 %v3630_v15 }
 0xd99   : > { %v8027_v54 = vpop.eup %5120  ;;  %5126 = vrcp.f32 %v7966_v28  ;;  %v3622_v29 = vmul.f32 1.442695, %v3523_v12  ;;  %v8609_v28 = vpack.c.bf16 %v7864_v2, %v7861_v45 }
 0xd9a   : > { %372 = vperm.xlu1 %4396, %v304_v55   ;;  %v3884_v59 = vpack.c.bf16 %v3834_v8, %v3832_v43  ;;  %v3885_v61 = vpack.c.bf16 %v3835_v32, %v3833_v44  ;;  %v3740_v58 = vadd.f32 %v8027_v54, %v8025_v7  ;;  %5128 = vrcp.f32 %v3706_v56 }
 0xd9b   : > { %3750 = vadd.xlane.f32.xlu0 %v3749_v14  ;;  %v3620_v55 = vmul.f32 1.442695, %v3522_v25  ;;  %v8039_v21 = vpop.eup %5122  ;;  %v8610_v56 = vpack.c.bf16 %v7870_v0, %v7867_v38 }
 0xd9d   : > { %5130 = vpow2.f32 %v3620_v55 }
 0xd9e   : > { %v8041_v49 = vpop.eup %5124  ;;  %5132 = vpow2.f32 %v3622_v29 }
 0xd9f   : > { %v5127_v14 = vpop.eup %5126  ;;  %5134 = vrcp.f32 %v7980_v19  ;;  %v3737_v32 = vadd.f32 %v8041_v49, %v8039_v21 }
 0xda0   : > { %3905 = vmatpush.bf16.xpose.msrb.mxu2 %v3884_v59  ;;  %3918 = vmatpush.bf16.xpose.msrb.mxu3 %v3885_v61  ;;  %v3694_v46 = vpop.xlane.xlu1 %3693  ;;  %v5129_v8 = vpop.eup %5128  ;;  %v3826_v24 = vmul.f32 %v5127_v14, %v7793_v22  ;;  %v3827_v15 = vmul.f32 %v5127_v14, %v7795_v63  ;;  %5136 = vrcp.f32 %v3700_v27 }
 0xda1   : > { %v3824_v45 = vmul.f32 %v5129_v8, %v7767_v33  ;;  %v3825_v2 = vmul.f32 %v5129_v8, %v7771_v1 }
 0xda2   : > { %4018 = vperm.xlu1 %4396, %v4004_v6  }
 0xda3   : > { %3741 = vadd.xlane.f32.xlu0 %v3740_v58  ;;  %v8059_v48 = vpop.eup %5130  ;;  %v3880_v0 = vpack.c.bf16 %v3826_v24, %v3824_v45  ;;  %v3881_v19 = vpack.c.bf16 %v3827_v15, %v3825_v2 }
 0xda4   : > { %v8061_v38 = vpop.eup %5132 }
 0xda5   : > { %v5135_v43 = vpop.eup %5134  ;;  %v3731_v22 = vadd.f32 %v8061_v38, %v8059_v48 }
 0xda6   : > { %v5137_v44 = vpop.eup %5136  ;;  %v3822_v63 = vmul.f32 %v5135_v43, %v7809_v51  ;;  %v3823_v33 = vmul.f32 %v5135_v43, %v7811_v34 }
 0xda7   : > { %v3820_v27 = vmul.f32 %v5137_v44, %v7787_v35  ;;  %v3821_v59 = vmul.f32 %v5137_v44, %v7791_v40 }
 0xda8   : > { %3906 = vmatpush.bf16.xpose.msrb.mxu2 %v8609_v28  ;;  %3919 = vmatpush.bf16.xpose.msrb.mxu3 %v8610_v56 }
 0xda9   : > { %v3878_v61 = vpack.c.bf16 %v3822_v63, %v3820_v27  ;;  %v3879_v25 = vpack.c.bf16 %v3823_v33, %v3821_v59 }
 0xdaa   : > { %4023 = vperm.xlu1 %4396, %v4005_v41  }
 0xdab   : > { %3738 = vadd.xlane.f32.xlu0 %v3737_v32  ;;  %v3760_v50 = vpop.xlane.xlu1 %3759 }
 0xdac   : > { %5138 = vrcp.f32 %v3760_v50 }
 0xdb0   : > { %3907 = vmatpush.bf16.xpose.msrb.mxu2 %v3880_v0  ;;  %3920 = vmatpush.bf16.xpose.msrb.mxu3 %v3881_v19 }
 0xdb2   : > { %v5139_v6 = vpop.eup %5138 }
 0xdb3   : > { %3732 = vadd.xlane.f32.xlu0 %v3731_v22  ;;  %v8070_v58 = vmul.f32 %v5139_v6, %v7844_v4  ;;  %v8076_v34 = vmul.f32 %v5139_v6, %v7846_v11  ;;  %v4003_v4 = vld [vmem:[%s8196_s5 + $0x8] sm:$0xff]  ;;  %v3685_v22 = vpop.xlane.xlu2 %3684  ;;  %v8613_v6 = vld [vmem:[#allocation33_spill] sm:$0xff] }
 0xdb4   : > { %v3763_v1 = vpop.xlane.xlu0 %3762 }
 0xdb5   : > { %5140 = vrcp.f32 %v3763_v1 }
 0xdb6   : > { %5142 = vrcp.f32 %v3694_v46 }
 0xdb8   : > { %3908 = vmatpush.bf16.xpose.msrb.mxu2 %v3878_v61  ;;  %3921 = vmatpush.bf16.xpose.msrb.mxu3 %v3879_v25 }
 0xdbb   : > { %v5141_v12 = vpop.eup %5140 }
 0xdbc   : > { %v8073_v51 = vmul.f32 %v5141_v12, %v7852_v23  ;;  %v8079_v35 = vmul.f32 %v5141_v12, %v7854_v20  ;;  %v3766_v29 = vpop.xlane.xlu1 %3765  ;;  %v5143_v32 = vpop.eup %5142 }
 0xdbd   : > { %v3816_v45 = vmul.f32 %v5143_v32, %v7805_v17  ;;  %v3817_v0 = vmul.f32 %v5143_v32, %v7807_v47  ;;  %v8611_v47 = vld [vmem:[#allocation25_spill] sm:$0xff] }
 0xdbe   : > { %v3898_v40 = vpack.c.bf16 %v8073_v51, %v8070_v58  ;;  %v3899_v55 = vpack.c.bf16 %v8079_v35, %v8076_v34 }
 0xdc4   : > { %v3769_v11 = vpop.xlane.xlu0 %3768 }
 0xdc7   : > { %4013 = vperm.xlu0 %4395, %v4003_v4   ;;  %v8614_v4 = vld [vmem:[#allocation31_spill] sm:$0xff] }
 0xdcc   : > { %v3772_v23 = vpop.xlane.xlu1 %3771 }
 0xdd4   : > { %v8088_v14 = vpop.xlane.xlu1 %3753 }
 0xddc   : > { %v3688_v41 = vpop.xlane.xlu1 %3687 }
 0xde4   : > { %v8090_v20 = vpop.xlane.xlu1 %3747 }
 0xdec   : > { %v3682_v8 = vpop.xlane.xlu1 %3681 }
 0xdee   : > { %v3775_v28 = vpop.xlane.xlu0 %3774 }
 0xdf4   : > { %v8098_v46 = vpop.xlane.xlu1 %3744 }
 0xdf6   : > { %v3697_v56 = vpop.xlane.xlu0 %3696 }
 0xdf7   : > { %5144 = vrcp.f32 %v3697_v56 }
 0xdf8   : > { %5146 = vrcp.f32 %v3688_v41 }
 0xdfd   : > { %v5145_v24 = vpop.eup %5144 }
 0xdfe   : > { %v8092_v15 = vpop.xlane.xlu0 %3756  ;;  %v3818_v2 = vmul.f32 %v5145_v24, %v7968_v3  ;;  %v3819_v19 = vmul.f32 %v5145_v24, %v7970_v52  ;;  %v5147_v63 = vpop.eup %5146  ;;  %v8612_v52 = vld [vmem:[#allocation26_spill] sm:$0xff] }
 0xdff   : > { %v3812_v27 = vmul.f32 %v5147_v63, %v7916_v30  ;;  %v3813_v61 = vmul.f32 %v5147_v63, %v7918_v9 }
 0xe00   : > { %v3876_v43 = vpack.c.bf16 %v3818_v2, %v3816_v45  ;;  %v3877_v50 = vpack.c.bf16 %v3819_v19, %v3817_v0 }
 0xe02   : > { %3909 = vmatpush.bf16.xpose.msrb.mxu2 %v3876_v43  ;;  %3922 = vmatpush.bf16.xpose.msrb.mxu3 %v3877_v50 }
 0xe06   : > { %v3691_v44 = vpop.xlane.xlu0 %3690 }
 0xe07   : > { %5148 = vrcp.f32 %v3691_v44 }
 0xe08   : > { %5150 = vrcp.f32 %v3685_v22 }
 0xe09   : > { %5152 = vrcp.f32 %v3682_v8 }
 0xe0a   : > { %5154 = vrcp.f32 %v3775_v28 }
 0xe0b   : > { %5156 = vrcp.f32 %v3772_v23 }
 0xe0c   : > { %v373_v17 = vpop.permute.xlu1 %372  ;;  %5158 = vrcp.f32 %v3769_v11 }
 0xe0d   : > { %v5149_v3 = vpop.eup %5148  ;;  %v494_v33 = vadd.f32 %v8611_v47, %v373_v17  ;;  %v538_v1 = vadd.f32 %v8612_v52, %v373_v17  ;;  %5160 = vrcp.f32 %v3766_v29 }
 0xe0e   : > { %v3814_v59 = vmul.f32 %v5149_v3, %v7992_v16  ;;  %v3815_v25 = vmul.f32 %v5149_v3, %v7994_v31  ;;  %v5151_v28 = vpop.eup %5150  ;;  %v3751_v17 = vpop.xlane.xlu0 %3750  ;;  %5162 = vrcp.f32 %v8092_v15  ;;  %v8616_v3 = vld [vmem:[#allocation21_spill] sm:$0xff]  ;;  %v8618_v15 = vld [vmem:[#allocation36_spill] sm:$0xff] }
 0xe0f   : > { %v8107_v12 = vmul.f32 %v8613_v6, %v494_v33  ;;  %v8110_v41 = vmul.f32 %v8614_v4, %v538_v1  ;;  %v5153_v8 = vpop.eup %5152  ;;  %v3810_v45 = vmul.f32 %v5151_v28, %v7719_v39  ;;  %v3811_v2 = vmul.f32 %v5151_v28, %v7721_v10  ;;  %v3736_v4 = vpop.xlane.xlu2 %3735 }
 0xe10   : > { %v3874_v23 = vpack.c.bf16 %v3814_v59, %v3812_v27  ;;  %v3875_v56 = vpack.c.bf16 %v3815_v25, %v3813_v61  ;;  %v5155_v32 = vpop.eup %5154  ;;  %v3808_v16 = vmul.f32 %v5153_v8, %v7944_v26  ;;  %v3809_v9 = vmul.f32 %v5153_v8, %v7946_v57  ;;  %v8620_v61 = vld [vmem:[#allocation19_spill] sm:$0xff]  ;;  %v8621_v25 = vld [vmem:[#allocation20_spill] sm:$0xff] }
 0xe11   : > { %v5157_v30 = vpop.eup %5156  ;;  %v3870_v31 = vmul.f32 %v5155_v32, %v7950_v42  ;;  %v3871_v24 = vmul.f32 %v5155_v32, %v7956_v37  ;;  %v8122_v37 = vpack.c.bf16 %v494_v33, %v494_v33  ;;  %v8124_v10 = vpack.c.bf16 %v538_v1, %v538_v1  ;;  %v8617_v33 = vld [vmem:[#allocation22_spill] sm:$0xff]  ;;  %v8619_v1 = vld [vmem:[#allocation51_spill] sm:$0xff] }
 0xe12   : > { %3910 = vmatpush.bf16.xpose.msrb.mxu2 %v3874_v23  ;;  %3923 = vmatpush.bf16.xpose.msrb.mxu3 %v3875_v56  ;;  %v3868_v0 = vmul.f32 %v5157_v30, %v7896_v36  ;;  %v3869_v19 = vmul.f32 %v5157_v30, %v7900_v5  ;;  %v3872_v43 = vpack.c.bf16 %v3810_v45, %v3808_v16  ;;  %v5159_v26 = vpop.eup %5158  ;;  %v8615_v5 = vld [vmem:[#allocation24_spill] sm:$0xff]  ;;  %5164 = vrcp.f32 %v8088_v14  ;;  %v8623_v30 = vld [vmem:[#allocation18_spill] sm:$0xff] }
 0xe13   : > { %v3873_v50 = vpack.c.bf16 %v3811_v2, %v3809_v9  ;;  %v5161_v57 = vpop.eup %5160  ;;  %v3866_v42 = vmul.f32 %v5159_v26, %v7886_v18  ;;  %v3867_v39 = vmul.f32 %v5159_v26, %v7890_v13  ;;  %5166 = vrcp.f32 %v3751_v17 }
 0xe14   : > { %v3902_v11 = vpack.c.bf16 %v3870_v31, %v3868_v0  ;;  %v3903_v44 = vpack.c.bf16 %v3871_v24, %v3869_v19  ;;  %v3864_v36 = vmul.f32 %v5161_v57, %v7878_v62  ;;  %v3865_v29 = vmul.f32 %v5161_v57, %v8615_v5  ;;  %v5163_v18 = vpop.eup %5162  ;;  %v8626_v5 = vld [vmem:[#allocation39_spill] sm:$0xff] }
 0xe15   : > { %v3858_v47 = vmul.f32 %v5163_v18, %v8616_v3  ;;  %v3859_v52 = vmul.f32 %v5163_v18, %v8617_v33  ;;  %5168 = vrcp.f32 %v8090_v20 }
 0xe16   : > { %v3900_v22 = vpack.c.bf16 %v3866_v42, %v3864_v36  ;;  %v3901_v63 = vpack.c.bf16 %v3867_v39, %v3865_v29  ;;  %v3742_v13 = vpop.xlane.xlu0 %3741 }
 0xe17   : > { %5170 = vrcp.f32 %v3742_v13  ;;  %v3730_v2 = vpop.xlane.xlu2 %3729  ;;  %v8628_v13 = vld [vmem:[#allocation11_spill] sm:$0xff] }
 0xe18   : > { %v5165_v62 = vpop.eup %5164  ;;  %5172 = vrcp.f32 %v8098_v46 }
 0xe19   : > { %v3856_v14 = vmul.f32 %v5165_v62, %v8618_v15  ;;  %v3857_v27 = vmul.f32 %v5165_v62, %v8619_v1  ;;  %v5167_v51 = vpop.eup %5166  ;;  %v4380_v15 = vld [vmem:[%s8195_s4] sm:$0xff] }
 0xe1a   : > { %3911 = vmatpush.bf16.xpose.msrb.mxu2 %v3872_v43  ;;  %3924 = vmatpush.bf16.xpose.msrb.mxu3 %v3873_v50  ;;  %v3854_v35 = vmul.f32 %v5167_v51, %v8008_v53  ;;  %v8625_v50 = vld [vmem:[#allocation6_spill] sm:$0xff] }
 0xe1b   : > { %v3896_v59 = vpack.c.bf16 %v3858_v47, %v3856_v14  ;;  %v3897_v58 = vpack.c.bf16 %v3859_v52, %v3857_v27  ;;  %v5169_v34 = vpop.eup %5168  ;;  %v8630_v14 = vld [vmem:[#allocation52_spill] sm:$0xff] }
 0xe1c   : > { %v3852_v20 = vmul.f32 %v5169_v34, %v8620_v61  ;;  %v3853_v6 = vmul.f32 %v5169_v34, %v8621_v25  ;;  %v8636_v25 = vld [vmem:[#allocation30_spill] sm:$0xff] }
 0xe1d   : > { %v5171_v56 = vpop.eup %5170 }
 0xe1e   : > { %v3894_v28 = vpack.c.bf16 %v3854_v35, %v3852_v20  ;;  %v5173_v8 = vpop.eup %5172  ;;  %v3848_v32 = vmul.f32 %v5171_v56, %v8025_v7  ;;  %v3849_v53 = vmul.f32 %v5171_v56, %v8027_v54  ;;  %v8624_v54 = vld [vmem:[#allocation5_spill] sm:$0xff]  ;;  %v8634_v35 = vld [vmem:[#allocation47_spill] sm:$0xff]  ;;  %v8635_v20 = vld [vmem:[#allocation32_spill] sm:$0xff] }
 0xe1f   : > { %v3851_v16 = vmul.f32 %v5173_v8, %v8623_v30 }
 0xe21   : > { %3912 = vmatmul.bf16.vlgmr.msrb.gmra.mxu2 %v8122_v37  ;;  %3925 = vmatmul.bf16.vlgmr.msrb.gmra.mxu3 %v8124_v10  ;;  %v3893_v24 = vpack.c.bf16 %v3851_v16, %v3849_v53 }
 0xe22   : > { %3930 = vmatpush.bf16.xpose.msra.mxu2 %v3902_v11  ;;  %3943 = vmatpush.bf16.xpose.msra.mxu3 %v3903_v44 }
 0xe2a   : > { %3931 = vmatpush.bf16.xpose.msra.mxu2 %v3900_v22  ;;  %3944 = vmatpush.bf16.xpose.msra.mxu3 %v3901_v63 }
 0xe32   : > { %3932 = vmatpush.bf16.xpose.msra.mxu2 %v3898_v40  ;;  %3945 = vmatpush.bf16.xpose.msra.mxu3 %v3899_v55  ;;  %v3855_v40 = vmul.f32 %v5167_v51, %v8010_v60  ;;  %v3739_v55 = vpop.xlane.xlu0 %3738  ;;  %v8622_v60 = vld [vmem:[#allocation17_spill] sm:$0xff] }
 0xe33   : > { %5174 = vrcp.f32 %v3739_v55  ;;  %v3850_v46 = vmul.f32 %v5173_v8, %v8622_v60 }
 0xe34   : > { %v3895_v23 = vpack.c.bf16 %v3855_v40, %v3853_v6  ;;  %5176 = vrcp.f32 %v3736_v4  ;;  %v8637_v6 = vpack.c.bf16 %v8635_v20, %v8636_v25  ;;  %v4009_v4 = vpop.permute.xlu2 %4008 }
 0xe35   : > { %v3892_v31 = vpack.c.bf16 %v3850_v46, %v3848_v32  ;;  %v4019_v32 = vpop.permute.xlu1 %4018 }
 0xe39   : > { %v5175_v45 = vpop.eup %5174 }
 0xe3a   : > { %3933 = vmatpush.bf16.xpose.msra.mxu2 %v3896_v59  ;;  %3946 = vmatpush.bf16.xpose.msra.mxu3 %v3897_v58  ;;  %v3733_v9 = vpop.xlane.xlu0 %3732  ;;  %v5177_v0 = vpop.eup %5176  ;;  %v3846_v19 = vmul.f32 %v5175_v45, %v8039_v21  ;;  %v3847_v7 = vmul.f32 %v5175_v45, %v8041_v49  ;;  %v8627_v21 = vld [vmem:[#allocation23_spill] sm:$0xff]  ;;  %v8633_v58 = vld [vmem:[#allocation12_spill] sm:$0xff] }
 0xe3b   : > { %5178 = vrcp.f32 %v3733_v9  ;;  %v3844_v43 = vmul.f32 %v5177_v0, %v8624_v54  ;;  %v3845_v11 = vmul.f32 %v5177_v0, %v8625_v50 }
 0xe3c   : > { %5180 = vrcp.f32 %v3730_v2 }
 0xe3d   : > { %v3890_v44 = vpack.c.bf16 %v3846_v19, %v3844_v43  ;;  %v3891_v26 = vpack.c.bf16 %v3847_v7, %v3845_v11  ;;  %v4024_v46 = vpop.permute.xlu1 %4023 }
 0xe41   : > { %v5179_v57 = vpop.eup %5178 }
 0xe42   : > { %3934 = vmatpush.bf16.xpose.msra.mxu2 %v3894_v28  ;;  %3947 = vmatpush.bf16.xpose.msra.mxu3 %v3895_v23  ;;  %v5181_v42 = vpop.eup %5180  ;;  %v3842_v39 = vmul.f32 %v5179_v57, %v8059_v48  ;;  %v3843_v36 = vmul.f32 %v5179_v57, %v8061_v38  ;;  %v8629_v38 = vld [vmem:[#allocation49_spill] sm:$0xff]  ;;  %v4014_v23 = vpop.permute.xlu0 %4013 }
 0xe43   : > { %v3840_v29 = vmul.f32 %v5181_v42, %v8626_v5  ;;  %v3841_v22 = vmul.f32 %v5181_v42, %v8627_v21 }
 0xe45   : > { %v3888_v49 = vpack.c.bf16 %v3842_v39, %v3840_v29  ;;  %v3889_v63 = vpack.c.bf16 %v3843_v36, %v3841_v22 }
 0xe4a   : > { %3935 = vmatpush.bf16.xpose.msra.mxu2 %v3892_v31  ;;  %3948 = vmatpush.bf16.xpose.msra.mxu3 %v3893_v24 }
 0xe52   : > { %3936 = vmatpush.bf16.xpose.msra.mxu2 %v3890_v44  ;;  %3949 = vmatpush.bf16.xpose.msra.mxu3 %v3891_v26 }
 0xe5a   : > { %3937 = vmatpush.bf16.xpose.msra.mxu2 %v3888_v49  ;;  %3950 = vmatpush.bf16.xpose.msra.mxu3 %v3889_v63 }
 0xe61   : > { %3938 = vmatmul.bf16.vlgmr.msra.gmra.mxu2 %v8122_v37  ;;  %3951 = vmatmul.bf16.vlgmr.msra.gmra.mxu3 %v8124_v10  ;;  %v8631_v37 = vld [vmem:[#allocation29_spill] sm:$0xff] }
 0xe62   : > { %v8632_v1 = vpack.c.bf16 %v8630_v14, %v8631_v37 }
 0xea4   : > { %v3913_v17 = vpop.f32.mrf.mxu2  ;;  %v3926_v18 = vpop.f32.mrf.mxu3 }
 0xea5   : > { %v3927_v62 = vadd.f32 %v3926_v18, %v3913_v17 }
 0xea7   : > { %v3972_v3 = vmul.f32 %v3927_v62, %v8628_v13 }
 0xea9   : > { %v3992_v48 = vadd.f32 %v8107_v12, %v3972_v3  ;;  %v4381_v12 = vld [vmem:[%s8195_s4 + $0x8] sm:$0xff] }
 0xeab   : > { %v4000_v47 = vpack.c.bf16 %v3992_v48, %v8629_v38 }
 0xeac   : > { %v3915_v33 = vpop.f32.mrf.mxu2  ;;  %v3928_v52 = vpop.f32.mrf.mxu3 }
 0xead   : > { %4048 = vmatpush.bf16.msrb.mxu2 %v4000_v47 }
 0xeb1   : > { %4049 = vmatpush.bf16.msrb.mxu2 %v8632_v1 }
 0xeb4   : > { %4360 = vmatmul.msk.bf16.vlgmr.msrb.gmra.mxu2 %vm430_vm0, %v4380_v15 }
 0xec4   : > { %4361 = vmatmul.msk.bf16.gmra.mxu2 %vm430_vm0, %v4381_v12 }
 0xee4   : > { %v3939_v10 = vpop.f32.mrf.mxu2  ;;  %v3952_v27 = vpop.f32.mrf.mxu3 }
 0xee5   : > { %v3953_v59 = vadd.f32 %v3952_v27, %v3939_v10 }
 0xee7   : > { %v3973_v51 = vmul.f32 %v3953_v59, %v8633_v58 }
 0xee9   : > { %v3993_v34 = vadd.f32 %v8110_v41, %v3973_v51 }
 0xeeb   : > { %v4001_v40 = vpack.c.bf16 %v3993_v34, %v8634_v35 }
 0xeec   : > { %v3941_v55 = vpop.f32.mrf.mxu2  ;;  %v3954_v61 = vpop.f32.mrf.mxu3 }
 0xeed   : > { %4067 = vmatpush.bf16.msrb.mxu3 %v4001_v40 }
 0xef1   : > { %4068 = vmatpush.bf16.msrb.mxu3 %v8637_v6 }
 0xef4   : > { %4362 = vmatmul.msk.bf16.vlgmr.msrb.gmra.mxu3 %vm430_vm0, %v4380_v15 }
 0xf04   : > { %4363 = vmatmul.msk.bf16.gmra.mxu3 %vm430_vm0, %v4381_v12 }
 0xf37   : > { %v4051_v41 = vpop.f32.mrf.mxu2 }
 0xf38   : > { %v4052_v28 = vadd.f32 %v4051_v41, %v4009_v4 }
 0xf3a   : > { %4080 = vst [vmem:[%s271_s19] sm:$0xff] %v4052_v28 }
 0xf3f   : > { %v4053_v56 = vpop.f32.mrf.mxu2 }
 0xf40   : > { %v4054_v8 = vadd.f32 %v4053_v56, %v4014_v23 }
 0xf42   : > { %4082 = vst [vmem:[%s271_s19 + $0x10] sm:$0xff] %v4054_v8 }
 0xf47   : > { %v4056_v53 = vpop.f32.mrf.mxu2 }
 0xf48   : > { %v4057_v60 = vadd.f32 %v4056_v53, %v4019_v32 }
 0xf4a   : > { %4084 = vst [vmem:[%s271_s19 + $0x20] sm:$0xff] %v4057_v60 }
 0xf4f   : > { %v4058_v30 = vpop.f32.mrf.mxu2 }
 0xf50   : > { %v4059_v16 = vadd.f32 %v4058_v30, %v4024_v46 }
 0xf52   : > { %4086 = vst [vmem:[%s271_s19 + $0x30] sm:$0xff] %v4059_v16 }
 0xf77   : > { %v4070_v9 = vpop.f32.mrf.mxu3 }
 0xf78   : > { %v4071_v31 = vadd.f32 %v4070_v9, %v4009_v4 }
 0xf7a   : > { %4081 = vst [vmem:[%s271_s19 + $0x8] sm:$0xff] %v4071_v31 }
 0xf7f   : > { %v4072_v24 = vpop.f32.mrf.mxu3 }
 0xf80   : > { %v4073_v45 = vadd.f32 %v4072_v24, %v4014_v23 }
 0xf82   : > { %4083 = vst [vmem:[%s271_s19 + $0x18] sm:$0xff] %v4073_v45 }
 0xf87   : > { %v4075_v2 = vpop.f32.mrf.mxu3 }
 0xf88   : > { %v4076_v0 = vadd.f32 %v4075_v2, %v4019_v32 }
 0xf8a   : > { %4085 = vst [vmem:[%s271_s19 + $0x28] sm:$0xff] %v4076_v0 }
 0xf8f   : > { %v4077_v19 = vpop.f32.mrf.mxu3 }
 0xf90   : > { %v4078_v7 = vadd.f32 %v4077_v19, %v4024_v46 }
 0xf92   : > { %4087 = vst [vmem:[%s271_s19 + $0x38] sm:$0xff] %v4078_v7 }
 0xf93 PF: > { %s16_s21 = sadd.s32 1, %s5188_s21  }
 0xf94   : > { %p13_p4 = scmp.ge.s32.totalorder %s16_s21, 4  }
 0xf96   :  { %15 = sbr.rel (!%p13_p4) target bundleno = 1 (0x1), region = 77 }

</bundles_post_ra>
